<compile_context>
chip_gen: v7x
topology: tpu7x:2x2x1
jax: 0.10.0
libtpu: 0.0.40
codegen_flags: <defaults>
</compile_context>

<pallas_src>
import math
import functools

import jax
import jax.numpy as jnp
from jax.experimental import pallas as pl
from jax.experimental.pallas import tpu as pltpu

BF16 = jnp.bfloat16


# ----------------------------------------------------------------------------
# Small helpers
# ----------------------------------------------------------------------------

def _round_up(n, m):
    return ((n + m - 1) // m) * m


def _tpu_vmem_bytes():
    try:
        return int(pltpu.get_tpu_info().vmem_capacity_bytes)
    except Exception:
        return 64 << 20                      # conservative (v7x) fallback


def _full_spec(arr):
    """Whole-array block replicated across the grid (weights / biases)."""
    nd = arr.ndim
    return pl.BlockSpec(arr.shape, lambda *_: (0,) * nd)


def _row_spec(tile, c):
    return pl.BlockSpec((1, tile, c), lambda b, t: (b, t, 0))


def _nbr_spec(k, tile, c):
    return pl.BlockSpec((1, k, tile, c), lambda b, t: (b, 0, t, 0))


# ----------------------------------------------------------------------------
# Kernel 1: EncodeNet layer-1 "neighbor" term u1 = pos @ Wn1  (bf16 out, Cin=3 FMAs)
# ----------------------------------------------------------------------------

def encode_u1(pos_cl, wn1, *, tile, vmem_limit):
    B, Np, _ = pos_cl.shape
    cout = wn1.shape[1]

    def kern(p_ref, w_ref, u_ref):
        p = p_ref[0]                                  # (T, 3) f32
        w = w_ref[...]                                # (3, cout) f32
        u = p[:, 0:1] * w[0:1] + p[:, 1:2] * w[1:2] + p[:, 2:3] * w[2:3]
        u_ref[0] = u.astype(u_ref.dtype)

    return pl.pallas_call(
        kern,
        out_shape=jax.ShapeDtypeStruct((B, Np, cout), BF16),
        grid=(B, Np // tile),
        in_specs=[_row_spec(tile, 3), _full_spec(wn1)],
        out_specs=_row_spec(tile, cout),
        compiler_params=pltpu.CompilerParams(
            dimension_semantics=("parallel", "parallel"),
            vmem_limit_bytes=vmem_limit),
    )(pos_cl, wn1)


# ----------------------------------------------------------------------------
# Kernel 2: layer-1 edge max-combine (base1 recomputed from pos) fused with the
#           layer-2 per-point matmul -> single bf16 (B, N, 48) output [base2 | u2]
# ----------------------------------------------------------------------------

def encode_layer2(pos_cl, u1_nbr, wb1, b1, w2f, b2f, *, tile, vmem_limit):
    B, Np, _ = pos_cl.shape
    K = u1_nbr.shape[1]
    cmid = wb1.shape[1]                               # 24
    cout = w2f.shape[1]                               # 48

    def kern(p_ref, nbr_ref, wb_ref, b1_ref, w2_ref, b2_ref, o_ref):
        p = p_ref[0]                                  # (T, 3) f32
        wb = wb_ref[...]                              # (3, 24) = Wc1 - Wn1
        base = (p[:, 0:1] * wb[0:1] + p[:, 1:2] * wb[1:2] + p[:, 2:3] * wb[2:3]
                + b1_ref[...])                        # (T, 24) f32
        x = jnp.maximum(base + nbr_ref[0, 0].astype(jnp.float32), 0.0)
        for k in range(1, K):                         # static unroll over knn
            x = jnp.maximum(x, jnp.maximum(base + nbr_ref[0, k].astype(jnp.float32), 0.0))
        # single (T,24)@(24,48) matmul = [ x1@(Wc2-Wn2)+b2 | x1@Wn2 ]
        o_ref[0] = (jnp.dot(x.astype(BF16), w2_ref[...],
                            preferred_element_type=jnp.float32)
                    + b2_ref[...]).astype(o_ref.dtype)

    return pl.pallas_call(
        kern,
        out_shape=jax.ShapeDtypeStruct((B, Np, cout), BF16),
        grid=(B, Np // tile),
        in_specs=[_row_spec(tile, 3), _nbr_spec(K, tile, cmid),
                  _full_spec(wb1), _full_spec(b1), _full_spec(w2f), _full_spec(b2f)],
        out_specs=_row_spec(tile, cout),
        compiler_params=pltpu.CompilerParams(
            dimension_semantics=("parallel", "parallel"),
            vmem_limit_bytes=vmem_limit),
    )(pos_cl, u1_nbr, wb1, b1, w2f, b2f)


# ----------------------------------------------------------------------------
# Kernel 3: fused per-point chain (layer-2 edge combine -> code, FusionNet, conv_1)
# ----------------------------------------------------------------------------

def fused_point_mlp(pos_cl, cu2, u2_nbr, chain_w, *, tile, vmem_limit):
    B, Np, _ = pos_cl.shape
    C2 = cu2.shape[-1]                                # 48
    ccode = u2_nbr.shape[-1]                          # 24
    K = u2_nbr.shape[1]
    d_y = chain_w[-1].shape[-1]                       # conv_1 output width (128)

    def kern(pos_ref, cu_ref, nbr_ref, *refs):
        *w_refs, o_ref = refs
        (m0w, m0b, m1w, m1b,
         w0p, w0c, b0, w1, b1, w2, b2,
         w3x, w3p, w3c, b3, w4, b4,
         wyc, wyy, by) = w_refs

        # -- EncodeNet layer-2 edge max -> code (T, 24); base2 precomputed in kernel 2
        base = cu_ref[0][:, :ccode].astype(jnp.float32)
        code = jnp.maximum(base + nbr_ref[0, 0].astype(jnp.float32), 0.0)
        for k in range(1, K):
            code = jnp.maximum(code,
                               jnp.maximum(base + nbr_ref[0, k].astype(jnp.float32), 0.0))
        code_b = code.astype(BF16)

        # -- FusionNet mlp_1: Conv1d(3,64)+ReLU as VPU FMAs, then Conv1d(64,64)
        p3 = pos_ref[0]                               # (T, 3)
        m0 = m0w[...]                                 # (3, 64) f32
        h0 = jnp.maximum(p3[:, 0:1] * m0[0:1] + p3[:, 1:2] * m0[1:2]
                         + p3[:, 2:3] * m0[2:3] + m0b[...], 0.0)
        p = jnp.dot(h0.astype(BF16), m1w[...],
                    preferred_element_type=jnp.float32) + m1b[...]   # (T, 64)
        p_b = p.astype(BF16)

        # -- lin0 : cat([p, code]) @ W  ->  split matmul
        x = (jnp.dot(p_b, w0p[...], preferred_element_type=jnp.float32)
             + jnp.dot(code_b, w0c[...], preferred_element_type=jnp.float32))
        x = jnp.maximum(x + b0[...], 0.0)
        # -- lin1, lin2
        x = jnp.maximum(jnp.dot(x.astype(BF16), w1[...],
                                preferred_element_type=jnp.float32) + b1[...], 0.0)
        x = jnp.maximum(jnp.dot(x.astype(BF16), w2[...],
                                preferred_element_type=jnp.float32) + b2[...], 0.0)
        # -- lin3 (skip layer): cat([x, p, code]) @ W  ->  split matmul
        x = (jnp.dot(x.astype(BF16), w3x[...], preferred_element_type=jnp.float32)
             + jnp.dot(p_b, w3p[...], preferred_element_type=jnp.float32)
             + jnp.dot(code_b, w3c[...], preferred_element_type=jnp.float32))
        x = jnp.maximum(x + b3[...], 0.0)
        # -- lin4 (no relu) -> yy (64)
        yy = jnp.dot(x.astype(BF16), w4[...],
                     preferred_element_type=jnp.float32) + b4[...]
        # -- conv_1: cat([code, yy]) @ W + ReLU  ->  split matmul
        y = (jnp.dot(code_b, wyc[...], preferred_element_type=jnp.float32)
             + jnp.dot(yy.astype(BF16), wyy[...], preferred_element_type=jnp.float32)
             + by[...])
        o_ref[0] = jnp.maximum(y, 0.0).astype(o_ref.dtype)

    in_specs = ([_row_spec(tile, 3), _row_spec(tile, C2), _nbr_spec(K, tile, ccode)]
                + [_full_spec(w) for w in chain_w])
    return pl.pallas_call(
        kern,
        out_shape=jax.ShapeDtypeStruct((B, Np, d_y), BF16),
        grid=(B, Np // tile),
        in_specs=in_specs,
        out_specs=_row_spec(tile, d_y),
        compiler_params=pltpu.CompilerParams(
            dimension_semantics=("parallel", "parallel"),
            vmem_limit_bytes=vmem_limit),
    )(pos_cl, cu2, u2_nbr, *chain_w)


# ----------------------------------------------------------------------------
# Kernel 4: fused tail -- dist_w, streamed pconv1 pool over N (accumulator pattern),
#           pconv1..5 + residuals + conv_2/conv_3 on the small head rows at the end.
# ----------------------------------------------------------------------------

def pile_tail(ab, pos_cl, y, pos_head, y_head, num_pcl, n_valid, tail_w, *,
              tile, vmem_limit):
    B, Np, C1 = y.shape
    half = num_pcl // 2
    n_head = 2 * num_pcl
    d_out = tail_w[-2].shape[-1]                      # conv_3 output width (128)

    def kern(ab_ref, pos_ref, y_ref, ph_ref, yh_ref, *refs):
        *w_refs, o_ref, dwh_ref, pool_ref, wsum_ref = refs
        (w1l, w1g, b1, w2l, w2g, b2, w3l, w3g, b3,
         w4l, w4g, b4, w5l, w5g, b5, wc2, bc2, wc3, bc3) = w_refs

        t = pl.program_id(1)

        @pl.when(t == 0)
        def _():
            pool_ref[...] = jnp.zeros_like(pool_ref)
            wsum_ref[...] = jnp.zeros_like(wsum_ref)

        alpha, beta = ab_ref[0], ab_ref[1]
        # per-tile distance weights, masked for padded rows
        p = pos_ref[0]                                               # (T, 3)
        dist = jnp.sqrt(jnp.sum(p * p, axis=-1, keepdims=True))      # (T, 1)
        w = jax.nn.sigmoid(-alpha * dist + beta)
        row = jax.lax.broadcasted_iota(jnp.int32, (tile, 1), 0) + t * tile
        w = jnp.where(row < n_valid, w, 0.0)
        # streamed weighted pool for pconv1 (VPU multiply + sublane reduce, no M=1 MXU)
        yv = y_ref[0].astype(jnp.float32)                            # (T, 128)
        pool_ref[...] += jnp.sum(w * yv, axis=0, keepdims=True)      # (1, 128)
        wsum_ref[...] += jnp.sum(w, keepdims=True)                   # (1, 1)

        @pl.when(t == pl.num_programs(1) - 1)
        def _():
            Wv = wsum_ref[...]                                       # (1, 1) = sum w
            S = Wv + (Wv == 0.0).astype(jnp.float32) + 1e-6
            scale = float(n_valid) / S                               # dw_i = w_i * scale

            # head dist weights (first 2*num_pcl valid points), reused by pconv2..5
            ph = ph_ref[0]                                           # (n_head, 3)
            dh = jnp.sqrt(jnp.sum(ph * ph, axis=-1, keepdims=True))
            wh = jax.nn.sigmoid(-alpha * dh + beta)
            dwh = wh * scale                                         # (n_head, 1)
            dwh_ref[0] = dwh[:half].astype(dwh_ref.dtype)

            # -- pconv1: streamed global pool + local head rows
            g1 = (pool_ref[...] * scale) / (Wv * scale + 1e-6)       # (1, 128)
            pooled1 = jnp.dot(g1.astype(BF16), w1g[...],
                              preferred_element_type=jnp.float32)
            local1 = jnp.dot(yh_ref[0], w1l[...],
                             preferred_element_type=jnp.float32)     # (n_head, 256)
            y1 = jnp.maximum(local1 + pooled1 + b1[...], 0.0)

            def pile(x, n_out, wl, wg, b):
                # PileConv with split matmul: [x_local, g] @ W == x_local@Wl + g@Wg
                L = x.shape[0]
                d = dwh[:L]                                          # (L, 1)
                g = (jnp.sum(d * x, axis=0, keepdims=True)
                     / (jnp.sum(d, keepdims=True) + 1e-6))           # (1, C)
                pooled = jnp.dot(g.astype(BF16), wg[...],
                                 preferred_element_type=jnp.float32)
                local = jnp.dot(x[:n_out].astype(BF16), wl[...],
                                preferred_element_type=jnp.float32)
                return jnp.maximum(local + pooled + b[...], 0.0)

            y2 = pile(y1, num_pcl, w2l, w2g, b2) + y1[:num_pcl]      # fused residual
            y3 = pile(y2, num_pcl, w3l, w3g, b3)
            y4 = pile(y3, half, w4l, w4g, b4) + y3[:half]            # fused residual
            y5 = pile(y4, half, w5l, w5g, b5)
            # conv_2 / conv_3 (Conv1D = 1x1 conv + ReLU)
            z = jnp.maximum(jnp.dot(y5.astype(BF16), wc2[...],
                                    preferred_element_type=jnp.float32) + bc2[...], 0.0)
            z = jnp.maximum(jnp.dot(z.astype(BF16), wc3[...],
                                    preferred_element_type=jnp.float32) + bc3[...], 0.0)
            o_ref[0] = z.astype(o_ref.dtype)

    in_specs = ([pl.BlockSpec(memory_space=pltpu.MemorySpace.SMEM),           # alpha,beta
                 pl.BlockSpec((1, tile, 3), lambda b, t: (b, t, 0)),          # pos tiles
                 pl.BlockSpec((1, tile, C1), lambda b, t: (b, t, 0)),         # y tiles
                 pl.BlockSpec((1, n_head, 3), lambda b, t: (b, 0, 0)),        # pos head
                 pl.BlockSpec((1, n_head, C1), lambda b, t: (b, 0, 0))]       # y head
                + [_full_spec(w) for w in tail_w])
    out_specs = (pl.BlockSpec((1, half, d_out), lambda b, t: (b, 0, 0)),
                 pl.BlockSpec((1, half, 1), lambda b, t: (b, 0, 0)))
    return pl.pallas_call(
        kern,
        out_shape=(jax.ShapeDtypeStruct((B, half, d_out), jnp.float32),
                   jax.ShapeDtypeStruct((B, half, 1), jnp.float32)),
        grid=(B, Np // tile),
        in_specs=in_specs,
        out_specs=out_specs,
        scratch_shapes=[pltpu.VMEM((1, C1), jnp.float32),
                        pltpu.VMEM((1, 1), jnp.float32)],
        compiler_params=pltpu.CompilerParams(
            dimension_semantics=("parallel", "arbitrary"),
            vmem_limit_bytes=vmem_limit),
    )(ab, pos_cl, y, pos_head, y_head, *tail_w)


# ----------------------------------------------------------------------------
# Plain-JAX glue (gathers, weight splitting)
# ----------------------------------------------------------------------------

def gather_kmajor(x, knn_idx):
    """x: (B, N, C), knn_idx: (B, N, K) -> (B, K, N, C) (K-major: clean in-kernel slabs)."""
    B, N, C = x.shape
    K = knn_idx.shape[-1]
    idx = jnp.transpose(knn_idx, (0, 2, 1)).reshape(B, K * N, 1)
    nbr = jnp.take_along_axis(x, idx, axis=1)
    return nbr.reshape(B, K, N, C)


def _prep_weights(params):
    f = lambda w: w.astype(BF16)
    rb = lambda b: b.reshape(1, -1).astype(jnp.float32)
    w0, w1 = params['enc_w0'], params['enc_w1']
    enc = dict(
        wn1=w0[3:].astype(jnp.float32),                         # u1 FMA weight
        wb1=(w0[:3] - w0[3:]).astype(jnp.float32),              # base1 = pos@(Wc1-Wn1)+b1
        b1=rb(params['enc_b0']),
        # fused layer-2 weight/bias: one (24,48) matmul -> [base2 | u2]
        w2f=f(jnp.concatenate([w1[:24] - w1[24:], w1[24:]], axis=1)),
        b2f=jnp.concatenate([params['enc_b1'],
                             jnp.zeros_like(params['enc_b1'])]).reshape(1, -1)
            .astype(jnp.float32),
    )
    # Fused chain weights (order must match the kernel unpack).  Row-splits of the
    # concat weights: lin0 (64 p | 24 code), lin3 (40 x | 64 p | 24 code),
    # conv_1 (24 code | 64 yy).
    chain = (
        params['mlp1_w0'].astype(jnp.float32), rb(params['mlp1_b0']),
        f(params['mlp1_w1']), rb(params['mlp1_b1']),
        f(params['lin0_w'][:64]), f(params['lin0_w'][64:]), rb(params['lin0_b']),
        f(params['lin1_w']), rb(params['lin1_b']),
        f(params['lin2_w']), rb(params['lin2_b']),
        f(params['lin3_w'][:40]), f(params['lin3_w'][40:104]), f(params['lin3_w'][104:]),
        rb(params['lin3_b']),
        f(params['lin4_w']), rb(params['lin4_b']),
        f(params['conv1_w'][:24]), f(params['conv1_w'][24:]), rb(params['conv1_b']),
    )

    def pile_split(wn, bn, cin):                                 # (local | global) rows
        return (f(params[wn][:cin]), f(params[wn][cin:]), rb(params[bn]))

    tail = (pile_split('pconv1_w', 'pconv1_b', 128)
            + pile_split('pconv2_w', 'pconv2_b', 256)
            + pile_split('pconv3_w', 'pconv3_b', 256)
            + pile_split('pconv4_w', 'pconv4_b', 256)
            + pile_split('pconv5_w', 'pconv5_b', 256)
            + (f(params['conv2_w']), rb(params['conv2_b']),
               f(params['conv3_w']), rb(params['conv3_b'])))
    ab = jnp.concatenate([params['alpha'], params['beta']]).astype(jnp.float32)
    return enc, chain, tail, ab


@functools.partial(jax.jit, static_argnums=(2,))
def point_encoder_forward(params, pos, num_pcl, knn_idx):
    """pos: (B, 3, N) float32, knn_idx: (B, N, K) int32, num_pcl: python int."""
    B, _, N = pos.shape
    half = num_pcl // 2
    n_head = 2 * num_pcl

    # tiling / padding config from VMEM capacity (v5e/v6e: big tiles, v7x: 512)
    vmem_cap = _tpu_vmem_bytes()
    vmem_limit = int(min(vmem_cap * 3 // 4, 100 << 20))
    max_tile = 1024 if vmem_cap >= (100 << 20) else 512
    if N <= 256:
        Np = _round_up(N, 8)
        t_pts = Np
    else:
        Np = _round_up(N, 256)
        t_pts = max_tile
        while Np % t_pts:
            t_pts //= 2
    t_mlp = 256 if (Np % 256 == 0 and t_pts > 256) else t_pts    # vreg-pressure cap

    enc, chain_w, tail_w, ab = _prep_weights(params)
    pos_cl = jnp.transpose(pos, (0, 2, 1))                       # (B, N, 3)
    if Np != N:
        pos_cl = jnp.pad(pos_cl, ((0, 0), (0, Np - N), (0, 0)))
        knn_idx = jnp.pad(knn_idx, ((0, 0), (0, Np - N), (0, 0)))

    # EncodeNet (2 edge convs) with per-edge matmuls factored out via linearity.
    u1 = encode_u1(pos_cl, enc['wn1'], tile=t_pts, vmem_limit=vmem_limit)     # bf16
    # TODO(synk): knn gather stays in XLA (take_along_axis); an in-kernel VMEM gather
    # of the bf16 u table via scalar-prefetched knn_idx would remove this HBM round trip.
    u1n = gather_kmajor(u1, knn_idx)
    cu2 = encode_layer2(pos_cl, u1n, enc['wb1'], enc['b1'], enc['w2f'], enc['b2f'],
                        tile=t_pts, vmem_limit=vmem_limit)                    # (B,Np,48) bf16
    u2n = gather_kmajor(cu2[..., 24:], knn_idx)                               # only u2 gathered

    # EncodeNet layer-2 combine + FusionNet + conv_1, fully fused (one HBM pass).
    y = fused_point_mlp(pos_cl, cu2, u2n, chain_w, tile=t_mlp,
                        vmem_limit=vmem_limit)                                # (B,Np,128) bf16

    # dist_w + streamed pconv1 pool + pconv2..5 (+residuals) + conv_2/conv_3.
    pos_head = pos_cl[:, :n_head, :]
    y_head = y[:, :n_head, :]
    out_cl, dwh = pile_tail(ab, pos_cl, y, pos_head, y_head, num_pcl, N, tail_w,
                            tile=t_pts, vmem_limit=vmem_limit)

    dist_w_half = jnp.reshape(dwh, (B, 1, half))                              # (B, 1, h)
    feat_half = jnp.transpose(y[:, :half, :].astype(jnp.float32), (0, 2, 1))  # (B, 128, h)
    data_tuple = (dist_w_half, feat_half)
    return jnp.transpose(out_cl, (0, 2, 1)), data_tuple                       # (B, 128, h)


# ----------------------------------------------------------------------------
# Deterministic parameter initialization (same layout as the PyTorch module)
# ----------------------------------------------------------------------------

def _linear_init(key, cin, cout):
    kw, kb = jax.random.split(key)
    bound = 1.0 / math.sqrt(cin)
    w = jax.random.uniform(kw, (cin, cout), jnp.float32, -bound, bound)
    b = jax.random.uniform(kb, (cout,), jnp.float32, -bound, bound)
    return w, b


def init_params(key):
    p = {}
    ki = iter(jax.random.split(key, 24))
    d_code, d_aug, d_out, d_mid, n_mid = 24, 64, 64, 128, 4
    dim_1 = 128
    # EncodeNet (2 graph convs, conv_channels=24)
    p['enc_w0'], p['enc_b0'] = _linear_init(next(ki), 2 * 3, d_code)
    p['enc_w1'], p['enc_b1'] = _linear_init(next(ki), 2 * d_code, d_code)
    # FusionNet
    p['mlp1_w0'], p['mlp1_b0'] = _linear_init(next(ki), 3, 64)
    p['mlp1_w1'], p['mlp1_b1'] = _linear_init(next(ki), 64, d_aug)
    dims = [d_aug + d_code] + [d_mid] * n_mid + [d_out]
    skip_in = (n_mid // 2 + 1,)
    for l in range(len(dims) - 1):
        out_dim = dims[l + 1] - d_aug - d_code if (l + 1) in skip_in else dims[l + 1]
        p[f'lin{l}_w'], p[f'lin{l}_b'] = _linear_init(next(ki), dims[l], out_dim)
    # PointEncoder head
    p['conv1_w'], p['conv1_b'] = _linear_init(next(ki), d_code + d_out, dim_1)
    p['pconv1_w'], p['pconv1_b'] = _linear_init(next(ki), 2 * dim_1, dim_1 * 2)
    for i in range(2, 6):
        p[f'pconv{i}_w'], p[f'pconv{i}_b'] = _linear_init(next(ki), 2 * (dim_1 * 2), dim_1 * 2)
    p['conv2_w'], p['conv2_b'] = _linear_init(next(ki), dim_1 * 2, 256)
    p['conv3_w'], p['conv3_b'] = _linear_init(next(ki), 256, 128)
    p['alpha'] = jnp.ones((1,), jnp.float32)
    p['beta'] = jnp.ones((1,), jnp.float32)
    return p


# ----------------------------------------------------------------------------

if __name__ == "__main__":
    key = jax.random.PRNGKey(0)
    kp, kpos, kidx = jax.random.split(key, 3)

    B, N, K = 2, 16, 4       # batch, points, knn
    num_pcl = 8              # num_pcl*2 == N, matching the slicing pattern

    params = init_params(kp)
    pos = jax.random.normal(kpos, (B, 3, N), jnp.float32)
    knn_idx = jax.random.randint(kidx, (B, N, K), 0, N, jnp.int32)

    y, (dist_w, feat) = point_encoder_forward(params, pos, num_pcl, knn_idx)
    jax.block_until_ready((y, dist_w, feat))

    assert y.shape == (B, 128, num_pcl // 2)
    assert dist_w.shape == (B, 1, num_pcl // 2)
    assert feat.shape == (B, 128, num_pcl // 2)
    print("KERNEL_OK")
</pallas_src>

<mosaic_0001>
module attributes {stable_mosaic.version = 11 : i64} {
  func.func @kern(%arg0: i32, %arg1: i32, %arg2: memref<1x16x3xf32, #tpu.memory_space<vmem>>, %arg3: memref<3x24xf32, #tpu.memory_space<vmem>>, %arg4: memref<1x16x24xbf16, #tpu.memory_space<vmem>>) attributes {dimension_semantics = [#tpu.dimension_semantics<parallel>, #tpu.dimension_semantics<parallel>], iteration_bounds = array<i64: 2, 1>, scalar_prefetch = 0 : i64, scratch_operands = 0 : i64, tpu.core_type = #tpu.core_type<tc>, window_params = [{transform_indices = @transform_0, window_bounds = array<i64: 1, 16, 3>}, {pipeline_mode = #tpu.pipeline_mode<synchronous>, transform_indices = @transform_1, window_bounds = array<i64: 3, 24>}, {transform_indices = @transform_2, window_bounds = array<i64: 1, 16, 24>}]} {
    %c0 = arith.constant 0 : index
    %c0_0 = arith.constant 0 : index
    %c0_1 = arith.constant 0 : index
    %0 = vector.load %arg2[%c0, %c0_0, %c0_1] : memref<1x16x3xf32, #tpu.memory_space<vmem>>, vector<1x16x3xf32>
    %1 = vector.shape_cast %0 : vector<1x16x3xf32> to vector<16x3xf32>
    %c0_2 = arith.constant 0 : index
    %c0_3 = arith.constant 0 : index
    %2 = vector.load %arg3[%c0_2, %c0_3] : memref<3x24xf32, #tpu.memory_space<vmem>>, vector<3x24xf32>
    %3 = vector.extract_strided_slice %1 {offsets = [0, 0], sizes = [16, 1], strides = [1, 1]} : vector<16x3xf32> to vector<16x1xf32>
    %4 = vector.extract_strided_slice %2 {offsets = [0, 0], sizes = [1, 24], strides = [1, 1]} : vector<3x24xf32> to vector<1x24xf32>
    %5 = vector.broadcast %3 : vector<16x1xf32> to vector<16x24xf32>
    %6 = vector.broadcast %4 : vector<1x24xf32> to vector<16x24xf32>
    %7 = arith.mulf %5, %6 : vector<16x24xf32>
    %8 = vector.extract_strided_slice %1 {offsets = [0, 1], sizes = [16, 1], strides = [1, 1]} : vector<16x3xf32> to vector<16x1xf32>
    %9 = vector.extract_strided_slice %2 {offsets = [1, 0], sizes = [1, 24], strides = [1, 1]} : vector<3x24xf32> to vector<1x24xf32>
    %10 = vector.broadcast %8 : vector<16x1xf32> to vector<16x24xf32>
    %11 = vector.broadcast %9 : vector<1x24xf32> to vector<16x24xf32>
    %12 = arith.mulf %10, %11 : vector<16x24xf32>
    %13 = arith.addf %7, %12 : vector<16x24xf32>
    %14 = vector.extract_strided_slice %1 {offsets = [0, 2], sizes = [16, 1], strides = [1, 1]} : vector<16x3xf32> to vector<16x1xf32>
    %15 = vector.extract_strided_slice %2 {offsets = [2, 0], sizes = [1, 24], strides = [1, 1]} : vector<3x24xf32> to vector<1x24xf32>
    %16 = vector.broadcast %14 : vector<16x1xf32> to vector<16x24xf32>
    %17 = vector.broadcast %15 : vector<1x24xf32> to vector<16x24xf32>
    %18 = arith.mulf %16, %17 : vector<16x24xf32>
    %19 = arith.addf %13, %18 : vector<16x24xf32>
    %20 = arith.truncf %19 : vector<16x24xf32> to vector<16x24xbf16>
    %c0_4 = arith.constant 0 : index
    %c0_5 = arith.constant 0 : index
    %c0_6 = arith.constant 0 : index
    %21 = vector.load %arg4[%c0_4, %c0_5, %c0_6] : memref<1x16x24xbf16, #tpu.memory_space<vmem>>, vector<1x16x24xbf16>
    %22 = vector.shape_cast %21 : vector<1x16x24xbf16> to vector<16x24xbf16>
    %23 = vector.shape_cast %20 : vector<16x24xbf16> to vector<1x16x24xbf16>
    tpu.vector_store %arg4[%c0_4, %c0_5, %c0_6], %23 {strides = array<i32>} : memref<1x16x24xbf16, #tpu.memory_space<vmem>>, vector<1x16x24xbf16>,
    return
  }
  func.func @transform_0(%arg0: i32, %arg1: i32) -> (i32, i32, i32) {
    %c0_i32 = arith.constant 0 : i32
    %c0_i32_0 = arith.constant 0 : i32
    return %arg0, %arg1, %c0_i32 : i32, i32, i32
  }
  func.func @transform_1(%arg0: i32, %arg1: i32) -> (i32, i32) {
    %c0_i32 = arith.constant 0 : i32
    %c0_i32_0 = arith.constant 0 : i32
    %c0_i32_1 = arith.constant 0 : i32
    return %c0_i32, %c0_i32_0 : i32, i32
  }
  func.func @transform_2(%arg0: i32, %arg1: i32) -> (i32, i32, i32) {
    %c0_i32 = arith.constant 0 : i32
    %c0_i32_0 = arith.constant 0 : i32
    return %arg0, %arg1, %c0_i32 : i32, i32, i32
  }
}

module attributes {stable_mosaic.version = 11 : i64} {
  func.func @kern(%arg0: i32, %arg1: i32, %arg2: memref<1x16x3xf32, #tpu.memory_space<vmem>>, %arg3: memref<1x4x16x24xbf16, #tpu.memory_space<vmem>>, %arg4: memref<3x24xf32, #tpu.memory_space<vmem>>, %arg5: memref<1x24xf32, #tpu.memory_space<vmem>>, %arg6: memref<24x48xbf16, #tpu.memory_space<vmem>>, %arg7: memref<1x48xf32, #tpu.memory_space<vmem>>, %arg8: memref<1x16x48xbf16, #tpu.memory_space<vmem>>) attributes {dimension_semantics = [#tpu.dimension_semantics<parallel>, #tpu.dimension_semantics<parallel>], iteration_bounds = array<i64: 2, 1>, scalar_prefetch = 0 : i64, scratch_operands = 0 : i64, tpu.core_type = #tpu.core_type<tc>, window_params = [{transform_indices = @transform_0, window_bounds = array<i64: 1, 16, 3>}, {transform_indices = @transform_1, window_bounds = array<i64: 1, 4, 16, 24>}, {pipeline_mode = #tpu.pipeline_mode<synchronous>, transform_indices = @transform_2, window_bounds = array<i64: 3, 24>}, {pipeline_mode = #tpu.pipeline_mode<synchronous>, transform_indices = @transform_3, window_bounds = array<i64: 1, 24>}, {pipeline_mode = #tpu.pipeline_mode<synchronous>, transform_indices = @transform_4, window_bounds = array<i64: 24, 48>}, {pipeline_mode = #tpu.pipeline_mode<synchronous>, transform_indices = @transform_5, window_bounds = array<i64: 1, 48>}, {transform_indices = @transform_6, window_bounds = array<i64: 1, 16, 48>}]} {
    %c0 = arith.constant 0 : index
    %c0_0 = arith.constant 0 : index
    %c0_1 = arith.constant 0 : index
    %0 = vector.load %arg2[%c0, %c0_0, %c0_1] : memref<1x16x3xf32, #tpu.memory_space<vmem>>, vector<1x16x3xf32>
    %1 = vector.shape_cast %0 : vector<1x16x3xf32> to vector<16x3xf32>
    %c0_2 = arith.constant 0 : index
    %c0_3 = arith.constant 0 : index
    %2 = vector.load %arg4[%c0_2, %c0_3] : memref<3x24xf32, #tpu.memory_space<vmem>>, vector<3x24xf32>
    %3 = vector.extract_strided_slice %1 {offsets = [0, 0], sizes = [16, 1], strides = [1, 1]} : vector<16x3xf32> to vector<16x1xf32>
    %4 = vector.extract_strided_slice %2 {offsets = [0, 0], sizes = [1, 24], strides = [1, 1]} : vector<3x24xf32> to vector<1x24xf32>
    %5 = vector.broadcast %3 : vector<16x1xf32> to vector<16x24xf32>
    %6 = vector.broadcast %4 : vector<1x24xf32> to vector<16x24xf32>
    %7 = arith.mulf %5, %6 : vector<16x24xf32>
    %8 = vector.extract_strided_slice %1 {offsets = [0, 1], sizes = [16, 1], strides = [1, 1]} : vector<16x3xf32> to vector<16x1xf32>
    %9 = vector.extract_strided_slice %2 {offsets = [1, 0], sizes = [1, 24], strides = [1, 1]} : vector<3x24xf32> to vector<1x24xf32>
    %10 = vector.broadcast %8 : vector<16x1xf32> to vector<16x24xf32>
    %11 = vector.broadcast %9 : vector<1x24xf32> to vector<16x24xf32>
    %12 = arith.mulf %10, %11 : vector<16x24xf32>
    %13 = arith.addf %7, %12 : vector<16x24xf32>
    %14 = vector.extract_strided_slice %1 {offsets = [0, 2], sizes = [16, 1], strides = [1, 1]} : vector<16x3xf32> to vector<16x1xf32>
    %15 = vector.extract_strided_slice %2 {offsets = [2, 0], sizes = [1, 24], strides = [1, 1]} : vector<3x24xf32> to vector<1x24xf32>
    %16 = vector.broadcast %14 : vector<16x1xf32> to vector<16x24xf32>
    %17 = vector.broadcast %15 : vector<1x24xf32> to vector<16x24xf32>
    %18 = arith.mulf %16, %17 : vector<16x24xf32>
    %19 = arith.addf %13, %18 : vector<16x24xf32>
    %c0_4 = arith.constant 0 : index
    %c0_5 = arith.constant 0 : index
    %20 = vector.load %arg5[%c0_4, %c0_5] : memref<1x24xf32, #tpu.memory_space<vmem>>, vector<1x24xf32>
    %21 = vector.broadcast %20 : vector<1x24xf32> to vector<16x24xf32>
    %22 = arith.addf %19, %21 : vector<16x24xf32>
    %c0_6 = arith.constant 0 : index
    %c0_7 = arith.constant 0 : index
    %c0_8 = arith.constant 0 : index
    %c0_9 = arith.constant 0 : index
    %23 = vector.load %arg3[%c0_6, %c0_7, %c0_8, %c0_9] : memref<1x4x16x24xbf16, #tpu.memory_space<vmem>>, vector<1x1x16x24xbf16>
    %24 = vector.shape_cast %23 : vector<1x1x16x24xbf16> to vector<16x24xbf16>
    %25 = arith.extf %24 : vector<16x24xbf16> to vector<16x24xf32>
    %26 = arith.addf %22, %25 : vector<16x24xf32>
    %cst = arith.constant 0.000000e+00 : f32
    %27 = vector.broadcast %cst : f32 to vector<16x24xf32>
    %28 = arith.maximumf %26, %27 : vector<16x24xf32>
    %c0_10 = arith.constant 0 : index
    %c1 = arith.constant 1 : index
    %c0_11 = arith.constant 0 : index
    %c0_12 = arith.constant 0 : index
    %29 = vector.load %arg3[%c0_10, %c1, %c0_11, %c0_12] : memref<1x4x16x24xbf16, #tpu.memory_space<vmem>>, vector<1x1x16x24xbf16>
    %30 = vector.shape_cast %29 : vector<1x1x16x24xbf16> to vector<16x24xbf16>
    %31 = arith.extf %30 : vector<16x24xbf16> to vector<16x24xf32>
    %32 = arith.addf %22, %31 : vector<16x24xf32>
    %cst_13 = arith.constant 0.000000e+00 : f32
    %33 = vector.broadcast %cst_13 : f32 to vector<16x24xf32>
    %34 = arith.maximumf %32, %33 : vector<16x24xf32>
    %35 = arith.maximumf %28, %34 : vector<16x24xf32>
    %c0_14 = arith.constant 0 : index
    %c2 = arith.constant 2 : index
    %c0_15 = arith.constant 0 : index
    %c0_16 = arith.constant 0 : index
    %36 = vector.load %arg3[%c0_14, %c2, %c0_15, %c0_16] : memref<1x4x16x24xbf16, #tpu.memory_space<vmem>>, vector<1x1x16x24xbf16>
    %37 = vector.shape_cast %36 : vector<1x1x16x24xbf16> to vector<16x24xbf16>
    %38 = arith.extf %37 : vector<16x24xbf16> to vector<16x24xf32>
    %39 = arith.addf %22, %38 : vector<16x24xf32>
    %cst_17 = arith.constant 0.000000e+00 : f32
    %40 = vector.broadcast %cst_17 : f32 to vector<16x24xf32>
    %41 = arith.maximumf %39, %40 : vector<16x24xf32>
    %42 = arith.maximumf %35, %41 : vector<16x24xf32>
    %c0_18 = arith.constant 0 : index
    %c3 = arith.constant 3 : index
    %c0_19 = arith.constant 0 : index
    %c0_20 = arith.constant 0 : index
    %43 = vector.load %arg3[%c0_18, %c3, %c0_19, %c0_20] : memref<1x4x16x24xbf16, #tpu.memory_space<vmem>>, vector<1x1x16x24xbf16>
    %44 = vector.shape_cast %43 : vector<1x1x16x24xbf16> to vector<16x24xbf16>
    %45 = arith.extf %44 : vector<16x24xbf16> to vector<16x24xf32>
    %46 = arith.addf %22, %45 : vector<16x24xf32>
    %cst_21 = arith.constant 0.000000e+00 : f32
    %47 = vector.broadcast %cst_21 : f32 to vector<16x24xf32>
    %48 = arith.maximumf %46, %47 : vector<16x24xf32>
    %49 = arith.maximumf %42, %48 : vector<16x24xf32>
    %50 = arith.truncf %49 : vector<16x24xf32> to vector<16x24xbf16>
    %c0_22 = arith.constant 0 : index
    %c0_23 = arith.constant 0 : index
    %51 = vector.load %arg6[%c0_22, %c0_23] : memref<24x48xbf16, #tpu.memory_space<vmem>>, vector<24x48xbf16>
    %cst_24 = arith.constant dense<0.000000e+00> : vector<16x48xf32>
    %52 = tpu.matmul %50, %51, %cst_24 {dimension_numbers = #tpu.dot_dimension_numbers<[1], [0], [0], [1], [0, 0, 1, 1], [], []>} : vector<16x24xbf16>, vector<24x48xbf16>, vector<16x48xf32> -> vector<16x48xf32>
    %c0_25 = arith.constant 0 : index
    %c0_26 = arith.constant 0 : index
    %53 = vector.load %arg7[%c0_25, %c0_26] : memref<1x48xf32, #tpu.memory_space<vmem>>, vector<1x48xf32>
    %54 = vector.broadcast %53 : vector<1x48xf32> to vector<16x48xf32>
    %55 = arith.addf %52, %54 : vector<16x48xf32>
    %56 = arith.truncf %55 : vector<16x48xf32> to vector<16x48xbf16>
    %c0_27 = arith.constant 0 : index
    %c0_28 = arith.constant 0 : index
    %c0_29 = arith.constant 0 : index
    %57 = vector.load %arg8[%c0_27, %c0_28, %c0_29] : memref<1x16x48xbf16, #tpu.memory_space<vmem>>, vector<1x16x48xbf16>
    %58 = vector.shape_cast %57 : vector<1x16x48xbf16> to vector<16x48xbf16>
    %59 = vector.shape_cast %56 : vector<16x48xbf16> to vector<1x16x48xbf16>
    tpu.vector_store %arg8[%c0_27, %c0_28, %c0_29], %59 {strides = array<i32>} : memref<1x16x48xbf16, #tpu.memory_space<vmem>>, vector<1x16x48xbf16>,
    return
  }
  func.func @transform_0(%arg0: i32, %arg1: i32) -> (i32, i32, i32) {
    %c0_i32 = arith.constant 0 : i32
    %c0_i32_0 = arith.constant 0 : i32
    return %arg0, %arg1, %c0_i32 : i32, i32, i32
  }
  func.func @transform_1(%arg0: i32, %arg1: i32) -> (i32, i32, i32, i32) {
    %c0_i32 = arith.constant 0 : i32
    %c0_i32_0 = arith.constant 0 : i32
    %c0_i32_1 = arith.constant 0 : i32
    return %arg0, %c0_i32, %arg1, %c0_i32_0 : i32, i32, i32, i32
  }
  func.func @transform_2(%arg0: i32, %arg1: i32) -> (i32, i32) {
    %c0_i32 = arith.constant 0 : i32
    %c0_i32_0 = arith.constant 0 : i32
    %c0_i32_1 = arith.constant 0 : i32
    return %c0_i32, %c0_i32_0 : i32, i32
  }
  func.func @transform_3(%arg0: i32, %arg1: i32) -> (i32, i32) {
    %c0_i32 = arith.constant 0 : i32
    %c0_i32_0 = arith.constant 0 : i32
    %c0_i32_1 = arith.constant 0 : i32
    return %c0_i32, %c0_i32_0 : i32, i32
  }
  func.func @transform_4(%arg0: i32, %arg1: i32) -> (i32, i32) {
    %c0_i32 = arith.constant 0 : i32
    %c0_i32_0 = arith.constant 0 : i32
    %c0_i32_1 = arith.constant 0 : i32
    return %c0_i32, %c0_i32_0 : i32, i32
  }
  func.func @transform_5(%arg0: i32, %arg1: i32) -> (i32, i32) {
    %c0_i32 = arith.constant 0 : i32
    %c0_i32_0 = arith.constant 0 : i32
    %c0_i32_1 = arith.constant 0 : i32
    return %c0_i32, %c0_i32_0 : i32, i32
  }
  func.func @transform_6(%arg0: i32, %arg1: i32) -> (i32, i32, i32) {
    %c0_i32 = arith.constant 0 : i32
    %c0_i32_0 = arith.constant 0 : i32
    return %arg0, %arg1, %c0_i32 : i32, i32, i32
  }
}

module attributes {stable_mosaic.version = 11 : i64} {
  func.func @kern(%arg0: i32, %arg1: i32, %arg2: memref<1x16x3xf32, #tpu.memory_space<vmem>>, %arg3: memref<1x16x48xbf16, #tpu.memory_space<vmem>>, %arg4: memref<1x4x16x24xbf16, #tpu.memory_space<vmem>>, %arg5: memref<3x64xf32, #tpu.memory_space<vmem>>, %arg6: memref<1x64xf32, #tpu.memory_space<vmem>>, %arg7: memref<64x64xbf16, #tpu.memory_space<vmem>>, %arg8: memref<1x64xf32, #tpu.memory_space<vmem>>, %arg9: memref<64x128xbf16, #tpu.memory_space<vmem>>, %arg10: memref<24x128xbf16, #tpu.memory_space<vmem>>, %arg11: memref<1x128xf32, #tpu.memory_space<vmem>>, %arg12: memref<128x128xbf16, #tpu.memory_space<vmem>>, %arg13: memref<1x128xf32, #tpu.memory_space<vmem>>, %arg14: memref<128x40xbf16, #tpu.memory_space<vmem>>, %arg15: memref<1x40xf32, #tpu.memory_space<vmem>>, %arg16: memref<40x128xbf16, #tpu.memory_space<vmem>>, %arg17: memref<64x128xbf16, #tpu.memory_space<vmem>>, %arg18: memref<24x128xbf16, #tpu.memory_space<vmem>>, %arg19: memref<1x128xf32, #tpu.memory_space<vmem>>, %arg20: memref<128x64xbf16, #tpu.memory_space<vmem>>, %arg21: memref<1x64xf32, #tpu.memory_space<vmem>>, %arg22: memref<24x128xbf16, #tpu.memory_space<vmem>>, %arg23: memref<64x128xbf16, #tpu.memory_space<vmem>>, %arg24: memref<1x128xf32, #tpu.memory_space<vmem>>, %arg25: memref<1x16x128xbf16, #tpu.memory_space<vmem>>) attributes {dimension_semantics = [#tpu.dimension_semantics<parallel>, #tpu.dimension_semantics<parallel>], iteration_bounds = array<i64: 2, 1>, scalar_prefetch = 0 : i64, scratch_operands = 0 : i64, tpu.core_type = #tpu.core_type<tc>, window_params = [{transform_indices = @transform_0, window_bounds = array<i64: 1, 16, 3>}, {transform_indices = @transform_1, window_bounds = array<i64: 1, 16, 48>}, {transform_indices = @transform_2, window_bounds = array<i64: 1, 4, 16, 24>}, {pipeline_mode = #tpu.pipeline_mode<synchronous>, transform_indices = @transform_3, window_bounds = array<i64: 3, 64>}, {pipeline_mode = #tpu.pipeline_mode<synchronous>, transform_indices = @transform_4, window_bounds = array<i64: 1, 64>}, {pipeline_mode = #tpu.pipeline_mode<synchronous>, transform_indices = @transform_5, window_bounds = array<i64: 64, 64>}, {pipeline_mode = #tpu.pipeline_mode<synchronous>, transform_indices = @transform_6, window_bounds = array<i64: 1, 64>}, {pipeline_mode = #tpu.pipeline_mode<synchronous>, transform_indices = @transform_7, window_bounds = array<i64: 64, 128>}, {pipeline_mode = #tpu.pipeline_mode<synchronous>, transform_indices = @transform_8, window_bounds = array<i64: 24, 128>}, {pipeline_mode = #tpu.pipeline_mode<synchronous>, transform_indices = @transform_9, window_bounds = array<i64: 1, 128>}, {pipeline_mode = #tpu.pipeline_mode<synchronous>, transform_indices = @transform_10, window_bounds = array<i64: 128, 128>}, {pipeline_mode = #tpu.pipeline_mode<synchronous>, transform_indices = @transform_11, window_bounds = array<i64: 1, 128>}, {pipeline_mode = #tpu.pipeline_mode<synchronous>, transform_indices = @transform_12, window_bounds = array<i64: 128, 40>}, {pipeline_mode = #tpu.pipeline_mode<synchronous>, transform_indices = @transform_13, window_bounds = array<i64: 1, 40>}, {pipeline_mode = #tpu.pipeline_mode<synchronous>, transform_indices = @transform_14, window_bounds = array<i64: 40, 128>}, {pipeline_mode = #tpu.pipeline_mode<synchronous>, transform_indices = @transform_15, window_bounds = array<i64: 64, 128>}, {pipeline_mode = #tpu.pipeline_mode<synchronous>, transform_indices = @transform_16, window_bounds = array<i64: 24, 128>}, {pipeline_mode = #tpu.pipeline_mode<synchronous>, transform_indices = @transform_17, window_bounds = array<i64: 1, 128>}, {pipeline_mode = #tpu.pipeline_mode<synchronous>, transform_indices = @transform_18, window_bounds = array<i64: 128, 64>}, {pipeline_mode = #tpu.pipeline_mode<synchronous>, transform_indices = @transform_19, window_bounds = array<i64: 1, 64>}, {pipeline_mode = #tpu.pipeline_mode<synchronous>, transform_indices = @transform_20, window_bounds = array<i64: 24, 128>}, {pipeline_mode = #tpu.pipeline_mode<synchronous>, transform_indices = @transform_21, window_bounds = array<i64: 64, 128>}, {pipeline_mode = #tpu.pipeline_mode<synchronous>, transform_indices = @transform_22, window_bounds = array<i64: 1, 128>}, {transform_indices = @transform_23, window_bounds = array<i64: 1, 16, 128>}]} {
    %c0 = arith.constant 0 : index
    %c0_0 = arith.constant 0 : index
    %c0_1 = arith.constant 0 : index
    %0 = vector.load %arg3[%c0, %c0_0, %c0_1] : memref<1x16x48xbf16, #tpu.memory_space<vmem>>, vector<1x16x48xbf16>
    %1 = vector.shape_cast %0 : vector<1x16x48xbf16> to vector<16x48xbf16>
    %2 = vector.extract_strided_slice %1 {offsets = [0, 0], sizes = [16, 24], strides = [1, 1]} : vector<16x48xbf16> to vector<16x24xbf16>
    %3 = arith.extf %2 : vector<16x24xbf16> to vector<16x24xf32>
    %c0_2 = arith.constant 0 : index
    %c0_3 = arith.constant 0 : index
    %c0_4 = arith.constant 0 : index
    %c0_5 = arith.constant 0 : index
    %4 = vector.load %arg4[%c0_2, %c0_3, %c0_4, %c0_5] : memref<1x4x16x24xbf16, #tpu.memory_space<vmem>>, vector<1x1x16x24xbf16>
    %5 = vector.shape_cast %4 : vector<1x1x16x24xbf16> to vector<16x24xbf16>
    %6 = arith.extf %5 : vector<16x24xbf16> to vector<16x24xf32>
    %7 = arith.addf %3, %6 : vector<16x24xf32>
    %cst = arith.constant 0.000000e+00 : f32
    %8 = vector.broadcast %cst : f32 to vector<16x24xf32>
    %9 = arith.maximumf %7, %8 : vector<16x24xf32>
    %c0_6 = arith.constant 0 : index
    %c1 = arith.constant 1 : index
    %c0_7 = arith.constant 0 : index
    %c0_8 = arith.constant 0 : index
    %10 = vector.load %arg4[%c0_6, %c1, %c0_7, %c0_8] : memref<1x4x16x24xbf16, #tpu.memory_space<vmem>>, vector<1x1x16x24xbf16>
    %11 = vector.shape_cast %10 : vector<1x1x16x24xbf16> to vector<16x24xbf16>
    %12 = arith.extf %11 : vector<16x24xbf16> to vector<16x24xf32>
    %13 = arith.addf %3, %12 : vector<16x24xf32>
    %cst_9 = arith.constant 0.000000e+00 : f32
    %14 = vector.broadcast %cst_9 : f32 to vector<16x24xf32>
    %15 = arith.maximumf %13, %14 : vector<16x24xf32>
    %16 = arith.maximumf %9, %15 : vector<16x24xf32>
    %c0_10 = arith.constant 0 : index
    %c2 = arith.constant 2 : index
    %c0_11 = arith.constant 0 : index
    %c0_12 = arith.constant 0 : index
    %17 = vector.load %arg4[%c0_10, %c2, %c0_11, %c0_12] : memref<1x4x16x24xbf16, #tpu.memory_space<vmem>>, vector<1x1x16x24xbf16>
    %18 = vector.shape_cast %17 : vector<1x1x16x24xbf16> to vector<16x24xbf16>
    %19 = arith.extf %18 : vector<16x24xbf16> to vector<16x24xf32>
    %20 = arith.addf %3, %19 : vector<16x24xf32>
    %cst_13 = arith.constant 0.000000e+00 : f32
    %21 = vector.broadcast %cst_13 : f32 to vector<16x24xf32>
    %22 = arith.maximumf %20, %21 : vector<16x24xf32>
    %23 = arith.maximumf %16, %22 : vector<16x24xf32>
    %c0_14 = arith.constant 0 : index
    %c3 = arith.constant 3 : index
    %c0_15 = arith.constant 0 : index
    %c0_16 = arith.constant 0 : index
    %24 = vector.load %arg4[%c0_14, %c3, %c0_15, %c0_16] : memref<1x4x16x24xbf16, #tpu.memory_space<vmem>>, vector<1x1x16x24xbf16>
    %25 = vector.shape_cast %24 : vector<1x1x16x24xbf16> to vector<16x24xbf16>
    %26 = arith.extf %25 : vector<16x24xbf16> to vector<16x24xf32>
    %27 = arith.addf %3, %26 : vector<16x24xf32>
    %cst_17 = arith.constant 0.000000e+00 : f32
    %28 = vector.broadcast %cst_17 : f32 to vector<16x24xf32>
    %29 = arith.maximumf %27, %28 : vector<16x24xf32>
    %30 = arith.maximumf %23, %29 : vector<16x24xf32>
    %31 = arith.truncf %30 : vector<16x24xf32> to vector<16x24xbf16>
    %c0_18 = arith.constant 0 : index
    %c0_19 = arith.constant 0 : index
    %c0_20 = arith.constant 0 : index
    %32 = vector.load %arg2[%c0_18, %c0_19, %c0_20] : memref<1x16x3xf32, #tpu.memory_space<vmem>>, vector<1x16x3xf32>
    %33 = vector.shape_cast %32 : vector<1x16x3xf32> to vector<16x3xf32>
    %c0_21 = arith.constant 0 : index
    %c0_22 = arith.constant 0 : index
    %34 = vector.load %arg5[%c0_21, %c0_22] : memref<3x64xf32, #tpu.memory_space<vmem>>, vector<3x64xf32>
    %35 = vector.extract_strided_slice %33 {offsets = [0, 0], sizes = [16, 1], strides = [1, 1]} : vector<16x3xf32> to vector<16x1xf32>
    %36 = vector.extract_strided_slice %34 {offsets = [0, 0], sizes = [1, 64], strides = [1, 1]} : vector<3x64xf32> to vector<1x64xf32>
    %37 = vector.broadcast %35 : vector<16x1xf32> to vector<16x64xf32>
    %38 = vector.broadcast %36 : vector<1x64xf32> to vector<16x64xf32>
    %39 = arith.mulf %37, %38 : vector<16x64xf32>
    %40 = vector.extract_strided_slice %33 {offsets = [0, 1], sizes = [16, 1], strides = [1, 1]} : vector<16x3xf32> to vector<16x1xf32>
    %41 = vector.extract_strided_slice %34 {offsets = [1, 0], sizes = [1, 64], strides = [1, 1]} : vector<3x64xf32> to vector<1x64xf32>
    %42 = vector.broadcast %40 : vector<16x1xf32> to vector<16x64xf32>
    %43 = vector.broadcast %41 : vector<1x64xf32> to vector<16x64xf32>
    %44 = arith.mulf %42, %43 : vector<16x64xf32>
    %45 = arith.addf %39, %44 : vector<16x64xf32>
    %46 = vector.extract_strided_slice %33 {offsets = [0, 2], sizes = [16, 1], strides = [1, 1]} : vector<16x3xf32> to vector<16x1xf32>
    %47 = vector.extract_strided_slice %34 {offsets = [2, 0], sizes = [1, 64], strides = [1, 1]} : vector<3x64xf32> to vector<1x64xf32>
    %48 = vector.broadcast %46 : vector<16x1xf32> to vector<16x64xf32>
    %49 = vector.broadcast %47 : vector<1x64xf32> to vector<16x64xf32>
    %50 = arith.mulf %48, %49 : vector<16x64xf32>
    %51 = arith.addf %45, %50 : vector<16x64xf32>
    %c0_23 = arith.constant 0 : index
    %c0_24 = arith.constant 0 : index
    %52 = vector.load %arg6[%c0_23, %c0_24] : memref<1x64xf32, #tpu.memory_space<vmem>>, vector<1x64xf32>
    %53 = vector.broadcast %52 : vector<1x64xf32> to vector<16x64xf32>
    %54 = arith.addf %51, %53 : vector<16x64xf32>
    %cst_25 = arith.constant 0.000000e+00 : f32
    %55 = vector.broadcast %cst_25 : f32 to vector<16x64xf32>
    %56 = arith.maximumf %54, %55 : vector<16x64xf32>
    %57 = arith.truncf %56 : vector<16x64xf32> to vector<16x64xbf16>
    %c0_26 = arith.constant 0 : index
    %c0_27 = arith.constant 0 : index
    %58 = vector.load %arg7[%c0_26, %c0_27] : memref<64x64xbf16, #tpu.memory_space<vmem>>, vector<64x64xbf16>
    %cst_28 = arith.constant dense<0.000000e+00> : vector<16x64xf32>
    %59 = tpu.matmul %57, %58, %cst_28 {dimension_numbers = #tpu.dot_dimension_numbers<[1], [0], [0], [1], [0, 0, 1, 1], [], []>} : vector<16x64xbf16>, vector<64x64xbf16>, vector<16x64xf32> -> vector<16x64xf32>
    %c0_29 = arith.constant 0 : index
    %c0_30 = arith.constant 0 : index
    %60 = vector.load %arg8[%c0_29, %c0_30] : memref<1x64xf32, #tpu.memory_space<vmem>>, vector<1x64xf32>
    %61 = vector.broadcast %60 : vector<1x64xf32> to vector<16x64xf32>
    %62 = arith.addf %59, %61 : vector<16x64xf32>
    %63 = arith.truncf %62 : vector<16x64xf32> to vector<16x64xbf16>
    %c0_31 = arith.constant 0 : index
    %c0_32 = arith.constant 0 : index
    %64 = vector.load %arg9[%c0_31, %c0_32] : memref<64x128xbf16, #tpu.memory_space<vmem>>, vector<64x128xbf16>
    %cst_33 = arith.constant dense<0.000000e+00> : vector<16x128xf32>
    %65 = tpu.matmul %63, %64, %cst_33 {dimension_numbers = #tpu.dot_dimension_numbers<[1], [0], [0], [1], [0, 0, 1, 1], [], []>} : vector<16x64xbf16>, vector<64x128xbf16>, vector<16x128xf32> -> vector<16x128xf32>
    %c0_34 = arith.constant 0 : index
    %c0_35 = arith.constant 0 : index
    %66 = vector.load %arg10[%c0_34, %c0_35] : memref<24x128xbf16, #tpu.memory_space<vmem>>, vector<24x128xbf16>
    %cst_36 = arith.constant dense<0.000000e+00> : vector<16x128xf32>
    %67 = tpu.matmul %31, %66, %cst_36 {dimension_numbers = #tpu.dot_dimension_numbers<[1], [0], [0], [1], [0, 0, 1, 1], [], []>} : vector<16x24xbf16>, vector<24x128xbf16>, vector<16x128xf32> -> vector<16x128xf32>
    %68 = arith.addf %65, %67 : vector<16x128xf32>
    %c0_37 = arith.constant 0 : index
    %c0_38 = arith.constant 0 : index
    %69 = vector.load %arg11[%c0_37, %c0_38] : memref<1x128xf32, #tpu.memory_space<vmem>>, vector<1x128xf32>
    %70 = vector.broadcast %69 : vector<1x128xf32> to vector<16x128xf32>
    %71 = arith.addf %68, %70 : vector<16x128xf32>
    %cst_39 = arith.constant 0.000000e+00 : f32
    %72 = vector.broadcast %cst_39 : f32 to vector<16x128xf32>
    %73 = arith.maximumf %71, %72 : vector<16x128xf32>
    %74 = arith.truncf %73 : vector<16x128xf32> to vector<16x128xbf16>
    %c0_40 = arith.constant 0 : index
    %c0_41 = arith.constant 0 : index
    %75 = vector.load %arg12[%c0_40, %c0_41] : memref<128x128xbf16, #tpu.memory_space<vmem>>, vector<128x128xbf16>
    %cst_42 = arith.constant dense<0.000000e+00> : vector<16x128xf32>
    %76 = tpu.matmul %74, %75, %cst_42 {dimension_numbers = #tpu.dot_dimension_numbers<[1], [0], [0], [1], [0, 0, 1, 1], [], []>} : vector<16x128xbf16>, vector<128x128xbf16>, vector<16x128xf32> -> vector<16x128xf32>
    %c0_43 = arith.constant 0 : index
    %c0_44 = arith.constant 0 : index
    %77 = vector.load %arg13[%c0_43, %c0_44] : memref<1x128xf32, #tpu.memory_space<vmem>>, vector<1x128xf32>
    %78 = vector.broadcast %77 : vector<1x128xf32> to vector<16x128xf32>
    %79 = arith.addf %76, %78 : vector<16x128xf32>
    %cst_45 = arith.constant 0.000000e+00 : f32
    %80 = vector.broadcast %cst_45 : f32 to vector<16x128xf32>
    %81 = arith.maximumf %79, %80 : vector<16x128xf32>
    %82 = arith.truncf %81 : vector<16x128xf32> to vector<16x128xbf16>
    %c0_46 = arith.constant 0 : index
    %c0_47 = arith.constant 0 : index
    %83 = vector.load %arg14[%c0_46, %c0_47] : memref<128x40xbf16, #tpu.memory_space<vmem>>, vector<128x40xbf16>
    %cst_48 = arith.constant dense<0.000000e+00> : vector<16x40xf32>
    %84 = tpu.matmul %82, %83, %cst_48 {dimension_numbers = #tpu.dot_dimension_numbers<[1], [0], [0], [1], [0, 0, 1, 1], [], []>} : vector<16x128xbf16>, vector<128x40xbf16>, vector<16x40xf32> -> vector<16x40xf32>
    %c0_49 = arith.constant 0 : index
    %c0_50 = arith.constant 0 : index
    %85 = vector.load %arg15[%c0_49, %c0_50] : memref<1x40xf32, #tpu.memory_space<vmem>>, vector<1x40xf32>
    %86 = vector.broadcast %85 : vector<1x40xf32> to vector<16x40xf32>
    %87 = arith.addf %84, %86 : vector<16x40xf32>
    %cst_51 = arith.constant 0.000000e+00 : f32
    %88 = vector.broadcast %cst_51 : f32 to vector<16x40xf32>
    %89 = arith.maximumf %87, %88 : vector<16x40xf32>
    %90 = arith.truncf %89 : vector<16x40xf32> to vector<16x40xbf16>
    %c0_52 = arith.constant 0 : index
    %c0_53 = arith.constant 0 : index
    %91 = vector.load %arg16[%c0_52, %c0_53] : memref<40x128xbf16, #tpu.memory_space<vmem>>, vector<40x128xbf16>
    %cst_54 = arith.constant dense<0.000000e+00> : vector<16x128xf32>
    %92 = tpu.matmul %90, %91, %cst_54 {dimension_numbers = #tpu.dot_dimension_numbers<[1], [0], [0], [1], [0, 0, 1, 1], [], []>} : vector<16x40xbf16>, vector<40x128xbf16>, vector<16x128xf32> -> vector<16x128xf32>
    %c0_55 = arith.constant 0 : index
    %c0_56 = arith.constant 0 : index
    %93 = vector.load %arg17[%c0_55, %c0_56] : memref<64x128xbf16, #tpu.memory_space<vmem>>, vector<64x128xbf16>
    %cst_57 = arith.constant dense<0.000000e+00> : vector<16x128xf32>
    %94 = tpu.matmul %63, %93, %cst_57 {dimension_numbers = #tpu.dot_dimension_numbers<[1], [0], [0], [1], [0, 0, 1, 1], [], []>} : vector<16x64xbf16>, vector<64x128xbf16>, vector<16x128xf32> -> vector<16x128xf32>
    %95 = arith.addf %92, %94 : vector<16x128xf32>
    %c0_58 = arith.constant 0 : index
    %c0_59 = arith.constant 0 : index
    %96 = vector.load %arg18[%c0_58, %c0_59] : memref<24x128xbf16, #tpu.memory_space<vmem>>, vector<24x128xbf16>
    %cst_60 = arith.constant dense<0.000000e+00> : vector<16x128xf32>
    %97 = tpu.matmul %31, %96, %cst_60 {dimension_numbers = #tpu.dot_dimension_numbers<[1], [0], [0], [1], [0, 0, 1, 1], [], []>} : vector<16x24xbf16>, vector<24x128xbf16>, vector<16x128xf32> -> vector<16x128xf32>
    %98 = arith.addf %95, %97 : vector<16x128xf32>
    %c0_61 = arith.constant 0 : index
    %c0_62 = arith.constant 0 : index
    %99 = vector.load %arg19[%c0_61, %c0_62] : memref<1x128xf32, #tpu.memory_space<vmem>>, vector<1x128xf32>
    %100 = vector.broadcast %99 : vector<1x128xf32> to vector<16x128xf32>
    %101 = arith.addf %98, %100 : vector<16x128xf32>
    %cst_63 = arith.constant 0.000000e+00 : f32
    %102 = vector.broadcast %cst_63 : f32 to vector<16x128xf32>
    %103 = arith.maximumf %101, %102 : vector<16x128xf32>
    %104 = arith.truncf %103 : vector<16x128xf32> to vector<16x128xbf16>
    %c0_64 = arith.constant 0 : index
    %c0_65 = arith.constant 0 : index
    %105 = vector.load %arg20[%c0_64, %c0_65] : memref<128x64xbf16, #tpu.memory_space<vmem>>, vector<128x64xbf16>
    %cst_66 = arith.constant dense<0.000000e+00> : vector<16x64xf32>
    %106 = tpu.matmul %104, %105, %cst_66 {dimension_numbers = #tpu.dot_dimension_numbers<[1], [0], [0], [1], [0, 0, 1, 1], [], []>} : vector<16x128xbf16>, vector<128x64xbf16>, vector<16x64xf32> -> vector<16x64xf32>
    %c0_67 = arith.constant 0 : index
    %c0_68 = arith.constant 0 : index
    %107 = vector.load %arg21[%c0_67, %c0_68] : memref<1x64xf32, #tpu.memory_space<vmem>>, vector<1x64xf32>
    %108 = vector.broadcast %107 : vector<1x64xf32> to vector<16x64xf32>
    %109 = arith.addf %106, %108 : vector<16x64xf32>
    %c0_69 = arith.constant 0 : index
    %c0_70 = arith.constant 0 : index
    %110 = vector.load %arg22[%c0_69, %c0_70] : memref<24x128xbf16, #tpu.memory_space<vmem>>, vector<24x128xbf16>
    %cst_71 = arith.constant dense<0.000000e+00> : vector<16x128xf32>
    %111 = tpu.matmul %31, %110, %cst_71 {dimension_numbers = #tpu.dot_dimension_numbers<[1], [0], [0], [1], [0, 0, 1, 1], [], []>} : vector<16x24xbf16>, vector<24x128xbf16>, vector<16x128xf32> -> vector<16x128xf32>
    %112 = arith.truncf %109 : vector<16x64xf32> to vector<16x64xbf16>
    %c0_72 = arith.constant 0 : index
    %c0_73 = arith.constant 0 : index
    %113 = vector.load %arg23[%c0_72, %c0_73] : memref<64x128xbf16, #tpu.memory_space<vmem>>, vector<64x128xbf16>
    %cst_74 = arith.constant dense<0.000000e+00> : vector<16x128xf32>
    %114 = tpu.matmul %112, %113, %cst_74 {dimension_numbers = #tpu.dot_dimension_numbers<[1], [0], [0], [1], [0, 0, 1, 1], [], []>} : vector<16x64xbf16>, vector<64x128xbf16>, vector<16x128xf32> -> vector<16x128xf32>
    %115 = arith.addf %111, %114 : vector<16x128xf32>
    %c0_75 = arith.constant 0 : index
    %c0_76 = arith.constant 0 : index
    %116 = vector.load %arg24[%c0_75, %c0_76] : memref<1x128xf32, #tpu.memory_space<vmem>>, vector<1x128xf32>
    %117 = vector.broadcast %116 : vector<1x128xf32> to vector<16x128xf32>
    %118 = arith.addf %115, %117 : vector<16x128xf32>
    %cst_77 = arith.constant 0.000000e+00 : f32
    %119 = vector.broadcast %cst_77 : f32 to vector<16x128xf32>
    %120 = arith.maximumf %118, %119 : vector<16x128xf32>
    %121 = arith.truncf %120 : vector<16x128xf32> to vector<16x128xbf16>
    %c0_78 = arith.constant 0 : index
    %c0_79 = arith.constant 0 : index
    %c0_80 = arith.constant 0 : index
    %122 = vector.load %arg25[%c0_78, %c0_79, %c0_80] : memref<1x16x128xbf16, #tpu.memory_space<vmem>>, vector<1x16x128xbf16>
    %123 = vector.shape_cast %122 : vector<1x16x128xbf16> to vector<16x128xbf16>
    %124 = vector.shape_cast %121 : vector<16x128xbf16> to vector<1x16x128xbf16>
    tpu.vector_store %arg25[%c0_78, %c0_79, %c0_80], %124 {strides = array<i32>} : memref<1x16x128xbf16, #tpu.memory_space<vmem>>, vector<1x16x128xbf16>,
    return
  }
  func.func @transform_0(%arg0: i32, %arg1: i32) -> (i32, i32, i32) {
    %c0_i32 = arith.constant 0 : i32
    %c0_i32_0 = arith.constant 0 : i32
    return %arg0, %arg1, %c0_i32 : i32, i32, i32
  }
  func.func @transform_1(%arg0: i32, %arg1: i32) -> (i32, i32, i32) {
    %c0_i32 = arith.constant 0 : i32
    %c0_i32_0 = arith.constant 0 : i32
    return %arg0, %arg1, %c0_i32 : i32, i32, i32
  }
  func.func @transform_2(%arg0: i32, %arg1: i32) -> (i32, i32, i32, i32) {
    %c0_i32 = arith.constant 0 : i32
    %c0_i32_0 = arith.constant 0 : i32
    %c0_i32_1 = arith.constant 0 : i32
    return %arg0, %c0_i32, %arg1, %c0_i32_0 : i32, i32, i32, i32
  }
  func.func @transform_3(%arg0: i32, %arg1: i32) -> (i32, i32) {
    %c0_i32 = arith.constant 0 : i32
    %c0_i32_0 = arith.constant 0 : i32
    %c0_i32_1 = arith.constant 0 : i32
    return %c0_i32, %c0_i32_0 : i32, i32
  }
  func.func @transform_4(%arg0: i32, %arg1: i32) -> (i32, i32) {
    %c0_i32 = arith.constant 0 : i32
    %c0_i32_0 = arith.constant 0 : i32
    %c0_i32_1 = arith.constant 0 : i32
    return %c0_i32, %c0_i32_0 : i32, i32
  }
  func.func @transform_5(%arg0: i32, %arg1: i32) -> (i32, i32) {
    %c0_i32 = arith.constant 0 : i32
    %c0_i32_0 = arith.constant 0 : i32
    %c0_i32_1 = arith.constant 0 : i32
    return %c0_i32, %c0_i32_0 : i32, i32
  }
  func.func @transform_6(%arg0: i32, %arg1: i32) -> (i32, i32) {
    %c0_i32 = arith.constant 0 : i32
    %c0_i32_0 = arith.constant 0 : i32
    %c0_i32_1 = arith.constant 0 : i32
    return %c0_i32, %c0_i32_0 : i32, i32
  }
  func.func @transform_7(%arg0: i32, %arg1: i32) -> (i32, i32) {
    %c0_i32 = arith.constant 0 : i32
    %c0_i32_0 = arith.constant 0 : i32
    %c0_i32_1 = arith.constant 0 : i32
    return %c0_i32, %c0_i32_0 : i32, i32
  }
  func.func @transform_8(%arg0: i32, %arg1: i32) -> (i32, i32) {
    %c0_i32 = arith.constant 0 : i32
    %c0_i32_0 = arith.constant 0 : i32
    %c0_i32_1 = arith.constant 0 : i32
    return %c0_i32, %c0_i32_0 : i32, i32
  }
  func.func @transform_9(%arg0: i32, %arg1: i32) -> (i32, i32) {
    %c0_i32 = arith.constant 0 : i32
    %c0_i32_0 = arith.constant 0 : i32
    %c0_i32_1 = arith.constant 0 : i32
    return %c0_i32, %c0_i32_0 : i32, i32
  }
  func.func @transform_10(%arg0: i32, %arg1: i32) -> (i32, i32) {
    %c0_i32 = arith.constant 0 : i32
    %c0_i32_0 = arith.constant 0 : i32
    %c0_i32_1 = arith.constant 0 : i32
    return %c0_i32, %c0_i32_0 : i32, i32
  }
  func.func @transform_11(%arg0: i32, %arg1: i32) -> (i32, i32) {
    %c0_i32 = arith.constant 0 : i32
    %c0_i32_0 = arith.constant 0 : i32
    %c0_i32_1 = arith.constant 0 : i32
    return %c0_i32, %c0_i32_0 : i32, i32
  }
  func.func @transform_12(%arg0: i32, %arg1: i32) -> (i32, i32) {
    %c0_i32 = arith.constant 0 : i32
    %c0_i32_0 = arith.constant 0 : i32
    %c0_i32_1 = arith.constant 0 : i32
    return %c0_i32, %c0_i32_0 : i32, i32
  }
  func.func @transform_13(%arg0: i32, %arg1: i32) -> (i32, i32) {
    %c0_i32 = arith.constant 0 : i32
    %c0_i32_0 = arith.constant 0 : i32
    %c0_i32_1 = arith.constant 0 : i32
    return %c0_i32, %c0_i32_0 : i32, i32
  }
  func.func @transform_14(%arg0: i32, %arg1: i32) -> (i32, i32) {
    %c0_i32 = arith.constant 0 : i32
    %c0_i32_0 = arith.constant 0 : i32
    %c0_i32_1 = arith.constant 0 : i32
    return %c0_i32, %c0_i32_0 : i32, i32
  }
  func.func @transform_15(%arg0: i32, %arg1: i32) -> (i32, i32) {
    %c0_i32 = arith.constant 0 : i32
    %c0_i32_0 = arith.constant 0 : i32
    %c0_i32_1 = arith.constant 0 : i32
    return %c0_i32, %c0_i32_0 : i32, i32
  }
  func.func @transform_16(%arg0: i32, %arg1: i32) -> (i32, i32) {
    %c0_i32 = arith.constant 0 : i32
    %c0_i32_0 = arith.constant 0 : i32
    %c0_i32_1 = arith.constant 0 : i32
    return %c0_i32, %c0_i32_0 : i32, i32
  }
  func.func @transform_17(%arg0: i32, %arg1: i32) -> (i32, i32) {
    %c0_i32 = arith.constant 0 : i32
    %c0_i32_0 = arith.constant 0 : i32
    %c0_i32_1 = arith.constant 0 : i32
    return %c0_i32, %c0_i32_0 : i32, i32
  }
  func.func @transform_18(%arg0: i32, %arg1: i32) -> (i32, i32) {
    %c0_i32 = arith.constant 0 : i32
    %c0_i32_0 = arith.constant 0 : i32
    %c0_i32_1 = arith.constant 0 : i32
    return %c0_i32, %c0_i32_0 : i32, i32
  }
  func.func @transform_19(%arg0: i32, %arg1: i32) -> (i32, i32) {
    %c0_i32 = arith.constant 0 : i32
    %c0_i32_0 = arith.constant 0 : i32
    %c0_i32_1 = arith.constant 0 : i32
    return %c0_i32, %c0_i32_0 : i32, i32
  }
  func.func @transform_20(%arg0: i32, %arg1: i32) -> (i32, i32) {
    %c0_i32 = arith.constant 0 : i32
    %c0_i32_0 = arith.constant 0 : i32
    %c0_i32_1 = arith.constant 0 : i32
    return %c0_i32, %c0_i32_0 : i32, i32
  }
  func.func @transform_21(%arg0: i32, %arg1: i32) -> (i32, i32) {
    %c0_i32 = arith.constant 0 : i32
    %c0_i32_0 = arith.constant 0 : i32
    %c0_i32_1 = arith.constant 0 : i32
    return %c0_i32, %c0_i32_0 : i32, i32
  }
  func.func @transform_22(%arg0: i32, %arg1: i32) -> (i32, i32) {
    %c0_i32 = arith.constant 0 : i32
    %c0_i32_0 = arith.constant 0 : i32
    %c0_i32_1 = arith.constant 0 : i32
    return %c0_i32, %c0_i32_0 : i32, i32
  }
  func.func @transform_23(%arg0: i32, %arg1: i32) -> (i32, i32, i32) {
    %c0_i32 = arith.constant 0 : i32
    %c0_i32_0 = arith.constant 0 : i32
    return %arg0, %arg1, %c0_i32 : i32, i32, i32
  }
}

module attributes {stable_mosaic.version = 11 : i64} {
  func.func @kern(%arg0: i32, %arg1: i32, %arg2: memref<2xf32, #tpu.memory_space<smem>>, %arg3: memref<1x16x3xf32, #tpu.memory_space<vmem>>, %arg4: memref<1x16x128xbf16, #tpu.memory_space<vmem>>, %arg5: memref<1x16x3xf32, #tpu.memory_space<vmem>>, %arg6: memref<1x16x128xbf16, #tpu.memory_space<vmem>>, %arg7: memref<128x256xbf16, #tpu.memory_space<vmem>>, %arg8: memref<128x256xbf16, #tpu.memory_space<vmem>>, %arg9: memref<1x256xf32, #tpu.memory_space<vmem>>, %arg10: memref<256x256xbf16, #tpu.memory_space<vmem>>, %arg11: memref<256x256xbf16, #tpu.memory_space<vmem>>, %arg12: memref<1x256xf32, #tpu.memory_space<vmem>>, %arg13: memref<256x256xbf16, #tpu.memory_space<vmem>>, %arg14: memref<256x256xbf16, #tpu.memory_space<vmem>>, %arg15: memref<1x256xf32, #tpu.memory_space<vmem>>, %arg16: memref<256x256xbf16, #tpu.memory_space<vmem>>, %arg17: memref<256x256xbf16, #tpu.memory_space<vmem>>, %arg18: memref<1x256xf32, #tpu.memory_space<vmem>>, %arg19: memref<256x256xbf16, #tpu.memory_space<vmem>>, %arg20: memref<256x256xbf16, #tpu.memory_space<vmem>>, %arg21: memref<1x256xf32, #tpu.memory_space<vmem>>, %arg22: memref<256x256xbf16, #tpu.memory_space<vmem>>, %arg23: memref<1x256xf32, #tpu.memory_space<vmem>>, %arg24: memref<256x128xbf16, #tpu.memory_space<vmem>>, %arg25: memref<1x128xf32, #tpu.memory_space<vmem>>, %arg26: memref<1x4x128xf32, #tpu.memory_space<vmem>>, %arg27: memref<1x4x1xf32, #tpu.memory_space<vmem>>, %arg28: memref<1x128xf32, #tpu.memory_space<vmem>>, %arg29: memref<1x1xf32, #tpu.memory_space<vmem>>) attributes {dimension_semantics = [#tpu.dimension_semantics<parallel>, #tpu.dimension_semantics<arbitrary>], iteration_bounds = array<i64: 2, 1>, scalar_prefetch = 0 : i64, scratch_operands = 2 : i64, tpu.core_type = #tpu.core_type<tc>, window_params = [{transform_indices = @transform_0, window_bounds = array<i64: 2>}, {transform_indices = @transform_1, window_bounds = array<i64: 1, 16, 3>}, {transform_indices = @transform_2, window_bounds = array<i64: 1, 16, 128>}, {transform_indices = @transform_3, window_bounds = array<i64: 1, 16, 3>}, {transform_indices = @transform_4, window_bounds = array<i64: 1, 16, 128>}, {pipeline_mode = #tpu.pipeline_mode<synchronous>, transform_indices = @transform_5, window_bounds = array<i64: 128, 256>}, {pipeline_mode = #tpu.pipeline_mode<synchronous>, transform_indices = @transform_6, window_bounds = array<i64: 128, 256>}, {pipeline_mode = #tpu.pipeline_mode<synchronous>, transform_indices = @transform_7, window_bounds = array<i64: 1, 256>}, {pipeline_mode = #tpu.pipeline_mode<synchronous>, transform_indices = @transform_8, window_bounds = array<i64: 256, 256>}, {pipeline_mode = #tpu.pipeline_mode<synchronous>, transform_indices = @transform_9, window_bounds = array<i64: 256, 256>}, {pipeline_mode = #tpu.pipeline_mode<synchronous>, transform_indices = @transform_10, window_bounds = array<i64: 1, 256>}, {pipeline_mode = #tpu.pipeline_mode<synchronous>, transform_indices = @transform_11, window_bounds = array<i64: 256, 256>}, {pipeline_mode = #tpu.pipeline_mode<synchronous>, transform_indices = @transform_12, window_bounds = array<i64: 256, 256>}, {pipeline_mode = #tpu.pipeline_mode<synchronous>, transform_indices = @transform_13, window_bounds = array<i64: 1, 256>}, {pipeline_mode = #tpu.pipeline_mode<synchronous>, transform_indices = @transform_14, window_bounds = array<i64: 256, 256>}, {pipeline_mode = #tpu.pipeline_mode<synchronous>, transform_indices = @transform_15, window_bounds = array<i64: 256, 256>}, {pipeline_mode = #tpu.pipeline_mode<synchronous>, transform_indices = @transform_16, window_bounds = array<i64: 1, 256>}, {pipeline_mode = #tpu.pipeline_mode<synchronous>, transform_indices = @transform_17, window_bounds = array<i64: 256, 256>}, {pipeline_mode = #tpu.pipeline_mode<synchronous>, transform_indices = @transform_18, window_bounds = array<i64: 256, 256>}, {pipeline_mode = #tpu.pipeline_mode<synchronous>, transform_indices = @transform_19, window_bounds = array<i64: 1, 256>}, {pipeline_mode = #tpu.pipeline_mode<synchronous>, transform_indices = @transform_20, window_bounds = array<i64: 256, 256>}, {pipeline_mode = #tpu.pipeline_mode<synchronous>, transform_indices = @transform_21, window_bounds = array<i64: 1, 256>}, {pipeline_mode = #tpu.pipeline_mode<synchronous>, transform_indices = @transform_22, window_bounds = array<i64: 256, 128>}, {pipeline_mode = #tpu.pipeline_mode<synchronous>, transform_indices = @transform_23, window_bounds = array<i64: 1, 128>}, {transform_indices = @transform_24, window_bounds = array<i64: 1, 4, 128>}, {transform_indices = @transform_25, window_bounds = array<i64: 1, 4, 1>}]} {
    %c0_i32 = arith.constant 0 : i32
    %0 = arith.cmpi eq, %arg1, %c0_i32 : i32
    %1 = arith.extui %0 : i1 to i32
    %c0_i32_0 = arith.constant 0 : i32
    %2 = arith.cmpi ne, %1, %c0_i32_0 : i32
    scf.if %2 {
      %cst_23 = arith.constant 0.000000e+00 : f32
      %50 = vector.broadcast %cst_23 : f32 to vector<1x128xf32>
      %c0_24 = arith.constant 0 : index
      %c0_25 = arith.constant 0 : index
      %51 = vector.load %arg28[%c0_24, %c0_25] : memref<1x128xf32, #tpu.memory_space<vmem>>, vector<1x128xf32>
      tpu.vector_store %arg28[%c0_24, %c0_25], %50 {strides = array<i32>} : memref<1x128xf32, #tpu.memory_space<vmem>>, vector<1x128xf32>,
      %cst_26 = arith.constant 0.000000e+00 : f32
      %52 = vector.broadcast %cst_26 : f32 to vector<1x1xf32>
      %c0_27 = arith.constant 0 : index
      %c0_28 = arith.constant 0 : index
      %53 = vector.load %arg29[%c0_27, %c0_28] : memref<1x1xf32, #tpu.memory_space<vmem>>, vector<1x1xf32>
      tpu.vector_store %arg29[%c0_27, %c0_28], %52 {strides = array<i32>} : memref<1x1xf32, #tpu.memory_space<vmem>>, vector<1x1xf32>,
    } else {
    }
    %c0 = arith.constant 0 : index
    %3 = memref.load %arg2[%c0] : memref<2xf32, #tpu.memory_space<smem>>
    %c1 = arith.constant 1 : index
    %4 = memref.load %arg2[%c1] : memref<2xf32, #tpu.memory_space<smem>>
    %c0_1 = arith.constant 0 : index
    %c0_2 = arith.constant 0 : index
    %c0_3 = arith.constant 0 : index
    %5 = vector.load %arg3[%c0_1, %c0_2, %c0_3] : memref<1x16x3xf32, #tpu.memory_space<vmem>>, vector<1x16x3xf32>
    %6 = vector.shape_cast %5 : vector<1x16x3xf32> to vector<16x3xf32>
    %7 = arith.mulf %6, %6 : vector<16x3xf32>
    %cst = arith.constant dense<0.000000e+00> : vector<16xf32>
    %8 = vector.multi_reduction <add>, %7, %cst [1] : vector<16x3xf32> to vector<16xf32>
    %9 = vector.shape_cast %8 : vector<16xf32> to vector<16x1xf32>
    %10 = math.sqrt %9 : vector<16x1xf32>
    %cst_4 = arith.constant 0.000000e+00 : f32
    %11 = arith.subf %cst_4, %3 : f32
    %12 = vector.broadcast %11 : f32 to vector<16x1xf32>
    %13 = arith.mulf %12, %10 : vector<16x1xf32>
    %14 = vector.broadcast %4 : f32 to vector<16x1xf32>
    %15 = arith.addf %13, %14 : vector<16x1xf32>
    %16 = arith.negf %15 : vector<16x1xf32>
    %17 = math.exp %16 : vector<16x1xf32>
    %cst_5 = arith.constant 1.000000e+00 : f32
    %18 = vector.broadcast %cst_5 : f32 to vector<16x1xf32>
    %19 = arith.addf %18, %17 : vector<16x1xf32>
    %20 = arith.divf %18, %19 : vector<16x1xf32>
    %21 = tpu.iota {dimensions = array<i32: 0>} : vector<16x1xi32>
    %c16_i32 = arith.constant 16 : i32
    %22 = arith.muli %arg1, %c16_i32 : i32
    %23 = vector.broadcast %22 : i32 to vector<16x1xi32>
    %24 = arith.addi %21, %23 : vector<16x1xi32>
    %c16_i32_6 = arith.constant 16 : i32
    %25 = vector.broadcast %c16_i32_6 : i32 to vector<16x1xi32>
    %26 = arith.cmpi slt, %24, %25 : vector<16x1xi32>
    %cst_7 = arith.constant 0.000000e+00 : f32
    %27 = vector.broadcast %cst_7 : f32 to vector<16x1xf32>
    %28 = arith.select %26, %20, %27 : vector<16x1xi1>, vector<16x1xf32>
    %c0_8 = arith.constant 0 : index
    %c0_9 = arith.constant 0 : index
    %c0_10 = arith.constant 0 : index
    %29 = vector.load %arg4[%c0_8, %c0_9, %c0_10] : memref<1x16x128xbf16, #tpu.memory_space<vmem>>, vector<1x16x128xbf16>
    %30 = vector.shape_cast %29 : vector<1x16x128xbf16> to vector<16x128xbf16>
    %31 = arith.extf %30 : vector<16x128xbf16> to vector<16x128xf32>
    %c0_11 = arith.constant 0 : index
    %c0_12 = arith.constant 0 : index
    %32 = vector.load %arg28[%c0_11, %c0_12] : memref<1x128xf32, #tpu.memory_space<vmem>>, vector<1x128xf32>
    %33 = vector.broadcast %28 : vector<16x1xf32> to vector<16x128xf32>
    %34 = arith.mulf %33, %31 : vector<16x128xf32>
    %cst_13 = arith.constant dense<0.000000e+00> : vector<128xf32>
    %35 = vector.multi_reduction <add>, %34, %cst_13 [0] : vector<16x128xf32> to vector<128xf32>
    %36 = vector.shape_cast %35 : vector<128xf32> to vector<1x128xf32>
    %37 = arith.addf %32, %36 : vector<1x128xf32>
    %c0_14 = arith.constant 0 : index
    %c0_15 = arith.constant 0 : index
    %38 = vector.load %arg28[%c0_14, %c0_15] : memref<1x128xf32, #tpu.memory_space<vmem>>, vector<1x128xf32>
    tpu.vector_store %arg28[%c0_14, %c0_15], %37 {strides = array<i32>} : memref<1x128xf32, #tpu.memory_space<vmem>>, vector<1x128xf32>,
    %c0_16 = arith.constant 0 : index
    %c0_17 = arith.constant 0 : index
    %39 = vector.load %arg29[%c0_16, %c0_17] : memref<1x1xf32, #tpu.memory_space<vmem>>, vector<1x1xf32>
    %40 = vector.shape_cast %28 : vector<16x1xf32> to vector<1x16x1xf32>
    %cst_18 = arith.constant dense<0.000000e+00> : vector<1xf32>
    %41 = vector.multi_reduction <add>, %40, %cst_18 [1, 2] : vector<1x16x1xf32> to vector<1xf32>
    %42 = vector.shape_cast %41 : vector<1xf32> to vector<1x1x1xf32>
    %43 = vector.extract %42[0, 0, 0] : f32 from vector<1x1x1xf32>
    %44 = vector.broadcast %43 : f32 to vector<1x1xf32>
    %45 = arith.addf %39, %44 : vector<1x1xf32>
    %c0_19 = arith.constant 0 : index
    %c0_20 = arith.constant 0 : index
    %46 = vector.load %arg29[%c0_19, %c0_20] : memref<1x1xf32, #tpu.memory_space<vmem>>, vector<1x1xf32>
    tpu.vector_store %arg29[%c0_19, %c0_20], %45 {strides = array<i32>} : memref<1x1xf32, #tpu.memory_space<vmem>>, vector<1x1xf32>,
    %c0_i32_21 = arith.constant 0 : i32
    %47 = arith.cmpi eq, %arg1, %c0_i32_21 : i32
    %48 = arith.extui %47 : i1 to i32
    %c0_i32_22 = arith.constant 0 : i32
    %49 = arith.cmpi ne, %48, %c0_i32_22 : i32
    scf.if %49 {
      %c0_23 = arith.constant 0 : index
      %c0_24 = arith.constant 0 : index
      %50 = vector.load %arg29[%c0_23, %c0_24] : memref<1x1xf32, #tpu.memory_space<vmem>>, vector<1x1xf32>
      %cst_25 = arith.constant 0.000000e+00 : f32
      %51 = vector.broadcast %cst_25 : f32 to vector<1x1xf32>
      %52 = arith.cmpf oeq, %50, %51 : vector<1x1xf32>
      %53 = arith.extui %52 : vector<1x1xi1> to vector<1x1xi32>
      %54 = arith.sitofp %53 : vector<1x1xi32> to vector<1x1xf32>
      %55 = arith.addf %50, %54 : vector<1x1xf32>
      %cst_26 = arith.constant 9.99999997E-7 : f32
      %56 = vector.broadcast %cst_26 : f32 to vector<1x1xf32>
      %57 = arith.addf %55, %56 : vector<1x1xf32>
      %cst_27 = arith.constant 1.600000e+01 : f32
      %58 = vector.broadcast %cst_27 : f32 to vector<1x1xf32>
      %59 = arith.divf %58, %57 : vector<1x1xf32>
      %c0_28 = arith.constant 0 : index
      %c0_29 = arith.constant 0 : index
      %c0_30 = arith.constant 0 : index
      %60 = vector.load %arg5[%c0_28, %c0_29, %c0_30] : memref<1x16x3xf32, #tpu.memory_space<vmem>>, vector<1x16x3xf32>
      %61 = vector.shape_cast %60 : vector<1x16x3xf32> to vector<16x3xf32>
      %62 = arith.mulf %61, %61 : vector<16x3xf32>
      %cst_31 = arith.constant dense<0.000000e+00> : vector<16xf32>
      %63 = vector.multi_reduction <add>, %62, %cst_31 [1] : vector<16x3xf32> to vector<16xf32>
      %64 = vector.shape_cast %63 : vector<16xf32> to vector<16x1xf32>
      %65 = math.sqrt %64 : vector<16x1xf32>
      %cst_32 = arith.constant 0.000000e+00 : f32
      %66 = arith.subf %cst_32, %3 : f32
      %67 = vector.broadcast %66 : f32 to vector<16x1xf32>
      %68 = arith.mulf %67, %65 : vector<16x1xf32>
      %69 = vector.broadcast %4 : f32 to vector<16x1xf32>
      %70 = arith.addf %68, %69 : vector<16x1xf32>
      %71 = arith.negf %70 : vector<16x1xf32>
      %72 = math.exp %71 : vector<16x1xf32>
      %cst_33 = arith.constant 1.000000e+00 : f32
      %73 = vector.broadcast %cst_33 : f32 to vector<16x1xf32>
      %74 = arith.addf %73, %72 : vector<16x1xf32>
      %75 = arith.divf %73, %74 : vector<16x1xf32>
      %76 = vector.broadcast %59 : vector<1x1xf32> to vector<16x1xf32>
      %77 = arith.mulf %75, %76 : vector<16x1xf32>
      %78 = vector.extract_strided_slice %77 {offsets = [0, 0], sizes = [4, 1], strides = [1, 1]} : vector<16x1xf32> to vector<4x1xf32>
      %c0_34 = arith.constant 0 : index
      %c0_35 = arith.constant 0 : index
      %c0_36 = arith.constant 0 : index
      %79 = vector.load %arg27[%c0_34, %c0_35, %c0_36] : memref<1x4x1xf32, #tpu.memory_space<vmem>>, vector<1x4x1xf32>
      %80 = vector.shape_cast %79 : vector<1x4x1xf32> to vector<4x1xf32>
      %81 = vector.shape_cast %78 : vector<4x1xf32> to vector<1x4x1xf32>
      tpu.vector_store %arg27[%c0_34, %c0_35, %c0_36], %81 {strides = array<i32>} : memref<1x4x1xf32, #tpu.memory_space<vmem>>, vector<1x4x1xf32>,
      %c0_37 = arith.constant 0 : index
      %c0_38 = arith.constant 0 : index
      %82 = vector.load %arg28[%c0_37, %c0_38] : memref<1x128xf32, #tpu.memory_space<vmem>>, vector<1x128xf32>
      %83 = vector.broadcast %59 : vector<1x1xf32> to vector<1x128xf32>
      %84 = arith.mulf %82, %83 : vector<1x128xf32>
      %85 = arith.mulf %50, %59 : vector<1x1xf32>
      %cst_39 = arith.constant 9.99999997E-7 : f32
      %86 = vector.broadcast %cst_39 : f32 to vector<1x1xf32>
      %87 = arith.addf %85, %86 : vector<1x1xf32>
      %88 = vector.broadcast %87 : vector<1x1xf32> to vector<1x128xf32>
      %89 = arith.divf %84, %88 : vector<1x128xf32>
      %90 = arith.truncf %89 : vector<1x128xf32> to vector<1x128xbf16>
      %c0_40 = arith.constant 0 : index
      %c0_41 = arith.constant 0 : index
      %91 = vector.load %arg8[%c0_40, %c0_41] : memref<128x256xbf16, #tpu.memory_space<vmem>>, vector<128x256xbf16>
      %cst_42 = arith.constant dense<0.000000e+00> : vector<1x256xf32>
      %92 = tpu.matmul %90, %91, %cst_42 {dimension_numbers = #tpu.dot_dimension_numbers<[1], [0], [0], [1], [0, 0, 1, 1], [], []>} : vector<1x128xbf16>, vector<128x256xbf16>, vector<1x256xf32> -> vector<1x256xf32>
      %c0_43 = arith.constant 0 : index
      %c0_44 = arith.constant 0 : index
      %c0_45 = arith.constant 0 : index
      %93 = vector.load %arg6[%c0_43, %c0_44, %c0_45] : memref<1x16x128xbf16, #tpu.memory_space<vmem>>, vector<1x16x128xbf16>
      %94 = vector.shape_cast %93 : vector<1x16x128xbf16> to vector<16x128xbf16>
      %c0_46 = arith.constant 0 : index
      %c0_47 = arith.constant 0 : index
      %95 = vector.load %arg7[%c0_46, %c0_47] : memref<128x256xbf16, #tpu.memory_space<vmem>>, vector<128x256xbf16>
      %cst_48 = arith.constant dense<0.000000e+00> : vector<16x256xf32>
      %96 = tpu.matmul %94, %95, %cst_48 {dimension_numbers = #tpu.dot_dimension_numbers<[1], [0], [0], [1], [0, 0, 1, 1], [], []>} : vector<16x128xbf16>, vector<128x256xbf16>, vector<16x256xf32> -> vector<16x256xf32>
      %97 = vector.broadcast %92 : vector<1x256xf32> to vector<16x256xf32>
      %98 = arith.addf %96, %97 : vector<16x256xf32>
      %c0_49 = arith.constant 0 : index
      %c0_50 = arith.constant 0 : index
      %99 = vector.load %arg9[%c0_49, %c0_50] : memref<1x256xf32, #tpu.memory_space<vmem>>, vector<1x256xf32>
      %100 = vector.broadcast %99 : vector<1x256xf32> to vector<16x256xf32>
      %101 = arith.addf %98, %100 : vector<16x256xf32>
      %cst_51 = arith.constant 0.000000e+00 : f32
      %102 = vector.broadcast %cst_51 : f32 to vector<16x256xf32>
      %103 = arith.maximumf %101, %102 : vector<16x256xf32>
      %104 = vector.broadcast %77 : vector<16x1xf32> to vector<16x256xf32>
      %105 = arith.mulf %104, %103 : vector<16x256xf32>
      %cst_52 = arith.constant dense<0.000000e+00> : vector<256xf32>
      %106 = vector.multi_reduction <add>, %105, %cst_52 [0] : vector<16x256xf32> to vector<256xf32>
      %107 = vector.shape_cast %106 : vector<256xf32> to vector<1x256xf32>
      %108 = vector.shape_cast %77 : vector<16x1xf32> to vector<1x16x1xf32>
      %cst_53 = arith.constant dense<0.000000e+00> : vector<1xf32>
      %109 = vector.multi_reduction <add>, %108, %cst_53 [1, 2] : vector<1x16x1xf32> to vector<1xf32>
      %110 = vector.shape_cast %109 : vector<1xf32> to vector<1x1x1xf32>
      %111 = vector.extract %110[0, 0, 0] : f32 from vector<1x1x1xf32>
      %112 = vector.broadcast %111 : f32 to vector<1x1xf32>
      %cst_54 = arith.constant 9.99999997E-7 : f32
      %113 = vector.broadcast %cst_54 : f32 to vector<1x1xf32>
      %114 = arith.addf %112, %113 : vector<1x1xf32>
      %115 = vector.broadcast %114 : vector<1x1xf32> to vector<1x256xf32>
      %116 = arith.divf %107, %115 : vector<1x256xf32>
      %117 = arith.truncf %116 : vector<1x256xf32> to vector<1x256xbf16>
      %c0_55 = arith.constant 0 : index
      %c0_56 = arith.constant 0 : index
      %118 = vector.load %arg11[%c0_55, %c0_56] : memref<256x256xbf16, #tpu.memory_space<vmem>>, vector<256x256xbf16>
      %cst_57 = arith.constant dense<0.000000e+00> : vector<1x256xf32>
      %119 = tpu.matmul %117, %118, %cst_57 {dimension_numbers = #tpu.dot_dimension_numbers<[1], [0], [0], [1], [0, 0, 1, 1], [], []>} : vector<1x256xbf16>, vector<256x256xbf16>, vector<1x256xf32> -> vector<1x256xf32>
      %120 = vector.extract_strided_slice %103 {offsets = [0, 0], sizes = [8, 256], strides = [1, 1]} : vector<16x256xf32> to vector<8x256xf32>
      %121 = arith.truncf %120 : vector<8x256xf32> to vector<8x256xbf16>
      %c0_58 = arith.constant 0 : index
      %c0_59 = arith.constant 0 : index
      %122 = vector.load %arg10[%c0_58, %c0_59] : memref<256x256xbf16, #tpu.memory_space<vmem>>, vector<256x256xbf16>
      %cst_60 = arith.constant dense<0.000000e+00> : vector<8x256xf32>
      %123 = tpu.matmul %121, %122, %cst_60 {dimension_numbers = #tpu.dot_dimension_numbers<[1], [0], [0], [1], [0, 0, 1, 1], [], []>} : vector<8x256xbf16>, vector<256x256xbf16>, vector<8x256xf32> -> vector<8x256xf32>
      %124 = vector.broadcast %119 : vector<1x256xf32> to vector<8x256xf32>
      %125 = arith.addf %123, %124 : vector<8x256xf32>
      %c0_61 = arith.constant 0 : index
      %c0_62 = arith.constant 0 : index
      %126 = vector.load %arg12[%c0_61, %c0_62] : memref<1x256xf32, #tpu.memory_space<vmem>>, vector<1x256xf32>
      %127 = vector.broadcast %126 : vector<1x256xf32> to vector<8x256xf32>
      %128 = arith.addf %125, %127 : vector<8x256xf32>
      %cst_63 = arith.constant 0.000000e+00 : f32
      %129 = vector.broadcast %cst_63 : f32 to vector<8x256xf32>
      %130 = arith.maximumf %128, %129 : vector<8x256xf32>
      %131 = vector.extract_strided_slice %103 {offsets = [0, 0], sizes = [8, 256], strides = [1, 1]} : vector<16x256xf32> to vector<8x256xf32>
      %132 = arith.addf %130, %131 : vector<8x256xf32>
      %133 = vector.extract_strided_slice %77 {offsets = [0, 0], sizes = [8, 1], strides = [1, 1]} : vector<16x1xf32> to vector<8x1xf32>
      %134 = vector.broadcast %133 : vector<8x1xf32> to vector<8x256xf32>
      %135 = arith.mulf %134, %132 : vector<8x256xf32>
      %cst_64 = arith.constant dense<0.000000e+00> : vector<256xf32>
      %136 = vector.multi_reduction <add>, %135, %cst_64 [0] : vector<8x256xf32> to vector<256xf32>
      %137 = vector.shape_cast %136 : vector<256xf32> to vector<1x256xf32>
      %138 = vector.shape_cast %133 : vector<8x1xf32> to vector<1x8x1xf32>
      %cst_65 = arith.constant dense<0.000000e+00> : vector<1xf32>
      %139 = vector.multi_reduction <add>, %138, %cst_65 [1, 2] : vector<1x8x1xf32> to vector<1xf32>
      %140 = vector.shape_cast %139 : vector<1xf32> to vector<1x1x1xf32>
      %141 = vector.extract %140[0, 0, 0] : f32 from vector<1x1x1xf32>
      %142 = vector.broadcast %141 : f32 to vector<1x1xf32>
      %cst_66 = arith.constant 9.99999997E-7 : f32
      %143 = vector.broadcast %cst_66 : f32 to vector<1x1xf32>
      %144 = arith.addf %142, %143 : vector<1x1xf32>
      %145 = vector.broadcast %144 : vector<1x1xf32> to vector<1x256xf32>
      %146 = arith.divf %137, %145 : vector<1x256xf32>
      %147 = arith.truncf %146 : vector<1x256xf32> to vector<1x256xbf16>
      %c0_67 = arith.constant 0 : index
      %c0_68 = arith.constant 0 : index
      %148 = vector.load %arg14[%c0_67, %c0_68] : memref<256x256xbf16, #tpu.memory_space<vmem>>, vector<256x256xbf16>
      %cst_69 = arith.constant dense<0.000000e+00> : vector<1x256xf32>
      %149 = tpu.matmul %147, %148, %cst_69 {dimension_numbers = #tpu.dot_dimension_numbers<[1], [0], [0], [1], [0, 0, 1, 1], [], []>} : vector<1x256xbf16>, vector<256x256xbf16>, vector<1x256xf32> -> vector<1x256xf32>
      %150 = arith.truncf %132 : vector<8x256xf32> to vector<8x256xbf16>
      %c0_70 = arith.constant 0 : index
      %c0_71 = arith.constant 0 : index
      %151 = vector.load %arg13[%c0_70, %c0_71] : memref<256x256xbf16, #tpu.memory_space<vmem>>, vector<256x256xbf16>
      %cst_72 = arith.constant dense<0.000000e+00> : vector<8x256xf32>
      %152 = tpu.matmul %150, %151, %cst_72 {dimension_numbers = #tpu.dot_dimension_numbers<[1], [0], [0], [1], [0, 0, 1, 1], [], []>} : vector<8x256xbf16>, vector<256x256xbf16>, vector<8x256xf32> -> vector<8x256xf32>
      %153 = vector.broadcast %149 : vector<1x256xf32> to vector<8x256xf32>
      %154 = arith.addf %152, %153 : vector<8x256xf32>
      %c0_73 = arith.constant 0 : index
      %c0_74 = arith.constant 0 : index
      %155 = vector.load %arg15[%c0_73, %c0_74] : memref<1x256xf32, #tpu.memory_space<vmem>>, vector<1x256xf32>
      %156 = vector.broadcast %155 : vector<1x256xf32> to vector<8x256xf32>
      %157 = arith.addf %154, %156 : vector<8x256xf32>
      %cst_75 = arith.constant 0.000000e+00 : f32
      %158 = vector.broadcast %cst_75 : f32 to vector<8x256xf32>
      %159 = arith.maximumf %157, %158 : vector<8x256xf32>
      %160 = vector.extract_strided_slice %77 {offsets = [0, 0], sizes = [8, 1], strides = [1, 1]} : vector<16x1xf32> to vector<8x1xf32>
      %161 = vector.broadcast %160 : vector<8x1xf32> to vector<8x256xf32>
      %162 = arith.mulf %161, %159 : vector<8x256xf32>
      %cst_76 = arith.constant dense<0.000000e+00> : vector<256xf32>
      %163 = vector.multi_reduction <add>, %162, %cst_76 [0] : vector<8x256xf32> to vector<256xf32>
      %164 = vector.shape_cast %163 : vector<256xf32> to vector<1x256xf32>
      %165 = vector.shape_cast %160 : vector<8x1xf32> to vector<1x8x1xf32>
      %cst_77 = arith.constant dense<0.000000e+00> : vector<1xf32>
      %166 = vector.multi_reduction <add>, %165, %cst_77 [1, 2] : vector<1x8x1xf32> to vector<1xf32>
      %167 = vector.shape_cast %166 : vector<1xf32> to vector<1x1x1xf32>
      %168 = vector.extract %167[0, 0, 0] : f32 from vector<1x1x1xf32>
      %169 = vector.broadcast %168 : f32 to vector<1x1xf32>
      %cst_78 = arith.constant 9.99999997E-7 : f32
      %170 = vector.broadcast %cst_78 : f32 to vector<1x1xf32>
      %171 = arith.addf %169, %170 : vector<1x1xf32>
      %172 = vector.broadcast %171 : vector<1x1xf32> to vector<1x256xf32>
      %173 = arith.divf %164, %172 : vector<1x256xf32>
      %174 = arith.truncf %173 : vector<1x256xf32> to vector<1x256xbf16>
      %c0_79 = arith.constant 0 : index
      %c0_80 = arith.constant 0 : index
      %175 = vector.load %arg17[%c0_79, %c0_80] : memref<256x256xbf16, #tpu.memory_space<vmem>>, vector<256x256xbf16>
      %cst_81 = arith.constant dense<0.000000e+00> : vector<1x256xf32>
      %176 = tpu.matmul %174, %175, %cst_81 {dimension_numbers = #tpu.dot_dimension_numbers<[1], [0], [0], [1], [0, 0, 1, 1], [], []>} : vector<1x256xbf16>, vector<256x256xbf16>, vector<1x256xf32> -> vector<1x256xf32>
      %177 = vector.extract_strided_slice %159 {offsets = [0, 0], sizes = [4, 256], strides = [1, 1]} : vector<8x256xf32> to vector<4x256xf32>
      %178 = arith.truncf %177 : vector<4x256xf32> to vector<4x256xbf16>
      %c0_82 = arith.constant 0 : index
      %c0_83 = arith.constant 0 : index
      %179 = vector.load %arg16[%c0_82, %c0_83] : memref<256x256xbf16, #tpu.memory_space<vmem>>, vector<256x256xbf16>
      %cst_84 = arith.constant dense<0.000000e+00> : vector<4x256xf32>
      %180 = tpu.matmul %178, %179, %cst_84 {dimension_numbers = #tpu.dot_dimension_numbers<[1], [0], [0], [1], [0, 0, 1, 1], [], []>} : vector<4x256xbf16>, vector<256x256xbf16>, vector<4x256xf32> -> vector<4x256xf32>
      %181 = vector.broadcast %176 : vector<1x256xf32> to vector<4x256xf32>
      %182 = arith.addf %180, %181 : vector<4x256xf32>
      %c0_85 = arith.constant 0 : index
      %c0_86 = arith.constant 0 : index
      %183 = vector.load %arg18[%c0_85, %c0_86] : memref<1x256xf32, #tpu.memory_space<vmem>>, vector<1x256xf32>
      %184 = vector.broadcast %183 : vector<1x256xf32> to vector<4x256xf32>
      %185 = arith.addf %182, %184 : vector<4x256xf32>
      %cst_87 = arith.constant 0.000000e+00 : f32
      %186 = vector.broadcast %cst_87 : f32 to vector<4x256xf32>
      %187 = arith.maximumf %185, %186 : vector<4x256xf32>
      %188 = vector.extract_strided_slice %159 {offsets = [0, 0], sizes = [4, 256], strides = [1, 1]} : vector<8x256xf32> to vector<4x256xf32>
      %189 = arith.addf %187, %188 : vector<4x256xf32>
      %190 = vector.extract_strided_slice %77 {offsets = [0, 0], sizes = [4, 1], strides = [1, 1]} : vector<16x1xf32> to vector<4x1xf32>
      %191 = vector.broadcast %190 : vector<4x1xf32> to vector<4x256xf32>
      %192 = arith.mulf %191, %189 : vector<4x256xf32>
      %cst_88 = arith.constant dense<0.000000e+00> : vector<256xf32>
      %193 = vector.multi_reduction <add>, %192, %cst_88 [0] : vector<4x256xf32> to vector<256xf32>
      %194 = vector.shape_cast %193 : vector<256xf32> to vector<1x256xf32>
      %195 = vector.shape_cast %190 : vector<4x1xf32> to vector<1x4x1xf32>
      %cst_89 = arith.constant dense<0.000000e+00> : vector<1xf32>
      %196 = vector.multi_reduction <add>, %195, %cst_89 [1, 2] : vector<1x4x1xf32> to vector<1xf32>
      %197 = vector.shape_cast %196 : vector<1xf32> to vector<1x1x1xf32>
      %198 = vector.extract %197[0, 0, 0] : f32 from vector<1x1x1xf32>
      %199 = vector.broadcast %198 : f32 to vector<1x1xf32>
      %cst_90 = arith.constant 9.99999997E-7 : f32
      %200 = vector.broadcast %cst_90 : f32 to vector<1x1xf32>
      %201 = arith.addf %199, %200 : vector<1x1xf32>
      %202 = vector.broadcast %201 : vector<1x1xf32> to vector<1x256xf32>
      %203 = arith.divf %194, %202 : vector<1x256xf32>
      %204 = arith.truncf %203 : vector<1x256xf32> to vector<1x256xbf16>
      %c0_91 = arith.constant 0 : index
      %c0_92 = arith.constant 0 : index
      %205 = vector.load %arg20[%c0_91, %c0_92] : memref<256x256xbf16, #tpu.memory_space<vmem>>, vector<256x256xbf16>
      %cst_93 = arith.constant dense<0.000000e+00> : vector<1x256xf32>
      %206 = tpu.matmul %204, %205, %cst_93 {dimension_numbers = #tpu.dot_dimension_numbers<[1], [0], [0], [1], [0, 0, 1, 1], [], []>} : vector<1x256xbf16>, vector<256x256xbf16>, vector<1x256xf32> -> vector<1x256xf32>
      %207 = arith.truncf %189 : vector<4x256xf32> to vector<4x256xbf16>
      %c0_94 = arith.constant 0 : index
      %c0_95 = arith.constant 0 : index
      %208 = vector.load %arg19[%c0_94, %c0_95] : memref<256x256xbf16, #tpu.memory_space<vmem>>, vector<256x256xbf16>
      %cst_96 = arith.constant dense<0.000000e+00> : vector<4x256xf32>
      %209 = tpu.matmul %207, %208, %cst_96 {dimension_numbers = #tpu.dot_dimension_numbers<[1], [0], [0], [1], [0, 0, 1, 1], [], []>} : vector<4x256xbf16>, vector<256x256xbf16>, vector<4x256xf32> -> vector<4x256xf32>
      %210 = vector.broadcast %206 : vector<1x256xf32> to vector<4x256xf32>
      %211 = arith.addf %209, %210 : vector<4x256xf32>
      %c0_97 = arith.constant 0 : index
      %c0_98 = arith.constant 0 : index
      %212 = vector.load %arg21[%c0_97, %c0_98] : memref<1x256xf32, #tpu.memory_space<vmem>>, vector<1x256xf32>
      %213 = vector.broadcast %212 : vector<1x256xf32> to vector<4x256xf32>
      %214 = arith.addf %211, %213 : vector<4x256xf32>
      %cst_99 = arith.constant 0.000000e+00 : f32
      %215 = vector.broadcast %cst_99 : f32 to vector<4x256xf32>
      %216 = arith.maximumf %214, %215 : vector<4x256xf32>
      %217 = arith.truncf %216 : vector<4x256xf32> to vector<4x256xbf16>
      %c0_100 = arith.constant 0 : index
      %c0_101 = arith.constant 0 : index
      %218 = vector.load %arg22[%c0_100, %c0_101] : memref<256x256xbf16, #tpu.memory_space<vmem>>, vector<256x256xbf16>
      %cst_102 = arith.constant dense<0.000000e+00> : vector<4x256xf32>
      %219 = tpu.matmul %217, %218, %cst_102 {dimension_numbers = #tpu.dot_dimension_numbers<[1], [0], [0], [1], [0, 0, 1, 1], [], []>} : vector<4x256xbf16>, vector<256x256xbf16>, vector<4x256xf32> -> vector<4x256xf32>
      %c0_103 = arith.constant 0 : index
      %c0_104 = arith.constant 0 : index
      %220 = vector.load %arg23[%c0_103, %c0_104] : memref<1x256xf32, #tpu.memory_space<vmem>>, vector<1x256xf32>
      %221 = vector.broadcast %220 : vector<1x256xf32> to vector<4x256xf32>
      %222 = arith.addf %219, %221 : vector<4x256xf32>
      %cst_105 = arith.constant 0.000000e+00 : f32
      %223 = vector.broadcast %cst_105 : f32 to vector<4x256xf32>
      %224 = arith.maximumf %222, %223 : vector<4x256xf32>
      %225 = arith.truncf %224 : vector<4x256xf32> to vector<4x256xbf16>
      %c0_106 = arith.constant 0 : index
      %c0_107 = arith.constant 0 : index
      %226 = vector.load %arg24[%c0_106, %c0_107] : memref<256x128xbf16, #tpu.memory_space<vmem>>, vector<256x128xbf16>
      %cst_108 = arith.constant dense<0.000000e+00> : vector<4x128xf32>
      %227 = tpu.matmul %225, %226, %cst_108 {dimension_numbers = #tpu.dot_dimension_numbers<[1], [0], [0], [1], [0, 0, 1, 1], [], []>} : vector<4x256xbf16>, vector<256x128xbf16>, vector<4x128xf32> -> vector<4x128xf32>
      %c0_109 = arith.constant 0 : index
      %c0_110 = arith.constant 0 : index
      %228 = vector.load %arg25[%c0_109, %c0_110] : memref<1x128xf32, #tpu.memory_space<vmem>>, vector<1x128xf32>
      %229 = vector.broadcast %228 : vector<1x128xf32> to vector<4x128xf32>
      %230 = arith.addf %227, %229 : vector<4x128xf32>
      %cst_111 = arith.constant 0.000000e+00 : f32
      %231 = vector.broadcast %cst_111 : f32 to vector<4x128xf32>
      %232 = arith.maximumf %230, %231 : vector<4x128xf32>
      %c0_112 = arith.constant 0 : index
      %c0_113 = arith.constant 0 : index
      %c0_114 = arith.constant 0 : index
      %233 = vector.load %arg26[%c0_112, %c0_113, %c0_114] : memref<1x4x128xf32, #tpu.memory_space<vmem>>, vector<1x4x128xf32>
      %234 = vector.shape_cast %233 : vector<1x4x128xf32> to vector<4x128xf32>
      %235 = vector.shape_cast %232 : vector<4x128xf32> to vector<1x4x128xf32>
      tpu.vector_store %arg26[%c0_112, %c0_113, %c0_114], %235 {strides = array<i32>} : memref<1x4x128xf32, #tpu.memory_space<vmem>>, vector<1x4x128xf32>,
    } else {
    }
    return
  }
  func.func @transform_0(%arg0: i32, %arg1: i32) -> i32 {
    %c0_i32 = arith.constant 0 : i32
    %c0_i32_0 = arith.constant 0 : i32
    return %c0_i32 : i32
  }
  func.func @transform_1(%arg0: i32, %arg1: i32) -> (i32, i32, i32) {
    %c0_i32 = arith.constant 0 : i32
    %c0_i32_0 = arith.constant 0 : i32
    return %arg0, %arg1, %c0_i32 : i32, i32, i32
  }
  func.func @transform_2(%arg0: i32, %arg1: i32) -> (i32, i32, i32) {
    %c0_i32 = arith.constant 0 : i32
    %c0_i32_0 = arith.constant 0 : i32
    return %arg0, %arg1, %c0_i32 : i32, i32, i32
  }
  func.func @transform_3(%arg0: i32, %arg1: i32) -> (i32, i32, i32) {
    %c0_i32 = arith.constant 0 : i32
    %c0_i32_0 = arith.constant 0 : i32
    %c0_i32_1 = arith.constant 0 : i32
    return %arg0, %c0_i32, %c0_i32_0 : i32, i32, i32
  }
  func.func @transform_4(%arg0: i32, %arg1: i32) -> (i32, i32, i32) {
    %c0_i32 = arith.constant 0 : i32
    %c0_i32_0 = arith.constant 0 : i32
    %c0_i32_1 = arith.constant 0 : i32
    return %arg0, %c0_i32, %c0_i32_0 : i32, i32, i32
  }
  func.func @transform_5(%arg0: i32, %arg1: i32) -> (i32, i32) {
    %c0_i32 = arith.constant 0 : i32
    %c0_i32_0 = arith.constant 0 : i32
    %c0_i32_1 = arith.constant 0 : i32
    return %c0_i32, %c0_i32_0 : i32, i32
  }
  func.func @transform_6(%arg0: i32, %arg1: i32) -> (i32, i32) {
    %c0_i32 = arith.constant 0 : i32
    %c0_i32_0 = arith.constant 0 : i32
    %c0_i32_1 = arith.constant 0 : i32
    return %c0_i32, %c0_i32_0 : i32, i32
  }
  func.func @transform_7(%arg0: i32, %arg1: i32) -> (i32, i32) {
    %c0_i32 = arith.constant 0 : i32
    %c0_i32_0 = arith.constant 0 : i32
    %c0_i32_1 = arith.constant 0 : i32
    return %c0_i32, %c0_i32_0 : i32, i32
  }
  func.func @transform_8(%arg0: i32, %arg1: i32) -> (i32, i32) {
    %c0_i32 = arith.constant 0 : i32
    %c0_i32_0 = arith.constant 0 : i32
    %c0_i32_1 = arith.constant 0 : i32
    return %c0_i32, %c0_i32_0 : i32, i32
  }
  func.func @transform_9(%arg0: i32, %arg1: i32) -> (i32, i32) {
    %c0_i32 = arith.constant 0 : i32
    %c0_i32_0 = arith.constant 0 : i32
    %c0_i32_1 = arith.constant 0 : i32
    return %c0_i32, %c0_i32_0 : i32, i32
  }
  func.func @transform_10(%arg0: i32, %arg1: i32) -> (i32, i32) {
    %c0_i32 = arith.constant 0 : i32
    %c0_i32_0 = arith.constant 0 : i32
    %c0_i32_1 = arith.constant 0 : i32
    return %c0_i32, %c0_i32_0 : i32, i32
  }
  func.func @transform_11(%arg0: i32, %arg1: i32) -> (i32, i32) {
    %c0_i32 = arith.constant 0 : i32
    %c0_i32_0 = arith.constant 0 : i32
    %c0_i32_1 = arith.constant 0 : i32
    return %c0_i32, %c0_i32_0 : i32, i32
  }
  func.func @transform_12(%arg0: i32, %arg1: i32) -> (i32, i32) {
    %c0_i32 = arith.constant 0 : i32
    %c0_i32_0 = arith.constant 0 : i32
    %c0_i32_1 = arith.constant 0 : i32
    return %c0_i32, %c0_i32_0 : i32, i32
  }
  func.func @transform_13(%arg0: i32, %arg1: i32) -> (i32, i32) {
    %c0_i32 = arith.constant 0 : i32
    %c0_i32_0 = arith.constant 0 : i32
    %c0_i32_1 = arith.constant 0 : i32
    return %c0_i32, %c0_i32_0 : i32, i32
  }
  func.func @transform_14(%arg0: i32, %arg1: i32) -> (i32, i32) {
    %c0_i32 = arith.constant 0 : i32
    %c0_i32_0 = arith.constant 0 : i32
    %c0_i32_1 = arith.constant 0 : i32
    return %c0_i32, %c0_i32_0 : i32, i32
  }
  func.func @transform_15(%arg0: i32, %arg1: i32) -> (i32, i32) {
    %c0_i32 = arith.constant 0 : i32
    %c0_i32_0 = arith.constant 0 : i32
    %c0_i32_1 = arith.constant 0 : i32
    return %c0_i32, %c0_i32_0 : i32, i32
  }
  func.func @transform_16(%arg0: i32, %arg1: i32) -> (i32, i32) {
    %c0_i32 = arith.constant 0 : i32
    %c0_i32_0 = arith.constant 0 : i32
    %c0_i32_1 = arith.constant 0 : i32
    return %c0_i32, %c0_i32_0 : i32, i32
  }
  func.func @transform_17(%arg0: i32, %arg1: i32) -> (i32, i32) {
    %c0_i32 = arith.constant 0 : i32
    %c0_i32_0 = arith.constant 0 : i32
    %c0_i32_1 = arith.constant 0 : i32
    return %c0_i32, %c0_i32_0 : i32, i32
  }
  func.func @transform_18(%arg0: i32, %arg1: i32) -> (i32, i32) {
    %c0_i32 = arith.constant 0 : i32
    %c0_i32_0 = arith.constant 0 : i32
    %c0_i32_1 = arith.constant 0 : i32
    return %c0_i32, %c0_i32_0 : i32, i32
  }
  func.func @transform_19(%arg0: i32, %arg1: i32) -> (i32, i32) {
    %c0_i32 = arith.constant 0 : i32
    %c0_i32_0 = arith.constant 0 : i32
    %c0_i32_1 = arith.constant 0 : i32
    return %c0_i32, %c0_i32_0 : i32, i32
  }
  func.func @transform_20(%arg0: i32, %arg1: i32) -> (i32, i32) {
    %c0_i32 = arith.constant 0 : i32
    %c0_i32_0 = arith.constant 0 : i32
    %c0_i32_1 = arith.constant 0 : i32
    return %c0_i32, %c0_i32_0 : i32, i32
  }
  func.func @transform_21(%arg0: i32, %arg1: i32) -> (i32, i32) {
    %c0_i32 = arith.constant 0 : i32
    %c0_i32_0 = arith.constant 0 : i32
    %c0_i32_1 = arith.constant 0 : i32
    return %c0_i32, %c0_i32_0 : i32, i32
  }
  func.func @transform_22(%arg0: i32, %arg1: i32) -> (i32, i32) {
    %c0_i32 = arith.constant 0 : i32
    %c0_i32_0 = arith.constant 0 : i32
    %c0_i32_1 = arith.constant 0 : i32
    return %c0_i32, %c0_i32_0 : i32, i32
  }
  func.func @transform_23(%arg0: i32, %arg1: i32) -> (i32, i32) {
    %c0_i32 = arith.constant 0 : i32
    %c0_i32_0 = arith.constant 0 : i32
    %c0_i32_1 = arith.constant 0 : i32
    return %c0_i32, %c0_i32_0 : i32, i32
  }
  func.func @transform_24(%arg0: i32, %arg1: i32) -> (i32, i32, i32) {
    %c0_i32 = arith.constant 0 : i32
    %c0_i32_0 = arith.constant 0 : i32
    %c0_i32_1 = arith.constant 0 : i32
    return %arg0, %c0_i32, %c0_i32_0 : i32, i32, i32
  }
  func.func @transform_25(%arg0: i32, %arg1: i32) -> (i32, i32, i32) {
    %c0_i32 = arith.constant 0 : i32
    %c0_i32_0 = arith.constant 0 : i32
    %c0_i32_1 = arith.constant 0 : i32
    return %arg0, %c0_i32, %c0_i32_0 : i32, i32, i32
  }
}

</mosaic_0001>

<bundles_post_ra>
// kernel: point_encoder_forward.4
= control target key start
LH: loop header
LB: loop body
LE: loop exit
PB: predicated region body
PF: predicated region fallthrough
CT: control target
= control target key end

     0   :  { %s422_s9 = smov 0   ;;  %s424_s10 = smov 0   ;;  %s462_s0 = inlined_call_operand.vmem [shape: f32[2,16,3], index: 0, kind: input, shape index: {}]   ;;  %s463_s1 = inlined_call_operand.vmem [shape: f32[3,24], index: 1, kind: input, shape index: {}]   ;;  %s464_s2 = inlined_call_operand.vmem [shape: bf16[2,16,24], index: 2, kind: output, shape index: {}]  }
   0x1   :  { %s426_s11 = smov 0  }
   0x2 LB: > { %s24_s12 = sadd.s32 1, %s398_s10  ;;  %p336_p0 = scmp.ge.s32.totalorder %s402_s11, 1  ;;  %s402_s11 = sphi %s426_s11, %s12_s11   ;;  %s398_s10 = sphi %s424_s10, %s466_s10   ;;  %s394_s9 = sphi %s422_s9, %s465_s9  }
   0x3   : > { %p26_p1 = scmp.ge.s32.totalorder %s24_s12, 2  ;;  %p133_p2 = scmp.lt.s32.totalorder %s402_s11, 3 }
   0x5   : > { %s468_s12 = smov (%p26_p1, %s24_s12), 0  ;;  %p134_p3 = pnand %p336_p0, %p133_p2 }
   0x6   : > { %p164_p4 = scmp.lt.s32.totalorder (!%p134_p3), %s394_s9, 1  ;;  %v404_v0 = vmov (!%p134_p3), 1   ;;  %v405_v1 = vmov (!%p134_p3), 0   ;;  %v406_v4 = vmov (!%p134_p3), 2   ;;  %v196_v5 = vlaneseq (!%p134_p3)  ;;  %v185_v9 = vld [vmem:[%s463_s1] sm:$0x7] (!%p134_p3) }
   0x7   : > { %137 = sbr.rel (%p134_p3) target bundleno = 162 (0xa2), region = 28  ;;  %377 = vset.pattern.permute.xlu1 (!%p134_p3), %v404_v0  ;;  %376 = vset.pattern.permute.xlu0 (!%p134_p3), %v405_v1  ;;  %vm242_vm0 = vcmask (!%p134_p3), 191488  }
   0x8   : > { %v197_v6 = vshrl.u32 (!%p134_p3), %v196_v5, 7 }
   0xa   : > { %v212_v7 = vsub.s32 (!%p134_p3), 1, %v197_v6  ;;  %v198_v8 = vsub.s32 (!%p134_p3), 0, %v197_v6  ;;  %v228_v12 = vsub.s32 (!%p134_p3), 2, %v197_v6 }
   0xc   : > { %v213_v13 = vrot.slane (!%p134_p3), %v185_v9, %v212_v7  ;;  %v199_v14 = vrot.slane (!%p134_p3), %v185_v9, %v198_v8  ;;  %v229_v17 = vrot.slane (!%p134_p3), %v185_v9, %v228_v12 }
   0xe   : > { %s470_s9 = smov (!%p164_p4, %s394_s9), 1 }
   0xf   : > { %s345_s13 = sshll.u32 %s470_s9, 4  ;;  %s346_s19 = sshll.u32 %s470_s9, 3 }
  0x10   : > { %s171_s16 = scalar_lea.vmem %s462_s0, %s345_s13  ;;  %s181_s22 = scalar_lea.vmem %s464_s2, %s346_s19 }
  0x11   : > { %v183_v2 = vld [vmem:[%s171_s16] sm:$0xff]  ;;  %v184_v3 = vld [vmem:[%s171_s16 + $0x8] sm:$0xff] }
  0x12   : > { %203 = vperm.xlu1 %377, %v183_v2   ;;  %188 = vperm.xlu0 %376, %v183_v2  }
  0x16   : > { %207 = vperm.xlu1 %377, %v184_v3   ;;  %193 = vperm.xlu0 %376, %v184_v3  }
  0x1a   : > { %379 = vset.pattern.permute.xlu1 %v406_v4  ;;  %378 = vset.pattern.permute.xlu0 %v406_v4 }
  0x1b   : > { %223 = vperm.xlu1 %379, %v184_v3   ;;  %219 = vperm.xlu0 %378, %v183_v2  }
  0x91   : > { %v204_v10 = vpop.permute.xlu1 %203  ;;  %v189_v11 = vpop.permute.xlu0 %188 }
  0x92   : > { %v214_v18 = vmul.f32 %v213_v13, %v204_v10  ;;  %v200_v19 = vmul.f32 %v199_v14, %v189_v11 }
  0x94   : > { %v216_v24 = vadd.f32 %v214_v18, %v200_v19 }
  0x95   : > { %v208_v15 = vpop.permute.xlu1 %207  ;;  %v194_v16 = vpop.permute.xlu0 %193 }
  0x96   : > { %v215_v20 = vmul.f32 %v213_v13, %v208_v15  ;;  %v201_v21 = vmul.f32 %v199_v14, %v194_v16 }
  0x98   : > { %v217_v25 = vadd.f32 %v215_v20, %v201_v21 }
  0x9a   : > { %v224_v22 = vpop.permute.xlu1 %223  ;;  %v220_v23 = vpop.permute.xlu0 %219 }
  0x9b   : > { %v231_v26 = vmul.f32 %v229_v17, %v224_v22  ;;  %v230_v27 = vmul.f32 %v229_v17, %v220_v23 }
  0x9d   : > { %v233_v28 = vadd.f32 %v231_v26, %v217_v25  ;;  %v232_v29 = vadd.f32 %v230_v27, %v216_v24 }
  0x9f   : > { %v348_v30 = vpack.c.bf16 %v233_v28, %v233_v28  ;;  %v347_v31 = vpack.c.bf16 %v232_v29, %v232_v29 }
  0xa1   : > { %244 = vst.msk [vmem:[%s181_s22 + $0x4] sm:$0xf] %vm242_vm0, %v348_v30  ;;  %243 = vst.msk [vmem:[%s181_s22] sm:$0xf] %vm242_vm0, %v347_v31 }
  0xa2 PF: > { %s12_s11 = sadd.s32 1, %s402_s11   ;;  %s465_s9 = smov %s398_s10 }
  0xa3   : > { %p9_p5 = scmp.ge.s32.totalorder %s12_s11, 4   ;;  %s466_s10 = smov %s468_s12 }
  0xa5   :  { %11 = sbr.rel (!%p9_p5) target bundleno = 2 (0x2), region = 58 }

// kernel: point_encoder_forward.5
= control target key start
LH: loop header
LB: loop body
LE: loop exit
PB: predicated region body
PF: predicated region fallthrough
CT: control target
= control target key end

     0   :  { %s774_s21 = smov 0   ;;  %s776_s22 = smov 0   ;;  %s830_s0 = inlined_call_operand.vmem [shape: f32[2,16,3], index: 0, kind: input, shape index: {}]   ;;  %s831_s1 = inlined_call_operand.vmem [shape: bf16[2,4,16,24], index: 1, kind: input, shape index: {}]   ;;  %s832_s2 = inlined_call_operand.vmem [shape: f32[3,24], index: 2, kind: input, shape index: {}]   ;;  %s833_s3 = inlined_call_operand.vmem [shape: f32[1,24], index: 3, kind: input, shape index: {}]   ;;  %s834_s4 = inlined_call_operand.vmem [shape: bf16[24,48], index: 4, kind: input, shape index: {}]   ;;  %s835_s5 = inlined_call_operand.vmem [shape: f32[1,48], index: 5, kind: input, shape index: {}]   ;;  %s836_s6 = inlined_call_operand.vmem [shape: bf16[2,16,48], index: 6, kind: output, shape index: {}]  }
   0x1   :  { %s778_s23 = smov 0  }
   0x2 LB: > { %s28_s24 = sadd.s32 1, %s728_s22  ;;  %p618_p0 = scmp.ge.s32.totalorder %s732_s23, 1  ;;  %s732_s23 = sphi %s778_s23, %s16_s23   ;;  %s728_s22 = sphi %s776_s22, %s838_s22   ;;  %s724_s21 = sphi %s774_s21, %s837_s21  }
   0x3   : > { %p30_p1 = scmp.ge.s32.totalorder %s28_s24, 2  ;;  %p250_p2 = scmp.lt.s32.totalorder %s732_s23, 3 }
   0x5   : > { %s840_s24 = smov (%p30_p1, %s28_s24), 0  ;;  %p251_p3 = pnand %p618_p0, %p250_p2 }
   0x6   : > { %p298_p4 = scmp.lt.s32.totalorder (!%p251_p3), %s724_s21, 1  ;;  %v734_v0 = vmov (!%p251_p3), 1   ;;  %v735_v1 = vmov (!%p251_p3), 0   ;;  %v736_v4 = vmov (!%p251_p3), 2   ;;  %v708_v5 = vld [vmem:[%s834_s4] sm:$0xff] (!%p251_p3)   ;;  %vm453_vm0 = vcmask (!%p251_p3), 1043456  }
   0x7   : > { %254 = sbr.rel (%p251_p3) target bundleno = 393 (0x189), region = 44  ;;  %705 = vset.pattern.permute.xlu1 (!%p251_p3), %v734_v0  ;;  %704 = vset.pattern.permute.xlu0 (!%p251_p3), %v735_v1  ;;  %v709_v6 = vld [vmem:[%s834_s4 + $0x8] ss:$0 sps:$4 sm:$0xff] (!%p251_p3)   ;;  %v737_v7 = vmov (!%p251_p3), 0.0   ;;  %vm738_vm1 = vmmov (!%p251_p3), 0   ;;  %v341_v9 = vlaneseq (!%p251_p3)  ;;  %vm449_vm2 = vcmask (!%p251_p3), 195584  }
   0x8   : > { %667 = vmatprep.subr.bf16.mxu0 (!%p251_p3), %v737_v7  ;;  %671 = vmatprep.mubr.msk.bf16.mxu0 (!%p251_p3), %vm738_vm1, %v737_v7  ;;  %v455_v8 = vsel (!%p251_p3), %vm453_vm0, %v709_v6, 0  ;;  %v330_v13 = vld [vmem:[%s832_s2] sm:$0x7] (!%p251_p3)  ;;  %vm506_vm3 = vcmask (!%p251_p3), 388096  }
   0x9   : > { %668 = vmatpush3.bf16.msra.mxu0 (!%p251_p3), %v708_v5  ;;  %v342_v10 = vshrl.u32 (!%p251_p3), %v341_v9, 7  ;;  %v625_v35 = vld [vmem:[%s833_s3] ss:$0 sm:$0xff] (!%p251_p3) }
   0xa   : > { %669 = vmatprep.subr.bf16.mxu0 (!%p251_p3), %v737_v7 }
   0xb   : > { %v357_v11 = vsub.s32 (!%p251_p3), 1, %v342_v10  ;;  %v343_v12 = vsub.s32 (!%p251_p3), 0, %v342_v10  ;;  %v373_v16 = vsub.s32 (!%p251_p3), 2, %v342_v10 }
   0xd   : > { %670 = vmatpush3.bf16.msra.mxu0 (!%p251_p3), %v455_v8  ;;  %v358_v17 = vrot.slane (!%p251_p3), %v330_v13, %v357_v11  ;;  %v344_v18 = vrot.slane (!%p251_p3), %v330_v13, %v343_v12  ;;  %v374_v21 = vrot.slane (!%p251_p3), %v330_v13, %v373_v16  ;;  %v632_v8 = vld [vmem:[%s835_s5] ss:$0 sm:$0xff] (!%p251_p3) }
   0xe   : > { %s842_s21 = smov (!%p298_p4, %s724_s21), 1 }
   0xf   : > { %s640_s25 = sshll.u32 %s842_s21, 4  ;;  %s641_s11 = sshll.u32 %s842_s21, 5 }
  0x10   : > { %s305_s28 = scalar_lea.vmem %s830_s0, %s640_s25  ;;  %s315_s14 = scalar_lea.vmem %s831_s1, %s641_s11 }
  0x11   : > { %v328_v2 = vld [vmem:[%s305_s28] sm:$0xff]  ;;  %v329_v3 = vld [vmem:[%s305_s28 + $0x8] sm:$0xff]  ;;  %v662_v28 = vld [vmem:[%s315_s14 + $0x10] sm:$0xff]   ;;  %s642_s19 = sshll.u32 %s842_s21, 3 }
  0x12   : > { %348 = vperm.xlu1 %705, %v328_v2   ;;  %333 = vperm.xlu0 %704, %v328_v2   ;;  %v646_v26 = vld [vmem:[%s315_s14] sm:$0xff]   ;;  %v661_v27 = vld [vmem:[%s315_s14 + $0x8] sm:$0xff]   ;;  %v663_v38 = vld [vmem:[%s315_s14 + $0x18] sm:$0xff]   ;;  %v656_v39 = vunpack.c.h.bf16 %v662_v28  ;;  %v655_v44 = vunpack.c.l.bf16 %v662_v28  ;;  %s325_s26 = scalar_lea.vmem %s836_s6, %s642_s19 }
  0x13   : > { %v648_v36 = vunpack.c.h.bf16 %v646_v26  ;;  %v652_v37 = vunpack.c.h.bf16 %v661_v27  ;;  %v647_v41 = vunpack.c.l.bf16 %v646_v26  ;;  %v651_v43 = vunpack.c.l.bf16 %v661_v27 }
  0x14   : > { %v660_v47 = vunpack.c.h.bf16 %v663_v38  ;;  %v659_v48 = vunpack.c.l.bf16 %v663_v38 }
  0x16   : > { %352 = vperm.xlu1 %705, %v329_v3   ;;  %338 = vperm.xlu0 %704, %v329_v3  }
  0x1a   : > { %707 = vset.pattern.permute.xlu1 %v736_v4  ;;  %706 = vset.pattern.permute.xlu0 %v736_v4 }
  0x1b   : > { %368 = vperm.xlu1 %707, %v329_v3   ;;  %364 = vperm.xlu0 %706, %v328_v2  }
  0x91   : > { %v349_v14 = vpop.permute.xlu1 %348  ;;  %v334_v15 = vpop.permute.xlu0 %333 }
  0x92   : > { %v359_v22 = vmul.f32 %v358_v17, %v349_v14  ;;  %v345_v23 = vmul.f32 %v344_v18, %v334_v15 }
  0x94   : > { %v361_v31 = vadd.f32 %v359_v22, %v345_v23 }
  0x95   : > { %v353_v19 = vpop.permute.xlu1 %352  ;;  %v339_v20 = vpop.permute.xlu0 %338 }
  0x96   : > { %v360_v24 = vmul.f32 %v358_v17, %v353_v19  ;;  %v346_v25 = vmul.f32 %v344_v18, %v339_v20 }
  0x98   : > { %v362_v32 = vadd.f32 %v360_v24, %v346_v25 }
  0x9a   : > { %v369_v29 = vpop.permute.xlu1 %368  ;;  %v365_v30 = vpop.permute.xlu0 %364 }
  0x9b   : > { %v376_v33 = vmul.f32 %v374_v21, %v369_v29  ;;  %v375_v34 = vmul.f32 %v374_v21, %v365_v30 }
  0x9d   : > { %v378_v40 = vadd.f32 %v376_v33, %v362_v32  ;;  %v377_v42 = vadd.f32 %v375_v34, %v361_v31 }
  0x9f   : > { %v387_v45 = vadd.f32 %v625_v35, %v378_v40  ;;  %v386_v46 = vadd.f32 %v625_v35, %v377_v42 }
  0xa1   : > { %v393_v49 = vadd.f32 %v648_v36, %v387_v45  ;;  %v402_v50 = vadd.f32 %v652_v37, %v387_v45  ;;  %v413_v51 = vadd.f32 %v656_v39, %v387_v45  ;;  %v392_v52 = vadd.f32 %v647_v41, %v386_v46 }
  0xa2   : > { %v401_v53 = vadd.f32 %v651_v43, %v386_v46  ;;  %v412_v54 = vadd.f32 %v655_v44, %v386_v46  ;;  %v424_v58 = vadd.f32 %v660_v47, %v387_v45  ;;  %v423_v60 = vadd.f32 %v659_v48, %v386_v46 }
  0xa3   : > { %v395_v55 = vmax.f32 %v393_v49, 0.0  ;;  %v404_v56 = vmax.f32 %v402_v50, 0.0  ;;  %v394_v57 = vmax.f32 %v392_v52, 0.0  ;;  %v415_v61 = vmax.f32 %v413_v51, 0.0 }
  0xa4   : > { %v403_v59 = vmax.f32 %v401_v53, 0.0  ;;  %v414_v63 = vmax.f32 %v412_v54, 0.0  ;;  %v426_v2 = vmax.f32 %v424_v58, 0.0  ;;  %v425_v4 = vmax.f32 %v423_v60, 0.0 }
  0xa5   : > { %v406_v62 = vmax.f32 %v395_v55, %v404_v56 }
  0xa6   : > { %v405_v0 = vmax.f32 %v394_v57, %v403_v59 }
  0xa7   : > { %v417_v1 = vmax.f32 %v406_v62, %v415_v61 }
  0xa8   : > { %v416_v3 = vmax.f32 %v405_v0, %v414_v63 }
  0xa9   : > { %v428_v5 = vmax.f32 %v417_v1, %v426_v2 }
  0xaa   : > { %v427_v6 = vmax.f32 %v416_v3, %v425_v4 }
  0xac   : > { %v429_v7 = vpack.c.bf16 %v428_v5, %v427_v6 }
  0xae   : > { %672 = vmatmul.mubr.msk.bf16.vlgmr.msra.gmra.mrb[0].mxu0 %vm449_vm2, %v429_v7 }
 0x181   : > { %v491_v9 = vpop.f32.mrb[0].mxu0 }
 0x182   : > { %v492_v10 = vadd.f32 %v632_v8, %v491_v9  ;;  %v673_v11 = vpop.f32.mrb[1].mxu0 }
 0x183   : > { %v494_v12 = vpop.f32.mrb[2].mxu0 }
 0x184   : > { %v643_v13 = vpack.c.bf16 %v492_v10, %v492_v10  ;;  %v495_v14 = vadd.f32 %v632_v8, %v494_v12  ;;  %v674_v15 = vpop.f32.mrb[3].mxu0 }
 0x186   : > { %507 = vst.msk [vmem:[%s325_s26] sm:$0xf] %vm506_vm3, %v643_v13  ;;  %v644_v16 = vpack.c.bf16 %v495_v14, %v495_v14 }
 0x188   : > { %508 = vst.msk [vmem:[%s325_s26 + $0x4] sm:$0xf] %vm506_vm3, %v644_v16 }
 0x189 PF: > { %s16_s23 = sadd.s32 1, %s732_s23   ;;  %s837_s21 = smov %s728_s22 }
 0x18a   : > { %p13_p5 = scmp.ge.s32.totalorder %s16_s23, 4   ;;  %s838_s22 = smov %s840_s24 }
 0x18c   :  { %15 = sbr.rel (!%p13_p5) target bundleno = 2 (0x2), region = 80 }

// kernel: point_encoder_forward.6
= control target key start
LH: loop header
LB: loop body
LE: loop exit
PB: predicated region body
PF: predicated region fallthrough
CT: control target
= control target key end

     0   :  { %s2553_s30 = smov 0   ;;  %s2555_s24 = smov 0   ;;  %s2872_s0 = inlined_call_operand.vmem [shape: f32[2,16,3], index: 0, kind: input, shape index: {}]   ;;  %s2873_s1 = inlined_call_operand.vmem [shape: bf16[2,16,48], index: 1, kind: input, shape index: {}]   ;;  %s2874_s2 = inlined_call_operand.vmem [shape: bf16[2,4,16,24], index: 2, kind: input, shape index: {}]   ;;  %s2875_s3 = inlined_call_operand.vmem [shape: f32[3,64], index: 3, kind: input, shape index: {}]   ;;  %s2876_s4 = inlined_call_operand.vmem [shape: f32[1,64], index: 4, kind: input, shape index: {}]   ;;  %s2877_s5 = inlined_call_operand.vmem [shape: bf16[64,64], index: 5, kind: input, shape index: {}]   ;;  %s2878_s6 = inlined_call_operand.vmem [shape: f32[1,64], index: 6, kind: input, shape index: {}]   ;;  %s2879_s7 = inlined_call_operand.vmem [shape: bf16[64,128], index: 7, kind: input, shape index: {}]   ;;  %s2880_s8 = inlined_call_operand.vmem [shape: bf16[24,128], index: 8, kind: input, shape index: {}]   ;;  %s2881_s9 = inlined_call_operand.vmem [shape: f32[1,128], index: 9, kind: input, shape index: {}]   ;;  %s2882_s10 = inlined_call_operand.vmem [shape: bf16[128,128], index: 10, kind: input, shape index: {}]   ;;  %s2883_s11 = inlined_call_operand.vmem [shape: f32[1,128], index: 11, kind: input, shape index: {}]   ;;  %s2884_s12 = inlined_call_operand.vmem [shape: bf16[128,40], index: 12, kind: input, shape index: {}]   ;;  %s2885_s13 = inlined_call_operand.vmem [shape: f32[1,40], index: 13, kind: input, shape index: {}]   ;;  %s2886_s14 = inlined_call_operand.vmem [shape: bf16[40,128], index: 14, kind: input, shape index: {}]   ;;  %s2887_s15 = inlined_call_operand.vmem [shape: bf16[64,128], index: 15, kind: input, shape index: {}]   ;;  %s2888_s16 = inlined_call_operand.vmem [shape: bf16[24,128], index: 16, kind: input, shape index: {}]   ;;  %s2889_s17 = inlined_call_operand.vmem [shape: f32[1,128], index: 17, kind: input, shape index: {}]   ;;  %s2890_s18 = inlined_call_operand.vmem [shape: bf16[128,64], index: 18, kind: input, shape index: {}]   ;;  %s2891_s19 = inlined_call_operand.vmem [shape: f32[1,64], index: 19, kind: input, shape index: {}]   ;;  %s2892_s20 = inlined_call_operand.vmem [shape: bf16[24,128], index: 20, kind: input, shape index: {}]   ;;  %s2893_s21 = inlined_call_operand.vmem [shape: bf16[64,128], index: 21, kind: input, shape index: {}]   ;;  %s2894_s22 = inlined_call_operand.vmem [shape: f32[1,128], index: 22, kind: input, shape index: {}]   ;;  %s2895_s23 = inlined_call_operand.vmem [shape: bf16[2,16,128], index: 23, kind: output, shape index: {}]  }
   0x1   :  { %2899 = sst [smem:[#allocation4_spill]] %s2872_s0 }
   0x2   :  { %2900 = sst [smem:[#allocation5_spill]] %s2873_s1 }
   0x3   :  { %2901 = sst [smem:[#allocation6_spill]] %s2874_s2 }
   0x4   :  { %2902 = sst [smem:[#allocation7_spill]] %s2875_s3 }
   0x5   :  { %2903 = sst [smem:[#allocation8_spill]] %s2876_s4  ;;  %s2551_s4 = smov 0  }
   0x6   :  { %2904 = sst [smem:[#allocation9_spill]] %s2877_s5 }
   0x7   :  { %2905 = sst [smem:[#allocation10_spill]] %s2878_s6 }
   0x8   :  { %2906 = sst [smem:[#allocation11_spill]] %s2879_s7 }
   0x9 LB: > { %2907 = sst [smem:[#allocation2_spill]] %s2420_s30  ;;  %s45_s25 = sadd.s32 1, %s2420_s30  ;;  %s2424_s24 = sphi %s2555_s24, %s33_s24   ;;  %s2420_s30 = sphi %s2553_s30, %s2918_s30   ;;  %s2416_s4 = sphi %s2551_s4, %s2917_s4  }
   0xa   : > { %p2000_p0 = scmp.ge.s32.totalorder %s2424_s24, 1  ;;  %p47_p1 = scmp.ge.s32.totalorder %s45_s25, 2 }
   0xb   : > { %p692_p2 = scmp.lt.s32.totalorder %s2424_s24, 3 }
   0xc   : > { %s2920_s25 = smov (%p47_p1, %s45_s25), 0 }
   0xd   : > { %2908 = sst [smem:[#allocation3_spill]] %s2920_s25  ;;  %p693_p3 = pnand %p2000_p0, %p692_p2 }
   0xe   : > { %p783_p4 = scmp.lt.s32.totalorder (!%p693_p3), %s2416_s4, 1  ;;  %v2426_v0 = vmov (!%p693_p3), 1   ;;  %v2427_v1 = vmov (!%p693_p3), 0   ;;  %s2909_s2 = sld [smem:[#allocation4_spill]] (!%p693_p3)  ;;  %v2428_v5 = vmov (!%p693_p3), 0.0   ;;  %v2429_v7 = vmov (!%p693_p3), 2  }
   0xf   : > { %696 = sbr.rel (%p693_p3) target bundleno = 1726 (0x6be), region = 112  ;;  %2350 = vset.pattern.permute.xlu1 (!%p693_p3), %v2426_v0  ;;  %2349 = vset.pattern.permute.xlu0 (!%p693_p3), %v2427_v1  ;;  %s2910_s29 = sld [smem:[#allocation9_spill]] (!%p693_p3)  ;;  %vm2430_vm0 = vmmov (!%p693_p3), 0   ;;  %v2357_v20 = vld [vmem:[%s2880_s8] sm:$0xff] (!%p693_p3)   ;;  %v2358_v21 = vld [vmem:[%s2880_s8 + $0x8] ss:$0 sps:$4 sm:$0xff] (!%p693_p3)   ;;  %v882_v53 = vlaneseq (!%p693_p3) }
  0x10   : > { %2178 = vmatprep.subr.bf16.mxu0 (!%p693_p3), %v2428_v5  ;;  %2190 = vmatprep.subr.bf16.mxu1 (!%p693_p3), %v2428_v5  ;;  %s2911_s1 = sld [smem:[#allocation5_spill]] (!%p693_p3)  ;;  %s2912_s25 = sld [smem:[#allocation6_spill]] (!%p693_p3)  ;;  %vm1041_vm1 = vcmask (!%p693_p3), 1043456   ;;  %vm1037_vm2 = vcmask (!%p693_p3), 195584   ;;  %vm971_vm3 = vcmask (!%p693_p3), 523264   ;;  %vm1489_vm4 = vcmask (!%p693_p3), 326656  }
  0x11   : > { %2186 = vmatprep.mubr.msk.bf16.mxu0 (!%p693_p3), %vm2430_vm0, %v2428_v5  ;;  %2194 = vmatprep.mubr.msk.bf16.mxu1 (!%p693_p3), %vm2430_vm0, %v2428_v5  ;;  %v1043_v30 = vsel (!%p693_p3), %vm1041_vm1, %v2358_v21, 0  ;;  %s2913_s28 = sld [smem:[#allocation11_spill]] (!%p693_p3)  ;;  %v883_v54 = vshrl.u32 (!%p693_p3), %v882_v53, 7 }
  0x12   : > { %2191 = vmatpush3.bf16.msra.mxu1 (!%p693_p3), %v2357_v20 }
  0x13   : > { %2192 = vmatprep.subr.bf16.mxu1 (!%p693_p3), %v2428_v5  ;;  %v898_v55 = vsub.s32 (!%p693_p3), 1, %v883_v54  ;;  %v884_v56 = vsub.s32 (!%p693_p3), 0, %v883_v54  ;;  %v914_v60 = vsub.s32 (!%p693_p3), 2, %v883_v54 }
  0x15   : > { %v2353_v4 = vld [vmem:[%s2910_s29] sm:$0xff] (!%p693_p3)   ;;  %v2354_v6 = vld [vmem:[%s2910_s29 + $0x8] sm:$0xff] (!%p693_p3)   ;;  %v2355_v11 = vld [vmem:[%s2910_s29 + $0x10] sm:$0xff] (!%p693_p3)  }
  0x16   : > { %s2922_s4 = smov (!%p783_p4, %s2416_s4), 1  ;;  %2179 = vmatpush3.bf16.msra.mxu0 %v2353_v4  ;;  %v2356_v13 = vld [vmem:[%s2910_s29 + $0x18] sm:$0xff]   ;;  %2193 = vmatpush3.bf16.msra.mxu1 %v1043_v30 }
  0x17   : > { %s2084_s5 = sshll.u32 %s2922_s4, 4  ;;  %s2085_s27 = sshll.u32 %s2922_s4, 3  ;;  %2180 = vmatprep.subr.bf16.mxu0 %v2428_v5  ;;  %2198 = vmatprep.subr.bf16.mxu1 %v2428_v5  ;;  %v2359_v48 = vld [vmem:[%s2913_s28] sm:$0xff]   ;;  %v2360_v52 = vld [vmem:[%s2913_s28 + $0x8] sm:$0xff]   ;;  %v2361_v21 = vld [vmem:[%s2913_s28 + $0x10] sm:$0xff]  }
  0x18   : > { %s790_s6 = scalar_lea.vmem %s2909_s2, %s2084_s5  ;;  %s2086_s3 = sshll.u32 %s2922_s4, 5  ;;  %v2366_v30 = vld [vmem:[%s2882_s10 + $0x18] sm:$0xff]  }
  0x19   : > { %v869_v2 = vld [vmem:[%s790_s6] sm:$0xff]  ;;  %v870_v3 = vld [vmem:[%s790_s6 + $0x8] sm:$0xff]  ;;  %s800_s26 = scalar_lea.vmem %s2911_s1, %s2085_s27  ;;  %s2593_s30 = scalar_lea.vmem %s2912_s25, %s2086_s3 }
  0x1a   : > { %889 = vperm.xlu1 %2350, %v869_v2   ;;  %874 = vperm.xlu0 %2349, %v869_v2   ;;  %v2091_v8 = vld [vmem:[%s800_s26] sm:$0xff]   ;;  %v2115_v10 = vld [vmem:[%s2593_s30 + $0x8] sm:$0xff]   ;;  %v2116_v19 = vld [vmem:[%s2593_s30 + $0x10] sm:$0xff]   ;;  %s2914_s1 = sld [smem:[#allocation7_spill]]  ;;  %s2915_s6 = sld [smem:[#allocation8_spill]] }
  0x1b   : > { %v2095_v9 = vld [vmem:[%s2593_s30] sm:$0xff]   ;;  %2181 = vmatpush3.bf16.msra.mxu0 %v2354_v6  ;;  %v2092_v12 = vunpack.c.l.bf16 %v2091_v8  ;;  %v2093_v14 = vunpack.c.h.bf16 %v2091_v8  ;;  %v2100_v17 = vunpack.c.l.bf16 %v2115_v10  ;;  %v2101_v18 = vunpack.c.h.bf16 %v2115_v10  ;;  %v2117_v25 = vld [vmem:[%s2593_s30 + $0x18] sm:$0xff]   ;;  %s2916_s2 = sld [smem:[#allocation10_spill]] }
  0x1c   : > { %2182 = vmatprep.subr.bf16.mxu0 %v2428_v5  ;;  %v2096_v15 = vunpack.c.l.bf16 %v2095_v9  ;;  %v2097_v16 = vunpack.c.h.bf16 %v2095_v9  ;;  %v2104_v27 = vunpack.c.l.bf16 %v2116_v19  ;;  %v2105_v28 = vunpack.c.h.bf16 %v2116_v19 }
  0x1d   : > { %v840_v24 = vadd.f32 %v2100_v17, %v2092_v12  ;;  %v841_v26 = vadd.f32 %v2101_v18, %v2093_v14  ;;  %v2108_v29 = vunpack.c.l.bf16 %v2117_v25  ;;  %v2109_v37 = vunpack.c.h.bf16 %v2117_v25 }
  0x1e   : > { %893 = vperm.xlu1 %2350, %v870_v3   ;;  %879 = vperm.xlu0 %2349, %v870_v3   ;;  %v831_v22 = vadd.f32 %v2096_v15, %v2092_v12  ;;  %v832_v23 = vadd.f32 %v2097_v16, %v2093_v14  ;;  %v851_v35 = vadd.f32 %v2104_v27, %v2092_v12 }
  0x1f   : > { %2183 = vmatpush3.bf16.msra.mxu0 %v2355_v11  ;;  %v842_v33 = vmax.f32 %v840_v24, 0.0  ;;  %v843_v34 = vmax.f32 %v841_v26, 0.0  ;;  %v852_v36 = vadd.f32 %v2105_v28, %v2093_v14  ;;  %v862_v39 = vadd.f32 %v2108_v29, %v2092_v12  ;;  %v2364_v24 = vld [vmem:[%s2882_s10 + $0x8] sm:$0xff]   ;;  %v2365_v26 = vld [vmem:[%s2882_s10 + $0x10] sm:$0xff]  }
  0x20   : > { %2184 = vmatprep.subr.bf16.mxu0 %v2428_v5  ;;  %v833_v31 = vmax.f32 %v831_v22, 0.0  ;;  %v834_v32 = vmax.f32 %v832_v23, 0.0  ;;  %v853_v41 = vmax.f32 %v851_v35, 0.0  ;;  %v863_v43 = vadd.f32 %v2109_v37, %v2093_v14  ;;  %v871_v57 = vld [vmem:[%s2914_s1] sm:$0x7]  ;;  %v2362_v22 = vld [vmem:[%s2913_s28 + $0x18] sm:$0xff]  }
  0x21   : > { %v854_v42 = vmax.f32 %v852_v36, 0.0  ;;  %v864_v44 = vmax.f32 %v862_v39, 0.0  ;;  %v899_v61 = vrot.slane %v871_v57, %v898_v55  ;;  %v885_v62 = vrot.slane %v871_v57, %v884_v56  ;;  %v2363_v23 = vld [vmem:[%s2882_s10] sm:$0xff]  }
  0x22   : > { %2352 = vset.pattern.permute.xlu1 %v2429_v7  ;;  %2351 = vset.pattern.permute.xlu0 %v2429_v7  ;;  %v844_v38 = vmax.f32 %v833_v31, %v842_v33  ;;  %v845_v40 = vmax.f32 %v834_v32, %v843_v34  ;;  %v865_v47 = vmax.f32 %v863_v43, 0.0  ;;  %v915_v1 = vrot.slane %v871_v57, %v914_v60  ;;  %v2367_v31 = vld [vmem:[%s2882_s10 + $0x20] sm:$0xff]   ;;  %v2368_v32 = vld [vmem:[%s2882_s10 + $0x28] sm:$0xff]  }
  0x23   : > { %909 = vperm.xlu1 %2352, %v870_v3   ;;  %905 = vperm.xlu0 %2351, %v869_v2   ;;  %v2016_v33 = vld [vmem:[%s2916_s2] ss:$0 sm:$0xff] }
  0x24   : > { %2185 = vmatpush3.bf16.msra.mxu0 %v2356_v13  ;;  %v855_v45 = vmax.f32 %v844_v38, %v853_v41  ;;  %v856_v46 = vmax.f32 %v845_v40, %v854_v42  ;;  %v2015_v13 = vld [vmem:[%s2915_s6] ss:$0 sm:$0xff]  ;;  %v2369_v41 = vld [vmem:[%s2882_s10 + $0x30] sm:$0xff]   ;;  %v2370_v42 = vld [vmem:[%s2882_s10 + $0x38] sm:$0xff]   ;;  %s820_s6 = scalar_lea.vmem %s2895_s23, %s2085_s27 }
  0x25   : > { %2210 = vmatprep.subr.bf16.mxu0 %v2428_v5  ;;  %v2375_v43 = vld [vmem:[%s2884_s12] sm:$0xff]  }
  0x26   : > { %v866_v49 = vmax.f32 %v855_v45, %v864_v44  ;;  %v867_v50 = vmax.f32 %v856_v46, %v865_v47  ;;  %v2376_v44 = vld [vmem:[%s2884_s12 + $0x8] sm:$0xff]   ;;  %v2377_v45 = vld [vmem:[%s2884_s12 + $0x10] sm:$0xff]   ;;  %v2378_v46 = vld [vmem:[%s2884_s12 + $0x18] sm:$0xff]  }
  0x27   : > { %v2379_v47 = vld [vmem:[%s2884_s12 + $0x20] sm:$0xff]  }
  0x28   : > { %v2625_v51 = vpack.c.bf16 %v867_v50, %v866_v49  ;;  %v2030_v50 = vld [vmem:[%s2881_s9] ss:$0 sm:$0xff] }
  0x2a   : > { %2195 = vmatmul.mubr.msk.bf16.vlgmr.msra.gmra.mrb[0].mxu1 %vm1037_vm2, %v2625_v51 }
  0x2b   : > { %2199 = vmatpush3.bf16.msra.mxu1 %v2359_v48  ;;  %2206 = vmatprep.mubr.msk.bf16.mxu1 %vm2430_vm0, %v2428_v5  ;;  %v2380_v48 = vld [vmem:[%s2884_s12 + $0x28] sm:$0xff]  }
  0x2c   : > { %2200 = vmatprep.subr.bf16.mxu1 %v2428_v5 }
  0x2f   : > { %2201 = vmatpush3.bf16.msra.mxu1 %v2360_v52 }
  0x30   : > { %2202 = vmatprep.subr.bf16.mxu1 %v2428_v5 }
  0x33   : > { %2203 = vmatpush3.bf16.msra.mxu1 %v2361_v21  ;;  %v2385_v21 = vld [vmem:[%s2886_s14 + $0x8] sm:$0xff]  }
  0x34   : > { %2204 = vmatprep.subr.bf16.mxu1 %v2428_v5 }
  0x37   : > { %2205 = vmatpush3.bf16.msra.mxu1 %v2362_v22  ;;  %v2386_v22 = vld [vmem:[%s2888_s16 + $0x8] ss:$0 sps:$4 sm:$0xff]  }
  0x38   : > { %2230 = vmatprep.subr.bf16.mxu1 %v2428_v5 }
  0x99   : > { %v890_v58 = vpop.permute.xlu1 %889  ;;  %v875_v59 = vpop.permute.xlu0 %874 }
  0x9a   : > { %v900_v2 = vmul.f32 %v899_v61, %v890_v58  ;;  %v886_v3 = vmul.f32 %v885_v62, %v875_v59 }
  0x9c   : > { %v902_v9 = vadd.f32 %v900_v2, %v886_v3  ;;  %v2381_v2 = vld [vmem:[%s2884_s12 + $0x30] sm:$0xff]   ;;  %v2382_v3 = vld [vmem:[%s2884_s12 + $0x38] sm:$0xff]  }
  0x9d   : > { %v894_v63 = vpop.permute.xlu1 %893  ;;  %v880_v0 = vpop.permute.xlu0 %879 }
  0x9e   : > { %v901_v4 = vmul.f32 %v899_v61, %v894_v63  ;;  %v887_v6 = vmul.f32 %v885_v62, %v880_v0  ;;  %v2371_v61 = vld [vmem:[%s2887_s15] sm:$0xff]   ;;  %v2372_v63 = vld [vmem:[%s2887_s15 + $0x8] sm:$0xff]   ;;  %v2373_v0 = vld [vmem:[%s2887_s15 + $0x10] sm:$0xff]  }
  0xa0   : > { %v903_v10 = vadd.f32 %v901_v4, %v887_v6  ;;  %v2031_v4 = vld [vmem:[%s2883_s11] ss:$0 sm:$0xff] }
  0xa2   : > { %v910_v7 = vpop.permute.xlu1 %909  ;;  %v906_v8 = vpop.permute.xlu0 %905 }
  0xa3   : > { %v917_v11 = vmul.f32 %v915_v1, %v910_v7  ;;  %v916_v12 = vmul.f32 %v915_v1, %v906_v8  ;;  %v2374_v1 = vld [vmem:[%s2887_s15 + $0x18] sm:$0xff]  }
  0xa5   : > { %v919_v14 = vadd.f32 %v917_v11, %v903_v10  ;;  %v918_v15 = vadd.f32 %v916_v12, %v902_v9 }
  0xa7   : > { %v928_v16 = vadd.f32 %v2015_v13, %v919_v14  ;;  %v927_v17 = vadd.f32 %v2015_v13, %v918_v15  ;;  %v2383_v14 = vld [vmem:[%s2886_s14] sm:$0xff]  }
  0xa9   : > { %v930_v18 = vmax.f32 %v928_v16, 0.0  ;;  %v929_v19 = vmax.f32 %v927_v17, 0.0 }
  0xab   : > { %v931_v20 = vpack.c.bf16 %v930_v18, %v929_v19 }
  0xad   : > { %2187 = vmatmul.mubr.msk.bf16.vlgmr.msra.gmra.mrb[0].mxu0 %vm971_vm3, %v931_v20  ;;  %v2384_v20 = vld [vmem:[%s2888_s16] sm:$0xff]  }
  0xae   : > { %2226 = vmatprep.mubr.msk.bf16.mxu0 %vm2430_vm0, %v2428_v5  ;;  %2211 = vmatpush3.bf16.msra.mxu0 %v2363_v23  ;;  %v2387_v23 = vld [vmem:[%s2886_s14 + $0x10] ss:$0 sps:$4 sm:$0xff]  }
  0xaf   : > { %2212 = vmatprep.subr.bf16.mxu0 %v2428_v5 }
  0xb2   : > { %2213 = vmatpush3.bf16.msra.mxu0 %v2364_v24  ;;  %v1550_v24 = vsel %vm1041_vm1, %v2386_v22, 0 }
  0xb3   : > { %2214 = vmatprep.subr.bf16.mxu0 %v2428_v5 }
  0xb6   : > { %2215 = vmatpush3.bf16.msra.mxu0 %v2365_v26  ;;  %v2040_v26 = vld [vmem:[%s2885_s13] ss:$0 sm:$0xff] }
  0xb7   : > { %2216 = vmatprep.subr.bf16.mxu0 %v2428_v5 }
  0xba   : > { %2217 = vmatpush3.bf16.msra.mxu0 %v2366_v30 }
  0xbb   : > { %2218 = vmatprep.subr.bf16.mxu0 %v2428_v5 }
  0xbe   : > { %2219 = vmatpush3.bf16.msra.mxu0 %v2367_v31 }
  0xbf   : > { %2220 = vmatprep.subr.bf16.mxu0 %v2428_v5 }
  0xc2   : > { %2221 = vmatpush3.bf16.msra.mxu0 %v2368_v32 }
  0xc3   : > { %2222 = vmatprep.subr.bf16.mxu0 %v2428_v5 }
  0xc6   : > { %2223 = vmatpush3.bf16.msra.mxu0 %v2369_v41 }
  0xc7   : > { %2224 = vmatprep.subr.bf16.mxu0 %v2428_v5 }
  0xca   : > { %2225 = vmatpush3.bf16.msra.mxu0 %v2370_v42 }
  0xcb   : > { %2250 = vmatprep.subr.bf16.mxu0 %v2428_v5 }
  0xfd   : > { %v1079_v25 = vpop.f32.mrb[0].mxu1 }
  0xfe   : > { %v2196_v27 = vpop.f32.mrb[1].mxu1 }
  0xff   : > { %v1082_v28 = vpop.f32.mrb[2].mxu1 }
 0x100   : > { %v2197_v29 = vpop.f32.mrb[3].mxu1 }
 0x180   : > { %v1009_v34 = vpop.f32.mrb[0].mxu0 }
 0x181   : > { %v2188_v35 = vpop.f32.mrb[1].mxu0  ;;  %v1010_v37 = vadd.f32 %v2016_v33, %v1009_v34 }
 0x182   : > { %v1012_v36 = vpop.f32.mrb[2].mxu0  ;;  %v2388_v35 = vld [vmem:[%s2890_s18] sm:$0xff]  }
 0x183   : > { %v1013_v38 = vadd.f32 %v2016_v33, %v1012_v36  ;;  %v2189_v39 = vpop.f32.mrb[3].mxu0 }
 0x184   : > { %v2391_v39 = vld [vmem:[%s2890_s18 + $0x18] sm:$0xff]  }
 0x185   : > { %v1016_v40 = vpack.c.bf16 %v1013_v38, %v1010_v37  ;;  %v2389_v37 = vld [vmem:[%s2890_s18 + $0x8] sm:$0xff]   ;;  %v2390_v38 = vld [vmem:[%s2890_s18 + $0x10] sm:$0xff]  }
 0x187   : > { %2207 = vmatmul.mubr.msk.bf16.vlgmr.msra.gmra.mrb[4].mxu1 %vm971_vm3, %v1016_v40 }
 0x188   : > { %2246 = vmatprep.mubr.msk.bf16.mxu1 %vm2430_vm0, %v2428_v5  ;;  %2231 = vmatpush3.bf16.msra.mxu1 %v2375_v43  ;;  %v2393_v43 = vld [vmem:[%s2890_s18 + $0x28] sm:$0xff]  }
 0x189   : > { %2232 = vmatprep.subr.bf16.mxu1 %v2428_v5 }
 0x18c   : > { %2233 = vmatpush3.bf16.msra.mxu1 %v2376_v44 }
 0x18d   : > { %2234 = vmatprep.subr.bf16.mxu1 %v2428_v5 }
 0x190   : > { %2235 = vmatpush3.bf16.msra.mxu1 %v2377_v45 }
 0x191   : > { %2236 = vmatprep.subr.bf16.mxu1 %v2428_v5 }
 0x194   : > { %2237 = vmatpush3.bf16.msra.mxu1 %v2378_v46  ;;  %v2394_v46 = vld [vmem:[%s2890_s18 + $0x30] sm:$0xff]  }
 0x195   : > { %2238 = vmatprep.subr.bf16.mxu1 %v2428_v5 }
 0x198   : > { %2239 = vmatpush3.bf16.msra.mxu1 %v2379_v47  ;;  %v2395_v47 = vld [vmem:[%s2890_s18 + $0x38] sm:$0xff]  }
 0x199   : > { %2240 = vmatprep.subr.bf16.mxu1 %v2428_v5 }
 0x19c   : > { %2241 = vmatpush3.bf16.msra.mxu1 %v2380_v48  ;;  %v2396_v48 = vld [vmem:[%s2893_s21] sm:$0xff]  }
 0x19d   : > { %2242 = vmatprep.subr.bf16.mxu1 %v2428_v5 }
 0x1a0   : > { %2243 = vmatpush3.bf16.msra.mxu1 %v2381_v2  ;;  %v2399_v2 = vld [vmem:[%s2893_s21 + $0x18] sm:$0xff]  }
 0x1a1   : > { %2244 = vmatprep.subr.bf16.mxu1 %v2428_v5 }
 0x1a4   : > { %2245 = vmatpush3.bf16.msra.mxu1 %v2382_v3  ;;  %v2062_v3 = vld [vmem:[%s2891_s19] ss:$0 sm:$0xff] }
 0x1a5   : > { %2262 = vmatprep.subr.bf16.mxu1 %v2428_v5 }
 0x25a   : > { %v1147_v49 = vpop.f32.mrb[4].mxu1 }
 0x25b   : > { %v1148_v52 = vadd.f32 %v1147_v49, %v1079_v25  ;;  %v2208_v53 = vpop.f32.mrb[5].mxu1  ;;  %v1494_v25 = vsel %vm1041_vm1, %v2387_v23, 0  ;;  %v2397_v49 = vld [vmem:[%s2893_s21 + $0x8] sm:$0xff]  }
 0x25c   : > { %v1150_v54 = vpop.f32.mrb[6].mxu1 }
 0x25d   : > { %v1161_v55 = vadd.f32 %v2030_v50, %v1148_v52  ;;  %v1151_v56 = vadd.f32 %v1150_v54, %v1082_v28  ;;  %v2209_v57 = vpop.f32.mrb[7].mxu1 }
 0x25f   : > { %v1162_v58 = vadd.f32 %v2030_v50, %v1151_v56  ;;  %v1163_v59 = vmax.f32 %v1161_v55, 0.0  ;;  %v2398_v50 = vld [vmem:[%s2893_s21 + $0x10] sm:$0xff]   ;;  %v2061_v55 = vld [vmem:[%s2889_s17] ss:$0 sm:$0xff] }
 0x261   : > { %v1164_v60 = vmax.f32 %v1162_v58, 0.0 }
 0x263   : > { %v1165_v62 = vpack.c.bf16 %v1164_v60, %v1163_v59 }
 0x265   : > { %2227 = vmatmul.mubr.bf16.vlgmr.msra.gmra.mrb[4].mxu0 %v1165_v62 }
 0x266   : > { %2251 = vmatpush3.bf16.msra.mxu0 %v2371_v61  ;;  %2258 = vmatprep.mubr.msk.bf16.mxu0 %vm2430_vm0, %v2428_v5 }
 0x267   : > { %2252 = vmatprep.subr.bf16.mxu0 %v2428_v5 }
 0x26a   : > { %2253 = vmatpush3.bf16.msra.mxu0 %v2372_v63 }
 0x26b   : > { %2254 = vmatprep.subr.bf16.mxu0 %v2428_v5 }
 0x26e   : > { %2255 = vmatpush3.bf16.msra.mxu0 %v2373_v0 }
 0x26f   : > { %2256 = vmatprep.subr.bf16.mxu0 %v2428_v5 }
 0x272   : > { %2257 = vmatpush3.bf16.msra.mxu0 %v2374_v1 }
 0x273   : > { %2272 = vmatprep.subr.bf16.mxu0 %v2428_v5 }
 0x275   : > { %2259 = vmatmul.mubr.msk.bf16.vlgmr.msra.gmra.mrb[8].mxu0 %vm971_vm3, %v1016_v40  ;;  %v2392_v40 = vld [vmem:[%s2890_s18 + $0x20] sm:$0xff]  }
 0x276   : > { %2276 = vmatprep.mubr.msk.bf16.mxu0 %vm2430_vm0, %v2428_v5  ;;  %2273 = vmatpush3.bf16.msra.mxu0 %v2384_v20  ;;  %v2079_v20 = vld [vmem:[%s2894_s22] ss:$0 sm:$0xff] }
 0x277   : > { %2274 = vmatprep.subr.bf16.mxu0 %v2428_v5 }
 0x27a   : > { %2275 = vmatpush3.bf16.msra.mxu0 %v1550_v24 }
 0x27b   : > { %2300 = vmatprep.subr.bf16.mxu0 %v2428_v5 }
 0x27d   : > { %2277 = vmatmul.mubr.msk.bf16.vlgmr.msra.gmra.mrb[12].mxu0 %vm1037_vm2, %v2625_v51 }
 0x27e   : > { %2308 = vmatprep.mubr.msk.bf16.mxu0 %vm2430_vm0, %v2428_v5  ;;  %2301 = vmatpush3.bf16.msra.mxu0 %v2396_v48 }
 0x27f   : > { %2302 = vmatprep.subr.bf16.mxu0 %v2428_v5 }
 0x282   : > { %2303 = vmatpush3.bf16.msra.mxu0 %v2397_v49 }
 0x283   : > { %2304 = vmatprep.subr.bf16.mxu0 %v2428_v5 }
 0x286   : > { %2305 = vmatpush3.bf16.msra.mxu0 %v2398_v50 }
 0x287   : > { %2306 = vmatprep.subr.bf16.mxu0 %v2428_v5 }
 0x28a   : > { %2307 = vmatpush3.bf16.msra.mxu0 %v2399_v2 }
 0x28b   : > { %2312 = vmatprep.subr.bf16.mxu0 %v2428_v5 }
 0x338   : > { %v1271_v6 = vpop.f32.mrb[4].mxu0 }
 0x339   : > { %v1272_v7 = vadd.f32 %v2031_v4, %v1271_v6  ;;  %v2228_v8 = vpop.f32.mrb[5].mxu0 }
 0x33a   : > { %v1274_v9 = vpop.f32.mrb[6].mxu0 }
 0x33b   : > { %v1275_v10 = vadd.f32 %v2031_v4, %v1274_v9  ;;  %v2229_v11 = vpop.f32.mrb[7].mxu0  ;;  %v1278_v12 = vmax.f32 %v1272_v7, 0.0 }
 0x33c   : > { %v2400_v11 = vld [vmem:[%s2892_s20] sm:$0xff]  }
 0x33d   : > { %v1279_v13 = vmax.f32 %v1275_v10, 0.0 }
 0x33f   : > { %v1280_v15 = vpack.c.bf16 %v1279_v13, %v1278_v12  ;;  %v2401_v13 = vld [vmem:[%s2892_s20 + $0x8] ss:$0 sps:$4 sm:$0xff]  }
 0x341   : > { %2247 = vmatmul.mubr.bf16.vlgmr.msra.gmra.mrb[8].mxu1 %v1280_v15 }
 0x342   : > { %2263 = vmatpush3.bf16.msra.mxu1 %v2383_v14  ;;  %2268 = vmatprep.mubr.msk.bf16.mxu1 %vm2430_vm0, %v2428_v5  ;;  %v1809_v14 = vsel %vm1041_vm1, %v2401_v13, 0 }
 0x343   : > { %2264 = vmatprep.subr.bf16.mxu1 %v2428_v5 }
 0x346   : > { %2265 = vmatpush3.bf16.msra.mxu1 %v2385_v21 }
 0x347   : > { %2266 = vmatprep.subr.bf16.mxu1 %v2428_v5 }
 0x348   : > { %v2756_v16 = vpop.f32.mrb[8].mxu0 }
 0x349   : > { %v2260_v17 = vpop.f32.mrb[9].mxu0 }
 0x34a   : > { %v2758_v18 = vpop.f32.mrb[10].mxu0  ;;  %2267 = vmatpush3.bf16.msra.mxu1 %v1494_v25 }
 0x34b   : > { %v2261_v19 = vpop.f32.mrb[11].mxu0  ;;  %2280 = vmatprep.subr.bf16.mxu1 %v2428_v5 }
 0x350   : > { %v1586_v41 = vpop.f32.mrb[12].mxu0 }
 0x351   : > { %v2278_v42 = vpop.f32.mrb[13].mxu0 }
 0x352   : > { %v1589_v44 = vpop.f32.mrb[14].mxu0 }
 0x353   : > { %v2279_v45 = vpop.f32.mrb[15].mxu0 }
 0x414   : > { %v1386_v27 = vpop.f32.mrb[8].mxu1 }
 0x415   : > { %v1387_v28 = vadd.f32 %v2040_v26, %v1386_v27  ;;  %v2248_v29 = vpop.f32.mrb[9].mxu1 }
 0x416   : > { %v1389_v30 = vpop.f32.mrb[10].mxu1 }
 0x417   : > { %v1390_v31 = vadd.f32 %v2040_v26, %v1389_v30  ;;  %v2249_v32 = vpop.f32.mrb[11].mxu1  ;;  %v1393_v33 = vmax.f32 %v1387_v28, 0.0 }
 0x419   : > { %v1394_v34 = vmax.f32 %v1390_v31, 0.0 }
 0x41b   : > { %v1395_v36 = vpack.c.bf16 %v1394_v34, %v1393_v33 }
 0x41d   : > { %2269 = vmatmul.mubr.msk.bf16.vlgmr.msra.gmra.mrb[12].mxu1 %vm1489_vm4, %v1395_v36 }
 0x41e   : > { %2281 = vmatpush3.bf16.msra.mxu1 %v2388_v35  ;;  %2296 = vmatprep.mubr.msk.bf16.mxu1 %vm2430_vm0, %v2428_v5 }
 0x41f   : > { %2282 = vmatprep.subr.bf16.mxu1 %v2428_v5 }
 0x422   : > { %2283 = vmatpush3.bf16.msra.mxu1 %v2389_v37 }
 0x423   : > { %2284 = vmatprep.subr.bf16.mxu1 %v2428_v5 }
 0x426   : > { %2285 = vmatpush3.bf16.msra.mxu1 %v2390_v38 }
 0x427   : > { %2286 = vmatprep.subr.bf16.mxu1 %v2428_v5 }
 0x42a   : > { %2287 = vmatpush3.bf16.msra.mxu1 %v2391_v39 }
 0x42b   : > { %2288 = vmatprep.subr.bf16.mxu1 %v2428_v5 }
 0x42e   : > { %2289 = vmatpush3.bf16.msra.mxu1 %v2392_v40 }
 0x42f   : > { %2290 = vmatprep.subr.bf16.mxu1 %v2428_v5 }
 0x432   : > { %2291 = vmatpush3.bf16.msra.mxu1 %v2393_v43 }
 0x433   : > { %2292 = vmatprep.subr.bf16.mxu1 %v2428_v5 }
 0x436   : > { %2293 = vmatpush3.bf16.msra.mxu1 %v2394_v46 }
 0x437   : > { %2294 = vmatprep.subr.bf16.mxu1 %v2428_v5 }
 0x43a   : > { %2295 = vmatpush3.bf16.msra.mxu1 %v2395_v47 }
 0x4f0   : > { %v1530_v52 = vpop.f32.mrb[12].mxu1 }
 0x4f1   : > { %v1531_v53 = vadd.f32 %v1530_v52, %v2756_v16  ;;  %v2270_v54 = vpop.f32.mrb[13].mxu1 }
 0x4f2   : > { %v1533_v56 = vpop.f32.mrb[14].mxu1 }
 0x4f3   : > { %v1593_v57 = vadd.f32 %v1586_v41, %v1531_v53  ;;  %v1534_v58 = vadd.f32 %v1533_v56, %v2758_v18  ;;  %v2271_v59 = vpop.f32.mrb[15].mxu1 }
 0x4f5   : > { %v1602_v60 = vadd.f32 %v2061_v55, %v1593_v57  ;;  %v1594_v61 = vadd.f32 %v1589_v44, %v1534_v58 }
 0x4f7   : > { %v1603_v62 = vadd.f32 %v2061_v55, %v1594_v61  ;;  %v1604_v63 = vmax.f32 %v1602_v60, 0.0 }
 0x4f9   : > { %v1605_v0 = vmax.f32 %v1603_v62, 0.0 }
 0x4fb   : > { %v1606_v1 = vpack.c.bf16 %v1605_v0, %v1604_v63 }
 0x4fd   : > { %2297 = vmatmul.mubr.bf16.vlgmr.msra.gmra.mrb[16].mxu1 %v1606_v1 }
 0x5d0   : > { %v1712_v4 = vpop.f32.mrb[16].mxu1 }
 0x5d1   : > { %v2298_v6 = vpop.f32.mrb[17].mxu1  ;;  %v1713_v8 = vadd.f32 %v2062_v3, %v1712_v4 }
 0x5d2   : > { %v1715_v7 = vpop.f32.mrb[18].mxu1 }
 0x5d3   : > { %v1716_v9 = vadd.f32 %v2062_v3, %v1715_v7  ;;  %v2299_v10 = vpop.f32.mrb[19].mxu1 }
 0x5d5   : > { %v1722_v12 = vpack.c.bf16 %v1716_v9, %v1713_v8 }
 0x5d7   : > { %2309 = vmatmul.mubr.msk.bf16.vlgmr.msra.gmra.mrb[16].mxu0 %vm971_vm3, %v1722_v12 }
 0x5d8   : > { %2313 = vmatpush3.bf16.msra.mxu0 %v2400_v11  ;;  %2316 = vmatprep.mubr.msk.bf16.mxu0 %vm2430_vm0, %v2428_v5 }
 0x5d9   : > { %2314 = vmatprep.subr.bf16.mxu0 %v2428_v5 }
 0x5dc   : > { %2315 = vmatpush3.bf16.msra.mxu0 %v1809_v14 }
 0x5df   : > { %2317 = vmatmul.mubr.msk.bf16.vlgmr.msra.gmra.mrb[20].mxu0 %vm1037_vm2, %v2625_v51 }
 0x6aa   : > { %v1792_v15 = vpop.f32.mrb[16].mxu0 }
 0x6ab   : > { %v2310_v16 = vpop.f32.mrb[17].mxu0 }
 0x6ac   : > { %v1795_v17 = vpop.f32.mrb[18].mxu0 }
 0x6ad   : > { %v2311_v18 = vpop.f32.mrb[19].mxu0 }
 0x6b2   : > { %v1845_v19 = vpop.f32.mrb[20].mxu0 }
 0x6b3   : > { %v1846_v21 = vadd.f32 %v1845_v19, %v1792_v15  ;;  %v2318_v22 = vpop.f32.mrb[21].mxu0 }
 0x6b4   : > { %v1848_v23 = vpop.f32.mrb[22].mxu0 }
 0x6b5   : > { %v1859_v5 = vadd.f32 %v2079_v20, %v1846_v21  ;;  %v1849_v24 = vadd.f32 %v1848_v23, %v1795_v17  ;;  %v2319_v25 = vpop.f32.mrb[23].mxu0 }
 0x6b7   : > { %v1860_v26 = vadd.f32 %v2079_v20, %v1849_v24  ;;  %v1861_v27 = vmax.f32 %v1859_v5, 0.0 }
 0x6b9   : > { %v1862_v28 = vmax.f32 %v1860_v26, 0.0 }
 0x6bb   : > { %v2113_v51 = vpack.c.bf16 %v1862_v28, %v1861_v27 }
 0x6bd   : > { %2114 = vst [vmem:[%s820_s6] sm:$0xff] %v2113_v51  }
 0x6be PF: > { %s33_s24 = sadd.s32 1, %s2424_s24   ;;  %s2917_s4 = sld [smem:[#allocation2_spill]] }
 0x6bf   : > { %p30_p5 = scmp.ge.s32.totalorder %s33_s24, 4   ;;  %s2918_s30 = sld [smem:[#allocation3_spill]] }
 0x6c1   :  { %32 = sbr.rel (!%p30_p5) target bundleno = 9 (0x9), region = 151 }

// kernel: point_encoder_forward.7
= control target key start
LH: loop header
LB: loop body
LE: loop exit
PB: predicated region body
PF: predicated region fallthrough
CT: control target
= control target key end

     0   :  { %s6628_s0 = inlined_call_operand.vmem [shape: f32[2], index: 0, kind: input, shape index: {}]   ;;  %s6629_s1 = inlined_call_operand.vmem [shape: f32[2,16,3], index: 1, kind: input, shape index: {}, may-alias: {1,3}]   ;;  %s6630_s2 = inlined_call_operand.vmem [shape: bf16[2,16,128], index: 2, kind: input, shape index: {}, may-alias: {2,4}]   ;;  %s6631_s3 = inlined_call_operand.vmem [shape: f32[2,16,3], index: 3, kind: input, shape index: {}, may-alias: {1,3}]   ;;  %s6632_s4 = inlined_call_operand.vmem [shape: bf16[2,16,128], index: 4, kind: input, shape index: {}, may-alias: {2,4}]   ;;  %s6633_s5 = inlined_call_operand.vmem [shape: bf16[128,256], index: 5, kind: input, shape index: {}]   ;;  %s6634_s6 = inlined_call_operand.vmem [shape: bf16[128,256], index: 6, kind: input, shape index: {}]   ;;  %s6635_s7 = inlined_call_operand.vmem [shape: f32[1,256], index: 7, kind: input, shape index: {}]   ;;  %s6636_s8 = inlined_call_operand.vmem [shape: bf16[256,256], index: 8, kind: input, shape index: {}]   ;;  %s6637_s9 = inlined_call_operand.vmem [shape: bf16[256,256], index: 9, kind: input, shape index: {}]   ;;  %s6638_s10 = inlined_call_operand.vmem [shape: f32[1,256], index: 10, kind: input, shape index: {}]   ;;  %s6639_s11 = inlined_call_operand.vmem [shape: bf16[256,256], index: 11, kind: input, shape index: {}]   ;;  %s6640_s12 = inlined_call_operand.vmem [shape: bf16[256,256], index: 12, kind: input, shape index: {}]   ;;  %s6641_s13 = inlined_call_operand.vmem [shape: f32[1,256], index: 13, kind: input, shape index: {}]   ;;  %s6642_s14 = inlined_call_operand.vmem [shape: bf16[256,256], index: 14, kind: input, shape index: {}]   ;;  %s6643_s15 = inlined_call_operand.vmem [shape: bf16[256,256], index: 15, kind: input, shape index: {}]   ;;  %s6644_s16 = inlined_call_operand.vmem [shape: f32[1,256], index: 16, kind: input, shape index: {}]   ;;  %s6645_s17 = inlined_call_operand.vmem [shape: bf16[256,256], index: 17, kind: input, shape index: {}]   ;;  %s6646_s18 = inlined_call_operand.vmem [shape: bf16[256,256], index: 18, kind: input, shape index: {}]   ;;  %s6647_s19 = inlined_call_operand.vmem [shape: f32[1,256], index: 19, kind: input, shape index: {}]   ;;  %s6648_s20 = inlined_call_operand.vmem [shape: bf16[256,256], index: 20, kind: input, shape index: {}]   ;;  %s6649_s21 = inlined_call_operand.vmem [shape: f32[1,256], index: 21, kind: input, shape index: {}]   ;;  %s6650_s22 = inlined_call_operand.vmem [shape: bf16[256,128], index: 22, kind: input, shape index: {}]   ;;  %s6651_s23 = inlined_call_operand.vmem [shape: f32[1,128], index: 23, kind: input, shape index: {}]   ;;  %s6652_s24 = inlined_call_operand.hbm [shape: f32[2,4,128], index: 24, kind: output, shape index: {0}]   ;;  %s6653_s25 = inlined_call_operand.vmem [shape: f32[2,4,1], index: 25, kind: output, shape index: {1}]  }
   0x1   :  { %6673 = sst [smem:[#allocation20_spill]] %s6628_s0 }
   0x2   :  { %6674 = sst [smem:[#allocation21_spill]] %s6629_s1 }
   0x3   :  { %6675 = sst [smem:[#allocation22_spill]] %s6630_s2 }
   0x4   :  { %6676 = sst [smem:[#allocation23_spill]] %s6631_s3 }
   0x5   :  { %6677 = sst [smem:[#allocation24_spill]] %s6632_s4 }
   0x6   :  { %6678 = sst [smem:[#allocation25_spill]] %s6633_s5 }
   0x7   :  { %6679 = sst [smem:[#allocation26_spill]] %s6634_s6 }
   0x8   :  { %6680 = sst [smem:[#allocation27_spill]] %s6635_s7 }
   0x9   :  { %6681 = sst [smem:[#allocation28_spill]] %s6636_s8 }
   0xa   :  { %6682 = sst [smem:[#allocation29_spill]] %s6637_s9 }
   0xb   :  { %6683 = sst [smem:[#allocation30_spill]] %s6651_s23 }
   0xc   :  { %6684 = sst [smem:[#allocation31_spill]] %s6652_s24 }
   0xd   :  { %31 = vsyncpa [#allocation6], 0 }
   0xe   :  { %32 = vsyncpa [#allocation5], 0 }
   0xf   :  { %34 = vsyncpa [#allocation5 + $0x1], 0  ;;  %s5326_s29 = smov 0   ;;  %s5328_s2 = smov 0  }
  0x10   :  { %s5330_s6 = smov 0   ;;  %s5332_s30 = smov 0  }
  0x11   :  { %s5334_s7 = smov 0   ;;  %s5336_s3 = smov 0  }
  0x12 LB: > { %6685 = sst [smem:[#allocation10_spill]] %s5170_s29  ;;  %s4089_s26 = sadd.s32 4294967295, %s5190_s3   ;;  %s5190_s3 = sphi %s5336_s3, %s40_s3   ;;  %s5186_s7 = sphi %s5334_s7, %s6724_s7   ;;  %s5182_s30 = sphi %s5332_s30, %s6723_s30   ;;  %s5178_s6 = sphi %s5330_s6, %s6722_s6   ;;  %s5174_s2 = sphi %s5328_s2, %s6721_s2   ;;  %s5170_s29 = sphi %s5326_s29, %s6720_s29  }
  0x13   : > { %6686 = sst [smem:[#allocation11_spill]] %s5174_s2  ;;  %s4090_s1 = sadd.s32 4294967294, %s5190_s3  }
  0x14   : > { %6687 = sst [smem:[#allocation12_spill]] %s5178_s6  ;;  %s52_s8 = sadd.s32 1, %s5186_s7 }
  0x15   : > { %6688 = sst [smem:[#allocation13_spill]] %s5182_s30  ;;  %s587_s27 = sadd.s32 1, %s5178_s6 }
  0x16   : > { %6689 = sst [smem:[#allocation14_spill]] %s5186_s7  ;;  %p54_p0 = scmp.ge.s32.totalorder %s52_s8, 2 }
  0x17   : > { %6690 = sst [smem:[#allocation15_spill]] %s5190_s3  ;;  %p597_p1 = scmp.ne.s32.totalorder %s5178_s6, %s5174_s2 }
  0x18   : > { %p598_p2 = scmp.eq.s32.totalorder %s4089_s26, 1  ;;  %p603_p3 = scmp.ne.s32.totalorder %s5174_s2, %s5170_s29 }
  0x19   : > { %s6726_s8 = smov (%p54_p0, %s52_s8), 0  ;;  %p604_p5 = scmp.eq.s32.totalorder %s4090_s1, 1 }
  0x1a   : > { %6691 = sst [smem:[#allocation16_spill]] %s6726_s8  ;;  %p5366_p4 = por %p598_p2, %p597_p1 }
  0x1b   : > { %s584_s28 = ssub.s32 %s5186_s7, %s6726_s8  ;;  %p4091_p6 = scmp.ge.s32.totalorder %s5190_s3, 1 }
  0x1c   : > { %s6692_s4 = scalar_select %p5366_p4, 1, 0 }
  0x1d   : > { %p585_p7 = scmp.eq.s32.totalorder %s584_s28, 0  ;;  %p5373_p8 = por %p604_p5, %p603_p3 }
  0x1e   : > { %6693 = sst [smem:[#allocation17_spill]] %s6692_s4  ;;  %p637_p9 = scmp.lt.s32.totalorder %s5190_s3, 3 }
  0x1f   : > { %s6694_s9 = scalar_select %p5373_p8, 1, 0 }
  0x20   : > { %s5379_s5 = scalar_select %p585_p7, %s5178_s6, %s587_s27  }
  0x21   : > { %6695 = sst [smem:[#allocation18_spill]] %s6694_s9  ;;  %p5381_p10 = pnand %p4091_p6, %p637_p9 }
  0x22   : > { %6696 = sst [smem:[#allocation19_spill]] %s5379_s5  ;;  %p5385_p11 = scmp.eq.s32.totalorder %s4089_s26, 0 }
  0x23   : > { %s6699_s7 = sld [smem:[#allocation20_spill]]  ;;  %p4498_p12 = pneg %p5381_p10 }
  0x25   : > { %p4499_p13 = pnand %p5385_p11, %p4498_p12 }
  0x27   : > { %p5095_p1 = pneg %p4499_p13 }
  0x29   : > { %s650_s28 = sshll.u32 %s6699_s7, 4  ;;  %s651_s28 = int_to_ptr.vmem [resolvable:$true] %s650_s28 }
  0x2a   : > { %s5093_s27 = scalar_lea.vmem %s651_s28, 16  ;;  %p5101_p5 = scmp.lt.s32.totalorder %s651_s28, %s651_s28 }
  0x2b   : > { %p5094_p0 = scmp.ne.s32.totalorder %s651_s28, %s5093_s27  ;;  %p5102_p6 = scmp.lt.s32.totalorder %s5093_s27, %s5093_s27 }
  0x2d   : > { %p5096_p2 = pnand %p5095_p1, %p5094_p0  ;;  %p5103_p7 = por %p5102_p6, %p5101_p5 }
  0x2f   : > { %p5097_p3 = pneg %p5096_p2 }
  0x31   : > { %p5104_p9 = pnand %p5103_p7, %p5097_p3 }
  0x33   : > { %5107 = shalt.err (!%p5104_p9)
}
  0x34   : > { %s5192_s26 = smov [#allocation4]   ;;  %762 = sbr.rel (%p5381_p10) target bundleno = 2358 (0x936), region = 116 }
  0x35   : > { %4501 = dma.vmem_to_smem (!%p4499_p13), %s651_s28, 16, %s5192_s26, [#allocation6]  }
  0x3b   : > { %5161 = dma.done.wait (%p5385_p11), [#allocation6], 16  }
  0x3c   : > { %5163 = vsyncadd (%p5385_p11), [#allocation6], 4294967280 }
  0x3d   : > { %768 = sfence }
  0x3e   : > { %p859_p12 = scmp.lt.s32.totalorder %s5182_s30, 1  ;;  %s6700_s0 = sld [smem:[#allocation21_spill]]  ;;  %vm906_vm0 = vcmask 23552   ;;  %v5193_v6 = vmov 0.0   ;;  %vm974_vm5 = vcmask 7168   ;;  %vm898_vm6 = vcmask 0  }
  0x3f   : > { %897 = vst [vmem:[#allocation2] sm:$0x1] %v5193_v6  ;;  %s900_s29 = sld [smem:[#allocation4]]  ;;  %s4106_s26 = sld [smem:[#allocation4 + $0x1]]  ;;  %899 = vst.msk [vmem:[#allocation3] sm:$0x1] %vm898_vm6, %v5193_v6 }
  0x40   : > { %s5404_s7 = scalar_select %p859_p12, %s5182_s30, 1  ;;  %v5194_v50 = vmov 0   ;;  %vm1050_vm12 = vcmask 3072   ;;  %vm2965_vm13 = vcmask 1043456  }
  0x41   : > { %4561 = vset.pattern.permute.xlu0 %v5194_v50  ;;  %4560 = vset.pattern.permute.xlu1 %v5194_v50  ;;  %s6707_s30 = sld [smem:[#allocation24_spill]]  ;;  %s6708_s3 = sld [smem:[#allocation28_spill]] }
  0x42   : > { %s6662_s8 = sshll.u32 %s5404_s7, 4  ;;  %s6661_s28 = sshll.u32 %s5404_s7, 3  ;;  %1204 = vmatprep.mubr.bf16.mxu0 %v5194_v50  ;;  %1357 = vmatprep.mubr.bf16.mxu1 %v5194_v50 }
  0x43   : > { %s6706_s24 = sshll.u32 %s5404_s7, 3 }
  0x44   : > { %s866_s27 = scalar_lea.vmem %s6700_s0, %s6662_s8  ;;  %s6704_s0 = sshll.u32 %s5404_s7, 4 }
  0x45   : > { %v902_v0 = vld [vmem:[%s866_s27] sm:$0xff]  ;;  %v903_v1 = vld [vmem:[%s866_s27 + $0x8] sm:$0xff]  ;;  %s927_s1 = ssub.f32 0.0, %s900_s29  ;;  %v5417_v16 = vstv %s4106_s26  ;;  %s6701_s29 = sld [smem:[#allocation22_spill]] }
  0x46   : > { %v904_v2 = vmul.f32 %v902_v0, %v902_v0  ;;  %v905_v3 = vmul.f32 %v903_v1, %v903_v1  ;;  %v961_v47 = vld [vmem:[#allocation2] sm:$0x1]  ;;  %s6702_s27 = sld [smem:[#allocation26_spill]] }
  0x47   : > { %v5415_v11 = vstv %s927_s1  ;;  %s887_s2 = scalar_lea.vmem %s6707_s30, %s6706_s24  ;;  %s6709_s9 = smov %s6708_s3 }
  0x48   : > { %v907_v4 = vsel %vm906_vm0, %v904_v2, 0.0  ;;  %v910_v5 = vsel %vm906_vm0, %v905_v3, 0.0  ;;  %s4105_s30 = sshll.u32 %s5404_s7, 2 }
  0x49   : > { %908 = vadd.xlane.f32.xlu0 %v907_v4  ;;  %s891_s1 = scalar_lea.vmem %s6653_s25, %s4105_s30 }
  0x4b   : > { %s876_s26 = scalar_lea.vmem %s6701_s29, %s6661_s28  ;;  %s6703_s28 = sld [smem:[#allocation25_spill]] }
  0x4c   : > { %v4459_v31 = vld [vmem:[%s876_s26] sm:$0xff]   ;;  %v4568_v59 = vld [vmem:[%s6702_s27 + $0x14] ss:$8 sps:$4 sm:$0xff]   ;;  %v4572_v62 = vld [vmem:[%s6702_s27 + $0x10] ss:$8 sps:$4 sm:$0xff]  }
  0x4d   : > { %911 = vadd.xlane.f32.xlu0 %v910_v5  ;;  %v4460_v32 = vunpack.c.l.bf16 %v4459_v31  ;;  %v4461_v33 = vunpack.c.h.bf16 %v4459_v31  ;;  %v4562_v55 = vld [vmem:[%s6702_s27 + $0x4] ss:$8 sps:$4 sm:$0xff]   ;;  %v4566_v57 = vld [vmem:[%s6702_s27] ss:$8 sps:$4 sm:$0xff]  }
  0x4e   : > { %1172 = vmatprep.subr.bf16.mxu0 %v4562_v55  ;;  %v4574_v1 = vld [vmem:[%s6702_s27 + $0x24] ss:$8 sps:$4 sm:$0xff]   ;;  %v4578_v4 = vld [vmem:[%s6702_s27 + $0x20] ss:$8 sps:$4 sm:$0xff]  }
  0x4f   : > { %1173 = vmatpush1.bf16.msra.mxu0 %v4566_v57  ;;  %v4598_v31 = vld [vmem:[%s6702_s27 + $0x64] ss:$8 sps:$4 sm:$0xff]  }
  0x50   : > { %1174 = vmatprep.subr.bf16.mxu0 %v4568_v59  ;;  %v4613_v59 = vld [vmem:[%s6709_s9 + $0x4] ss:$8 sps:$4 sm:$0xff]  }
  0x51   : > { %v4564_v56 = vld [vmem:[%s6703_s28 + $0x4] ss:$8 sps:$4 sm:$0xff]   ;;  %v4567_v58 = vld [vmem:[%s6703_s28] ss:$8 sps:$4 sm:$0xff]   ;;  %v4570_v61 = vld [vmem:[%s6703_s28 + $0x14] ss:$8 sps:$4 sm:$0xff]  }
  0x52   : > { %1325 = vmatprep.subr.bf16.mxu1 %v4564_v56  ;;  %v4573_v63 = vld [vmem:[%s6703_s28 + $0x10] ss:$8 sps:$4 sm:$0xff]   ;;  %v4576_v2 = vld [vmem:[%s6703_s28 + $0x24] ss:$8 sps:$4 sm:$0xff]   ;;  %v4579_v5 = vld [vmem:[%s6703_s28 + $0x20] ss:$8 sps:$4 sm:$0xff]  }
  0x53   : > { %1326 = vmatpush1.bf16.msra.mxu1 %v4567_v58  ;;  %1175 = vmatpush1.bf16.msra.mxu0 %v4572_v62  ;;  %v4611_v58 = vld [vmem:[%s6708_s3] ss:$8 sps:$4 sm:$0xff]   ;;  %v4619_v62 = vld [vmem:[%s6709_s9 + $0x24] ss:$8 sps:$4 sm:$0xff]  }
  0x54   : > { %1327 = vmatprep.subr.bf16.mxu1 %v4570_v61  ;;  %1176 = vmatprep.subr.bf16.mxu0 %v4574_v1  ;;  %v4614_v61 = vld [vmem:[%s6709_s9 + $0x10] ss:$8 sps:$4 sm:$0xff]  }
  0x57   : > { %1328 = vmatpush1.bf16.msra.mxu1 %v4573_v63  ;;  %1177 = vmatpush1.bf16.msra.mxu0 %v4578_v4  ;;  %v4617_v63 = vld [vmem:[%s6709_s9 + $0x20] ss:$8 sps:$4 sm:$0xff]  }
  0x58   : > { %1329 = vmatprep.subr.bf16.mxu1 %v4576_v2  ;;  %v4620_v2 = vld [vmem:[%s6709_s9 + $0x30] ss:$8 sps:$4 sm:$0xff]   ;;  %v4623_v4 = vld [vmem:[%s6709_s9 + $0x40] ss:$8 sps:$4 sm:$0xff]  }
  0x5b   : > { %1330 = vmatpush1.bf16.msra.mxu1 %v4579_v5  ;;  %v4628_v5 = vld [vmem:[%s6709_s9 + $0x54] ss:$8 sps:$4 sm:$0xff]  }
  0xd6   : > { %v909_v7 = vpop.xlane.xlu0 %908 }
  0xd7   : > { %5059 = vrsqrt.f32 %v909_v7  ;;  %vm915_vm1 = vcmp.eq.f32.partialorder %v909_v7, inf  ;;  %v918_v12 = vand.u32 2147483648, %v909_v7  ;;  %vm917_vm2 = vcmp.eq.f32.partialorder %v909_v7, 0.0 }
  0xda   : > { %v912_v8 = vpop.xlane.xlu0 %911 }
  0xdb   : > { %5061 = vrsqrt.f32 %v912_v8  ;;  %vm922_vm3 = vcmp.eq.f32.partialorder %v912_v8, inf  ;;  %v925_v19 = vand.u32 2147483648, %v912_v8  ;;  %vm924_vm4 = vcmp.eq.f32.partialorder %v912_v8, 0.0 }
  0xe1   : > { %v5060_v9 = vpop.eup %5059 }
  0xe2   : > { %v914_v10 = vmul.f32 %v5060_v9, %v909_v7 }
  0xe4   : > { %v916_v13 = vsel %vm915_vm1, %v909_v7, %v914_v10  ;;  %v973_v7 = vld [vmem:[#allocation3] sm:$0x1] }
  0xe5   : > { %v5062_v14 = vpop.eup %5061  ;;  %v919_v15 = vsel %vm917_vm2, %v918_v12, %v916_v13 }
  0xe6   : > { %v929_v17 = vmul.f32 %v5415_v11, %v919_v15  ;;  %v921_v18 = vmul.f32 %v5062_v14, %v912_v8 }
  0xe8   : > { %v923_v20 = vsel %vm922_vm3, %v912_v8, %v921_v18  ;;  %v932_v21 = vadd.f32 %v5417_v16, %v929_v17  ;;  %v4580_v18 = vld [vmem:[%s6702_s27 + $0x34] ss:$8 sps:$4 sm:$0xff]  }
  0xe9   : > { %v926_v22 = vsel %vm924_vm4, %v925_v19, %v923_v20  ;;  %v4582_v19 = vld [vmem:[%s6703_s28 + $0x34] ss:$8 sps:$4 sm:$0xff]   ;;  %1178 = vmatprep.subr.bf16.mxu0 %v4580_v18 }
  0xea   : > { %v930_v23 = vmul.f32 %v5415_v11, %v926_v22  ;;  %v4107_v24 = vmul.f32 -1.442695, %v932_v21  ;;  %v4585_v21 = vld [vmem:[%s6703_s28 + $0x30] ss:$8 sps:$4 sm:$0xff]   ;;  %1331 = vmatprep.subr.bf16.mxu1 %v4582_v19 }
  0xeb   : > { %1332 = vmatpush1.bf16.msra.mxu1 %v4585_v21  ;;  %v4637_v21 = vld [vmem:[%s6709_s9 + $0x84] ss:$8 sps:$4 sm:$0xff]  }
  0xec   : > { %v933_v25 = vadd.f32 %v5417_v16, %v930_v23  ;;  %5063 = vpow2.f32 %v4107_v24  ;;  %v4586_v23 = vld [vmem:[%s6702_s27 + $0x44] ss:$8 sps:$4 sm:$0xff]  }
  0xed   : > { %v4588_v24 = vld [vmem:[%s6703_s28 + $0x44] ss:$8 sps:$4 sm:$0xff]  }
  0xee   : > { %v4108_v26 = vmul.f32 -1.442695, %v933_v25  ;;  %v4590_v25 = vld [vmem:[%s6702_s27 + $0x40] ss:$8 sps:$4 sm:$0xff]   ;;  %1333 = vmatprep.subr.bf16.mxu1 %v4588_v24 }
  0xf0   : > { %5065 = vpow2.f32 %v4108_v26  ;;  %v4591_v26 = vld [vmem:[%s6703_s28 + $0x40] ss:$8 sps:$4 sm:$0xff]  }
  0xf1   : > { %1334 = vmatpush1.bf16.msra.mxu1 %v4591_v26 }
  0xf6   : > { %v5064_v27 = vpop.eup %5063 }
  0xf7   : > { %v940_v28 = vadd.f32 1.0, %v5064_v27  ;;  %v4592_v27 = vld [vmem:[%s6702_s27 + $0x54] ss:$8 sps:$4 sm:$0xff]  }
  0xf9   : > { %5067 = vrcp.f32 %v940_v28  ;;  %v4594_v28 = vld [vmem:[%s6703_s28 + $0x54] ss:$8 sps:$4 sm:$0xff]  }
  0xfa   : > { %v5066_v29 = vpop.eup %5065  ;;  %1335 = vmatprep.subr.bf16.mxu1 %v4594_v28 }
  0xfb   : > { %v941_v30 = vadd.f32 1.0, %v5066_v29  ;;  %v4596_v29 = vld [vmem:[%s6702_s27 + $0x50] ss:$8 sps:$4 sm:$0xff]  }
  0xfd   : > { %5069 = vrcp.f32 %v941_v30  ;;  %v4597_v30 = vld [vmem:[%s6703_s28 + $0x50] ss:$8 sps:$4 sm:$0xff]  }
  0xfe   : > { %1336 = vmatpush1.bf16.msra.mxu1 %v4597_v30 }
 0x103   : > { %v5068_v34 = vpop.eup %5067 }
 0x104   : > { %v962_v36 = vmul.f32 %v5068_v34, %v4460_v32  ;;  %v975_v37 = vsel %vm974_vm5, %v5068_v34, 0.0  ;;  %v4600_v32 = vld [vmem:[%s6703_s28 + $0x64] ss:$8 sps:$4 sm:$0xff]   ;;  %v4603_v34 = vld [vmem:[%s6703_s28 + $0x60] ss:$8 sps:$4 sm:$0xff]  }
 0x105   : > { %1337 = vmatprep.subr.bf16.mxu1 %v4600_v32 }
 0x106   : > { %1338 = vmatpush1.bf16.msra.mxu1 %v4603_v34 }
 0x107   : > { %v5070_v35 = vpop.eup %5069 }
 0x108   : > { %v976_v38 = vsel %vm974_vm5, %v5070_v35, 0.0  ;;  %v963_v39 = vmul.f32 %v5070_v35, %v4461_v33  ;;  %v4602_v33 = vld [vmem:[%s6702_s27 + $0x60] ss:$8 sps:$4 sm:$0xff]   ;;  %v4604_v35 = vld [vmem:[%s6702_s27 + $0x74] ss:$8 sps:$4 sm:$0xff]  }
 0x109   : > { %v977_v40 = vadd.f32 %v976_v38, %v975_v37  ;;  %v4608_v37 = vld [vmem:[%s6702_s27 + $0x70] ss:$8 sps:$4 sm:$0xff]  }
 0x10a   : > { %v964_v41 = vadd.f32 %v963_v39, %v962_v36  ;;  %v4606_v36 = vld [vmem:[%s6703_s28 + $0x74] ss:$8 sps:$4 sm:$0xff]   ;;  %v4609_v38 = vld [vmem:[%s6703_s28 + $0x70] ss:$8 sps:$4 sm:$0xff]   ;;  %v4610_v39 = vld [vmem:[%s887_s2] sm:$0xff]  }
 0x10b   : > { %978 = vadd.xlane.f32.xlu1 %v977_v40  ;;  %1339 = vmatprep.subr.bf16.mxu1 %v4606_v36 }
 0x10c   : > { %v965_v42 = vrot.slane %v964_v41, 4  ;;  %1340 = vmatpush1.bf16.msra.mxu1 %v4609_v38 }
 0x10d   : > { %1870 = vmatprep.subr.bf16.mxu1 %v4613_v59  ;;  %v4655_v59 = vld [vmem:[%s6709_s9 + $0xe4] ss:$8 sps:$4 sm:$0xff]  }
 0x10e   : > { %v966_v43 = vadd.f32 %v965_v42, %v964_v41 }
 0x10f   : > { %1358 = vmatmul.mubr.bf16.vlgmr.msra.gmra.mrb[0].mxu1 %v4610_v39 }
 0x110   : > { %v967_v44 = vrot.slane %v966_v43, 2  ;;  %1871 = vmatpush1.bf16.msra.mxu1 %v4611_v58 }
 0x112   : > { %v968_v45 = vadd.f32 %v967_v44, %v966_v43 }
 0x114   : > { %v969_v46 = vrot.slane %v968_v45, 1 }
 0x116   : > { %v970_v48 = vadd.f32 %v969_v46, %v968_v45  ;;  %v1043_v46 = vlaneseq }
 0x118   : > { %v971_v49 = vadd.f32 %v970_v48, %v961_v47  ;;  %v5547_v47 = vshrl.u32 %v1043_v46, 7 }
 0x11a   : > { %972 = vst [vmem:[#allocation2] sm:$0x1] %v971_v49  ;;  %v5550_v48 = vsub.s32 0, %v5547_v47 }
 0x198   : > { %v979_v51 = vpop.xlane.xlu1 %978 }
 0x199   : > { %v980_v52 = vrot.slane %v979_v51, 4 }
 0x19b   : > { %v981_v53 = vadd.f32 %v980_v52, %v979_v51 }
 0x19d   : > { %v982_v54 = vrot.slane %v981_v53, 2 }
 0x19f   : > { %v983_v60 = vadd.f32 %v982_v54, %v981_v53  ;;  %v1052_v53 = vld [vmem:[#allocation2] sm:$0x1] }
 0x1a1   : > { %v984_v0 = vrot.slane %v983_v60, 1 }
 0x1a3   : > { %v985_v3 = vadd.f32 %v984_v0, %v983_v60  ;;  %v4616_v60 = vld [vmem:[%s6709_s9 + $0x14] ss:$8 sps:$4 sm:$0xff]  }
 0x1a4   : > { %1872 = vmatprep.subr.bf16.mxu1 %v4616_v60  ;;  %v4622_v0 = vld [vmem:[%s6709_s9 + $0x34] ss:$8 sps:$4 sm:$0xff]   ;;  %v4653_v60 = vld [vmem:[%s6709_s9 + $0xe0] ss:$8 sps:$4 sm:$0xff]  }
 0x1a5   : > { %4484 = vpush %v985_v3  ;;  %1873 = vmatpush1.bf16.msra.mxu1 %v4614_v61  ;;  %v4625_v3 = vld [vmem:[%s6709_s9 + $0x44] ss:$8 sps:$4 sm:$0xff]   ;;  %v4658_v61 = vld [vmem:[%s6709_s9 + $0xf4] ss:$8 sps:$4 sm:$0xff]  }
 0x1a6   : > { %1874 = vmatprep.subr.bf16.mxu1 %v4619_v62  ;;  %v4656_v62 = vld [vmem:[%s6709_s9 + $0xf0] ss:$8 sps:$4 sm:$0xff]  }
 0x1a9   : > { %1875 = vmatpush1.bf16.msra.mxu1 %v4617_v63 }
 0x1aa   : > { %1876 = vmatprep.subr.bf16.mxu1 %v4622_v0 }
 0x1ad   : > { %1877 = vmatpush1.bf16.msra.mxu1 %v4620_v2 }
 0x1ae   : > { %1878 = vmatprep.subr.bf16.mxu1 %v4625_v3 }
 0x1b1   : > { %1879 = vmatpush1.bf16.msra.mxu1 %v4623_v4 }
 0x1b2   : > { %1880 = vmatprep.subr.bf16.mxu1 %v4628_v5 }
 0x1d6   : > { %s4485_s8 = spop %4484 }
 0x1d7   : > { %v987_v8 = vstv %s4485_s8  ;;  %s6705_s8 = sld [smem:[#allocation23_spill]] }
 0x1d8   : > { %v988_v9 = vadd.f32 %v987_v8, %v973_v7  ;;  %v4626_v7 = vld [vmem:[%s6709_s9 + $0x50] ss:$8 sps:$4 sm:$0xff]  }
 0x1d9   : > { %1881 = vmatpush1.bf16.msra.mxu1 %v4626_v7 }
 0x1da   : > { %990 = vst.msk [vmem:[#allocation3] sm:$0x1] %vm898_vm6, %v988_v9  ;;  %v4631_v9 = vld [vmem:[%s6709_s9 + $0x64] ss:$8 sps:$4 sm:$0xff]  }
 0x1db   : > { %1882 = vmatprep.subr.bf16.mxu1 %v4631_v9 }
 0x1dd   : > { %s882_s6 = scalar_lea.vmem %s6705_s8, %s6704_s0  ;;  %s6710_s0 = sld [smem:[#allocation29_spill]] }
 0x1de   : > { %v1003_v40 = vld [vmem:[%s882_s6 + $0x8] sm:$0xff]  ;;  %v1002_v43 = vld [vmem:[%s882_s6] sm:$0xff] }
 0x1df   : > { %v1005_v41 = vmul.f32 %v1003_v40, %v1003_v40  ;;  %v1004_v44 = vmul.f32 %v1002_v43, %v1002_v43  ;;  %v4647_v40 = vld [vmem:[%s6709_s9 + $0xc0] ss:$8 sps:$4 sm:$0xff]  }
 0x1e1   : > { %v994_v10 = vld [vmem:[#allocation3] sm:$0x1]  ;;  %v1009_v42 = vsel %vm906_vm0, %v1005_v41, 0.0  ;;  %v1006_v45 = vsel %vm906_vm0, %v1004_v44, 0.0 }
 0x1e2   : > { %vm995_vm7 = vcmp.eq.f32.partialorder %v994_v10, 0.0 }
 0x1e3   : > { %v4109_v12 = vsel %vm995_vm7, 1.0, %v5193_v6  ;;  %v4584_v6 = vld [vmem:[%s6702_s27 + $0x30] ss:$8 sps:$4 sm:$0xff]   ;;  %v4661_v63 = vld [vmem:[%s6710_s0 + $0x4] ss:$8 sps:$4 sm:$0xff]  }
 0x1e4   : > { %v998_v13 = vadd.f32 %v4109_v12, %v994_v10  ;;  %1179 = vmatpush1.bf16.msra.mxu0 %v4584_v6  ;;  %v4632_v6 = vld [vmem:[%s6709_s9 + $0x70] ss:$8 sps:$4 sm:$0xff]   ;;  %v4659_v0 = vld [vmem:[%s6710_s0] ss:$8 sps:$4 sm:$0xff]   ;;  %v4667_v4 = vld [vmem:[%s6710_s0 + $0x24] ss:$8 sps:$4 sm:$0xff]  }
 0x1e5   : > { %1180 = vmatprep.subr.bf16.mxu0 %v4586_v23  ;;  %v4662_v2 = vld [vmem:[%s6710_s0 + $0x10] ss:$8 sps:$4 sm:$0xff]   ;;  %v4665_v3 = vld [vmem:[%s6710_s0 + $0x20] ss:$8 sps:$4 sm:$0xff]   ;;  %v4670_v5 = vld [vmem:[%s6710_s0 + $0x34] ss:$8 sps:$4 sm:$0xff]  }
 0x1e6   : > { %v999_v14 = vadd.f32 1e-06, %v998_v13  ;;  %v4629_v13 = vld [vmem:[%s6709_s9 + $0x60] ss:$8 sps:$4 sm:$0xff]   ;;  %v4668_v7 = vld [vmem:[%s6710_s0 + $0x30] ss:$8 sps:$4 sm:$0xff]  }
 0x1e7   : > { %1883 = vmatpush1.bf16.msra.mxu1 %v4629_v13  ;;  %v4671_v9 = vld [vmem:[%s6710_s0 + $0x40] ss:$8 sps:$4 sm:$0xff]   ;;  %v4679_v13 = vld [vmem:[%s6710_s0 + $0x64] ss:$8 sps:$4 sm:$0xff]  }
 0x1e8   : > { %5071 = vrcp.f32 %v999_v14  ;;  %1181 = vmatpush1.bf16.msra.mxu0 %v4590_v25  ;;  %v4635_v25 = vld [vmem:[%s6709_s9 + $0x80] ss:$8 sps:$4 sm:$0xff]  }
 0x1e9   : > { %1182 = vmatprep.subr.bf16.mxu0 %v4592_v27  ;;  %v4640_v27 = vld [vmem:[%s6709_s9 + $0x94] ss:$8 sps:$4 sm:$0xff]  }
 0x1ec   : > { %1183 = vmatpush1.bf16.msra.mxu0 %v4596_v29 }
 0x1ed   : > { %1184 = vmatprep.subr.bf16.mxu0 %v4598_v31  ;;  %v4638_v31 = vld [vmem:[%s6709_s9 + $0x90] ss:$8 sps:$4 sm:$0xff]  }
 0x1f0   : > { %1185 = vmatpush1.bf16.msra.mxu0 %v4602_v33  ;;  %v4643_v33 = vld [vmem:[%s6709_s9 + $0xa4] ss:$8 sps:$4 sm:$0xff]  }
 0x1f1   : > { %1186 = vmatprep.subr.bf16.mxu0 %v4604_v35  ;;  %v4641_v35 = vld [vmem:[%s6709_s9 + $0xa0] ss:$8 sps:$4 sm:$0xff]  }
 0x1f2   : > { %v5072_v15 = vpop.eup %5071 }
 0x1f3   : > { %v5471_v17 = vmul.f32 16.0, %v5072_v15  ;;  %v4634_v15 = vld [vmem:[%s6709_s9 + $0x74] ss:$8 sps:$4 sm:$0xff]  }
 0x1f4   : > { %1187 = vmatpush1.bf16.msra.mxu0 %v4608_v37  ;;  %1884 = vmatprep.subr.bf16.mxu1 %v4634_v15  ;;  %v4646_v37 = vld [vmem:[%s6709_s9 + $0xb4] ss:$8 sps:$4 sm:$0xff]  }
 0x1f5   : > { %1054 = vperm.xlu0 %4561, %v5471_v17   ;;  %v1062_v20 = vmul.f32 %v5471_v17, %v994_v10  ;;  %1885 = vmatpush1.bf16.msra.mxu1 %v4632_v6  ;;  %v1046_v44 = vrot.slane %v5471_v17, %v5550_v48  ;;  %v4652_v17 = vld [vmem:[%s6709_s9 + $0xd4] ss:$8 sps:$4 sm:$0xff]  }
 0x1f6   : > { %1886 = vmatprep.subr.bf16.mxu1 %v4637_v21  ;;  %1627 = vmatprep.subr.bf16.mxu0 %v4661_v63  ;;  %v4682_v15 = vld [vmem:[%s6710_s0 + $0x74] ss:$8 sps:$4 sm:$0xff]   ;;  %v4686_v21 = vld [vmem:[%s6710_s0 + $0x90] ss:$8 sps:$4 sm:$0xff]  }
 0x1f7   : > { %v1063_v22 = vadd.f32 1e-06, %v1062_v20  ;;  %v4688_v6 = vld [vmem:[%s6710_s0 + $0x94] ss:$8 sps:$4 sm:$0xff]  }
 0x1f9   : > { %1066 = vperm.xlu1 %4560, %v1063_v22   ;;  %1887 = vmatpush1.bf16.msra.mxu1 %v4635_v25  ;;  %v4692_v25 = vld [vmem:[%s6710_s0 + $0xb0] ss:$8 sps:$4 sm:$0xff]  }
 0x1fa   : > { %1888 = vmatprep.subr.bf16.mxu1 %v4640_v27  ;;  %v4695_v27 = vld [vmem:[%s6710_s0 + $0xc0] ss:$8 sps:$4 sm:$0xff]  }
 0x1fd   : > { %1889 = vmatpush1.bf16.msra.mxu1 %v4638_v31  ;;  %v4703_v31 = vld [vmem:[%s6710_s0 + $0xe4] ss:$8 sps:$4 sm:$0xff]  }
 0x1fe   : > { %1890 = vmatprep.subr.bf16.mxu1 %v4643_v33  ;;  %v4704_v33 = vld [vmem:[%s6710_s0 + $0xf0] ss:$8 sps:$4 sm:$0xff]  }
 0x201   : > { %1891 = vmatpush1.bf16.msra.mxu1 %v4641_v35  ;;  %v5770_v35 = vsub.s32 1, %v5547_v47 }
 0x202   : > { %1892 = vmatprep.subr.bf16.mxu1 %v4646_v37 }
 0x214   : > { %1010 = vadd.xlane.f32.xlu0 %v1009_v42 }
 0x21d   : > { %1007 = vadd.xlane.f32.xlu1 %v1006_v45 }
 0x274   : > { %v1055_v51 = vpop.permute.xlu0 %1054 }
 0x275   : > { %v1060_v52 = vrot.slane %v1055_v51, %v5550_v48 }
 0x277   : > { %v1061_v54 = vmul.f32 %v1060_v52, %v1052_v53 }
 0x278   : > { %v1067_v49 = vpop.permute.xlu1 %1066 }
 0x279   : > { %v1072_v50 = vrot.slane %v1067_v49, %v5550_v48 }
 0x27b   : > { %5073 = vrcp.f32 %v1072_v50 }
 0x285   : > { %v5074_v55 = vpop.eup %5073 }
 0x286   : > { %v1074_v56 = vmul.f32 %v5074_v55, %v1061_v54  ;;  %v5647_v54 = vpop.f32.mrb[0].mxu1  ;;  %v4650_v55 = vld [vmem:[%s6709_s9 + $0xd0] ss:$8 sps:$4 sm:$0xff]  }
 0x288   : > { %v1075_v57 = vpack.c.bf16 %v1074_v56, %v1074_v56  ;;  %v5652_v56 = vpop.f32.mrb[1].mxu1 }
 0x28a   : > { %1205 = vmatmul.mubr.bf16.vlgmr.msra.gmra.mrb[0].mxu0 %v1075_v57  ;;  %v5654_v57 = vpop.f32.mrb[2].mxu1 }
 0x28b   : > { %v5656_v58 = vpop.f32.mrb[3].mxu1  ;;  %1628 = vmatpush1.bf16.msra.mxu0 %v4659_v0 }
 0x2a1   : > { %v1011_v1 = vpop.xlane.xlu0 %1010 }
 0x2a2   : > { %5075 = vrsqrt.f32 %v1011_v1  ;;  %vm1021_vm8 = vcmp.eq.f32.partialorder %v1011_v1, inf  ;;  %v1024_v14 = vand.u32 2147483648, %v1011_v1  ;;  %vm1023_vm9 = vcmp.eq.f32.partialorder %v1011_v1, 0.0 }
 0x2aa   : > { %v1008_v8 = vpop.xlane.xlu1 %1007 }
 0x2ab   : > { %5077 = vrsqrt.f32 %v1008_v8  ;;  %vm1014_vm10 = vcmp.eq.f32.partialorder %v1008_v8, inf  ;;  %v1017_v28 = vand.u32 2147483648, %v1008_v8  ;;  %vm1016_vm11 = vcmp.eq.f32.partialorder %v1008_v8, 0.0 }
 0x2ac   : > { %v5076_v10 = vpop.eup %5075 }
 0x2ad   : > { %v1020_v12 = vmul.f32 %v5076_v10, %v1011_v1  ;;  %v4676_v10 = vld [vmem:[%s6710_s0 + $0x54] ss:$8 sps:$4 sm:$0xff]  }
 0x2af   : > { %v1022_v18 = vsel %vm1021_vm8, %v1011_v1, %v1020_v12  ;;  %v4664_v1 = vld [vmem:[%s6710_s0 + $0x14] ss:$8 sps:$4 sm:$0xff]   ;;  %v4674_v12 = vld [vmem:[%s6710_s0 + $0x50] ss:$8 sps:$4 sm:$0xff]  }
 0x2b0   : > { %v1025_v19 = vsel %vm1023_vm9, %v1024_v14, %v1022_v18  ;;  %1629 = vmatprep.subr.bf16.mxu0 %v4664_v1  ;;  %v4677_v14 = vld [vmem:[%s6710_s0 + $0x60] ss:$8 sps:$4 sm:$0xff]   ;;  %v4680_v18 = vld [vmem:[%s6710_s0 + $0x70] ss:$8 sps:$4 sm:$0xff]  }
 0x2b1   : > { %v1027_v20 = vmul.f32 %v1025_v19, %v5415_v11  ;;  %1630 = vmatpush1.bf16.msra.mxu0 %v4662_v2  ;;  %v4685_v19 = vld [vmem:[%s6710_s0 + $0x84] ss:$8 sps:$4 sm:$0xff]  }
 0x2b2   : > { %1631 = vmatprep.subr.bf16.mxu0 %v4667_v4 }
 0x2b3   : > { %v1029_v22 = vadd.f32 %v1027_v20, %v5417_v16  ;;  %v4683_v20 = vld [vmem:[%s6710_s0 + $0x80] ss:$8 sps:$4 sm:$0xff]  }
 0x2b5   : > { %v5078_v23 = vpop.eup %5077  ;;  %v4111_v24 = vmul.f32 -1.442695, %v1029_v22  ;;  %1632 = vmatpush1.bf16.msra.mxu0 %v4665_v3  ;;  %v4691_v22 = vld [vmem:[%s6710_s0 + $0xa4] ss:$8 sps:$4 sm:$0xff]  }
 0x2b6   : > { %v1013_v26 = vmul.f32 %v5078_v23, %v1008_v8  ;;  %1633 = vmatprep.subr.bf16.mxu0 %v4670_v5  ;;  %v4689_v23 = vld [vmem:[%s6710_s0 + $0xa0] ss:$8 sps:$4 sm:$0xff]  }
 0x2b7   : > { %5079 = vpow2.f32 %v4111_v24  ;;  %v4694_v24 = vld [vmem:[%s6710_s0 + $0xb4] ss:$8 sps:$4 sm:$0xff]  }
 0x2b8   : > { %v1015_v29 = vsel %vm1014_vm10, %v1008_v8, %v1013_v26  ;;  %v4673_v8 = vld [vmem:[%s6710_s0 + $0x44] ss:$8 sps:$4 sm:$0xff]  }
 0x2b9   : > { %v1018_v30 = vsel %vm1016_vm11, %v1017_v28, %v1015_v29  ;;  %1634 = vmatpush1.bf16.msra.mxu0 %v4668_v7  ;;  %v4697_v26 = vld [vmem:[%s6710_s0 + $0xc4] ss:$8 sps:$4 sm:$0xff]   ;;  %v4700_v28 = vld [vmem:[%s6710_s0 + $0xd4] ss:$8 sps:$4 sm:$0xff]   ;;  %v4698_v29 = vld [vmem:[%s6710_s0 + $0xd0] ss:$8 sps:$4 sm:$0xff]  }
 0x2ba   : > { %v1026_v32 = vmul.f32 %v1018_v30, %v5415_v11  ;;  %v4644_v11 = vld [vmem:[%s6709_s9 + $0xb0] ss:$8 sps:$4 sm:$0xff]   ;;  %1635 = vmatprep.subr.bf16.mxu0 %v4673_v8  ;;  %v4701_v30 = vld [vmem:[%s6710_s0 + $0xe0] ss:$8 sps:$4 sm:$0xff]  }
 0x2bb   : > { %1893 = vmatpush1.bf16.msra.mxu1 %v4644_v11 }
 0x2bc   : > { %v1028_v34 = vadd.f32 %v1026_v32, %v5417_v16  ;;  %v4649_v16 = vld [vmem:[%s6709_s9 + $0xc4] ss:$8 sps:$4 sm:$0xff]   ;;  %v4706_v32 = vld [vmem:[%s6710_s0 + $0xf4] ss:$8 sps:$4 sm:$0xff]   ;;  %s6716_s0 = sld [smem:[#allocation31_spill]] }
 0x2bd   : > { %1894 = vmatprep.subr.bf16.mxu1 %v4649_v16  ;;  %1636 = vmatpush1.bf16.msra.mxu0 %v4671_v9 }
 0x2be   : > { %v4110_v36 = vmul.f32 -1.442695, %v1028_v34  ;;  %1637 = vmatprep.subr.bf16.mxu0 %v4676_v10 }
 0x2bf   : > { %1895 = vmatpush1.bf16.msra.mxu1 %v4647_v40 }
 0x2c0   : > { %5081 = vpow2.f32 %v4110_v36  ;;  %1896 = vmatprep.subr.bf16.mxu1 %v4652_v17 }
 0x2c1   : > { %v5080_v38 = vpop.eup %5079  ;;  %1638 = vmatpush1.bf16.msra.mxu0 %v4674_v12 }
 0x2c2   : > { %v1037_v39 = vadd.f32 1.0, %v5080_v38  ;;  %1639 = vmatprep.subr.bf16.mxu0 %v4679_v13 }
 0x2c3   : > { %1897 = vmatpush1.bf16.msra.mxu1 %v4650_v55 }
 0x2c4   : > { %5083 = vrcp.f32 %v1037_v39  ;;  %1898 = vmatprep.subr.bf16.mxu1 %v4655_v59 }
 0x2c5   : > { %1640 = vmatpush1.bf16.msra.mxu0 %v4677_v14 }
 0x2c6   : > { %1641 = vmatprep.subr.bf16.mxu0 %v4682_v15 }
 0x2c7   : > { %1899 = vmatpush1.bf16.msra.mxu1 %v4653_v60 }
 0x2c8   : > { %1900 = vmatprep.subr.bf16.mxu1 %v4658_v61 }
 0x2c9   : > { %1642 = vmatpush1.bf16.msra.mxu0 %v4680_v18 }
 0x2ca   : > { %v5082_v41 = vpop.eup %5081  ;;  %1643 = vmatprep.subr.bf16.mxu0 %v4685_v19 }
 0x2cb   : > { %v1036_v42 = vadd.f32 1.0, %v5082_v41  ;;  %1901 = vmatpush1.bf16.msra.mxu1 %v4656_v62 }
 0x2cd   : > { %5085 = vrcp.f32 %v1036_v42  ;;  %1644 = vmatpush1.bf16.msra.mxu0 %v4683_v20 }
 0x2ce   : > { %v5084_v43 = vpop.eup %5083  ;;  %1645 = vmatprep.subr.bf16.mxu0 %v4688_v6 }
 0x2cf   : > { %v1049_v45 = vmul.f32 %v5084_v43, %v1046_v44 }
 0x2d1   : > { %v1417_v52 = vsel %vm974_vm5, %v1049_v45, 0.0  ;;  %1646 = vmatpush1.bf16.msra.mxu0 %v4686_v21 }
 0x2d2   : > { %1647 = vmatprep.subr.bf16.mxu0 %v4691_v22 }
 0x2d5   : > { %1648 = vmatpush1.bf16.msra.mxu0 %v4689_v23 }
 0x2d6   : > { %1649 = vmatprep.subr.bf16.mxu0 %v4694_v24 }
 0x2d7   : > { %v5086_v46 = vpop.eup %5085 }
 0x2d8   : > { %v1048_v49 = vmul.f32 %v5086_v46, %v1046_v44 }
 0x2d9   : > { %1650 = vmatpush1.bf16.msra.mxu0 %v4692_v25 }
 0x2da   : > { %v2980_v50 = vsel %vm1050_vm12, %v1048_v49, 0.0  ;;  %1051 = vst.msk [vmem:[%s891_s1] sm:$0xf] %vm1050_vm12, %v1048_v49  ;;  %v1416_v51 = vsel %vm974_vm5, %v1048_v49, 0.0  ;;  %1651 = vmatprep.subr.bf16.mxu0 %v4697_v26  ;;  %s6711_s1 = sld [smem:[#allocation27_spill]] }
 0x2db   : > { %2981 = vadd.xlane.f32.xlu0 %v2980_v50  ;;  %v1418_v53 = vadd.f32 %v1417_v52, %v1416_v51 }
 0x2dd   : > { %1419 = vadd.xlane.f32.xlu1 %v1418_v53  ;;  %1652 = vmatpush1.bf16.msra.mxu0 %v4695_v27 }
 0x2de   : > { %1653 = vmatprep.subr.bf16.mxu0 %v4700_v28 }
 0x2e0   : > { %v1368_v34 = vld [vmem:[%s6711_s1] sm:$0x3]  ;;  %s6712_s1 = sld [smem:[#allocation11_spill]] }
 0x2e1   : > { %1654 = vmatpush1.bf16.msra.mxu0 %v4698_v29  ;;  %v1373_v11 = vrot.slane %v1368_v34, %v5550_v48  ;;  %v1377_v39 = vrot.slane %v1368_v34, %v5770_v35 }
 0x2e2   : > { %1655 = vmatprep.subr.bf16.mxu0 %v4703_v31 }
 0x2e5   : > { %1656 = vmatpush1.bf16.msra.mxu0 %v4701_v30 }
 0x2e6   : > { %1657 = vmatprep.subr.bf16.mxu0 %v4706_v32  ;;  %s849_s7 = sand.u32 1, %s6712_s1  }
 0x2e7   : > { %s4096_s5 = sshll.u32 %s849_s7, 2  ;;  %s3918_s8 = scalar_lea.sflag [#allocation5], %s849_s7 }
 0x2e8   : > { %s851_s2 = scalar_lea.vmem [#allocation7], %s4096_s5 }
 0x2e9   : > { %1658 = vmatpush1.bf16.msra.mxu0 %v4704_v33  ;;  %s3935_s30 = sshll.u32 %s851_s2, 4  ;;  %s6583_s30 = int_to_ptr.vmem [resolvable:$true] %s3935_s30 }
 0x2ee   : > { %1390 = vperm.xlu1 %4560, %v1048_v49  }
 0x2f2   : > { %1395 = vperm.xlu1 %4560, %v1049_v45  }
 0x316   : > { %1943 = vadd.xlane.f32.xlu1 %v1416_v51 }
 0x35d   : > { %v1206_v36 = vpop.f32.mrb[0].mxu0 }
 0x35e   : > { %v1234_v37 = vrot.slane %v1206_v36, %v5550_v48  ;;  %v1208_v38 = vpop.f32.mrb[1].mxu0 }
 0x35f   : > { %v1238_v16 = vrot.slane %v1208_v38, %v5550_v48  ;;  %v1210_v40 = vpop.f32.mrb[2].mxu0 }
 0x360   : > { %v1360_v41 = vadd.f32 %v5647_v54, %v1234_v37  ;;  %v1364_v42 = vadd.f32 %v5654_v57, %v1234_v37  ;;  %v1211_v43 = vpop.f32.mrb[3].mxu0 }
 0x361   : > { %v1362_v44 = vadd.f32 %v5652_v56, %v1238_v16  ;;  %v1366_v47 = vadd.f32 %v5656_v58, %v1238_v16  ;;  %v4709_v43 = vld [vmem:[%s6639_s11 + $0x4] ss:$8 sps:$4 sm:$0xff]  }
 0x362   : > { %v1380_v45 = vadd.f32 %v1373_v11, %v1360_v41  ;;  %v1382_v46 = vadd.f32 %v1373_v11, %v1364_v42  ;;  %v4707_v42 = vld [vmem:[%s6639_s11] ss:$8 sps:$4 sm:$0xff]   ;;  %2394 = vmatprep.subr.bf16.mxu1 %v4709_v43  ;;  %v4799_v43 = vld [vmem:[%s6640_s12 + $0xe4] ss:$8 sps:$4 sm:$0xff]  }
 0x363   : > { %v1381_v49 = vadd.f32 %v1377_v39, %v1362_v44  ;;  %v1383_v50 = vadd.f32 %v1377_v39, %v1366_v47  ;;  %v4712_v44 = vld [vmem:[%s6639_s11 + $0x14] ss:$8 sps:$4 sm:$0xff]   ;;  %v4719_v47 = vld [vmem:[%s6640_s12] ss:$8 sps:$4 sm:$0xff]  }
 0x364   : > { %v5780_v51 = vmax.f32 %v1380_v45, 0.0  ;;  %v1386_v63 = vmax.f32 %v1382_v46, 0.0  ;;  %v4710_v45 = vld [vmem:[%s6639_s11 + $0x10] ss:$8 sps:$4 sm:$0xff]   ;;  %v4721_v46 = vld [vmem:[%s6640_s12 + $0x4] ss:$8 sps:$4 sm:$0xff]  }
 0x365   : > { %v5782_v52 = vmax.f32 %v1381_v49, 0.0  ;;  %v1387_v0 = vmax.f32 %v1383_v50, 0.0  ;;  %v4715_v49 = vld [vmem:[%s6639_s11 + $0x24] ss:$8 sps:$4 sm:$0xff]   ;;  %v4727_v50 = vld [vmem:[%s6640_s12 + $0x14] ss:$8 sps:$4 sm:$0xff]   ;;  %2151 = vmatprep.subr.bf16.mxu0 %v4721_v46 }
 0x366   : > { %v1668_v17 = vpack.c.bf16 %v5780_v51, %v5780_v51  ;;  %v4805_v46 = vld [vmem:[%s6642_s14 + $0x4] ss:$8 sps:$4 sm:$0xff]  }
 0x367   : > { %v1669_v53 = vpack.c.bf16 %v5782_v52, %v5782_v52 }
 0x368   : > { %v2982_v1 = vpop.xlane.xlu0 %2981 }
 0x369   : > { %1902 = vmatprep.mubr.bf16.mxu1 %v1669_v53  ;;  %v2983_v4 = vrot.slane %v2982_v1, 4  ;;  %v4725_v53 = vld [vmem:[%s6640_s12 + $0x10] ss:$8 sps:$4 sm:$0xff]  }
 0x36a   : > { %v1420_v54 = vpop.xlane.xlu1 %1419  ;;  %1903 = vmatmul.mubr.bf16.vlgmr.msra.gmra.mrb[4].mxu1 %v1668_v17  ;;  %v4713_v17 = vld [vmem:[%s6639_s11 + $0x20] ss:$8 sps:$4 sm:$0xff]  }
 0x36b   : > { %v1421_v55 = vrot.slane %v1420_v54, 4  ;;  %v2984_v10 = vadd.f32 %v2983_v4, %v2982_v1  ;;  %2395 = vmatpush1.bf16.msra.mxu1 %v4707_v42  ;;  %v4743_v1 = vld [vmem:[%s6640_s12 + $0x40] ss:$8 sps:$4 sm:$0xff]   ;;  %v4736_v4 = vld [vmem:[%s6639_s11 + $0x64] ss:$8 sps:$4 sm:$0xff]  }
 0x36c   : > { %2396 = vmatprep.subr.bf16.mxu1 %v4712_v44  ;;  %v4796_v42 = vld [vmem:[%s6640_s12 + $0xd4] ss:$8 sps:$4 sm:$0xff]   ;;  %v4797_v44 = vld [vmem:[%s6640_s12 + $0xe0] ss:$8 sps:$4 sm:$0xff]  }
 0x36d   : > { %v1422_v56 = vadd.f32 %v1421_v55, %v1420_v54  ;;  %v2985_v14 = vrot.slane %v2984_v10, 2  ;;  %v4733_v54 = vld [vmem:[%s6640_s12 + $0x24] ss:$8 sps:$4 sm:$0xff]   ;;  %v4718_v55 = vld [vmem:[%s6639_s11 + $0x34] ss:$8 sps:$4 sm:$0xff]  }
 0x36e   : > { %v5788_v61 = vpop.permute.xlu1 %1390 }
 0x36f   : > { %v1423_v57 = vrot.slane %v1422_v56, 2  ;;  %v1398_v5 = vmul.f32 %v5788_v61, %v5780_v51  ;;  %v1399_v7 = vmul.f32 %v5788_v61, %v5782_v52  ;;  %v2986_v21 = vadd.f32 %v2985_v14, %v2984_v10  ;;  %2397 = vmatpush1.bf16.msra.mxu1 %v4710_v45  ;;  %v4755_v10 = vld [vmem:[%s6640_s12 + $0x60] ss:$8 sps:$4 sm:$0xff]   ;;  %v4748_v14 = vld [vmem:[%s6639_s11 + $0x84] ss:$8 sps:$4 sm:$0xff]  }
 0x370   : > { %2398 = vmatprep.subr.bf16.mxu1 %v4715_v49  ;;  %v4800_v45 = vld [vmem:[%s6640_s12 + $0xf0] ss:$8 sps:$4 sm:$0xff]   ;;  %v4817_v49 = vld [vmem:[%s6643_s15 + $0x4] ss:$8 sps:$4 sm:$0xff]  }
 0x371   : > { %v1424_v58 = vadd.f32 %v1423_v57, %v1422_v56  ;;  %v2987_v28 = vrot.slane %v2986_v21, 1  ;;  %v4731_v56 = vld [vmem:[%s6640_s12 + $0x20] ss:$8 sps:$4 sm:$0xff]   ;;  %v4716_v57 = vld [vmem:[%s6639_s11 + $0x30] ss:$8 sps:$4 sm:$0xff]  }
 0x372   : > { %v1396_v62 = vpop.permute.xlu1 %1395 }
 0x373   : > { %v1425_v59 = vrot.slane %v1424_v58, 1  ;;  %v1400_v2 = vmul.f32 %v1396_v62, %v1386_v63  ;;  %v1401_v3 = vmul.f32 %v1396_v62, %v1387_v0  ;;  %v2988_v33 = vadd.f32 %v2987_v28, %v2986_v21  ;;  %2399 = vmatpush1.bf16.msra.mxu1 %v4713_v17  ;;  %v4722_v62 = vld [vmem:[%s6639_s11 + $0x40] ss:$8 sps:$4 sm:$0xff]   ;;  %v4745_v63 = vld [vmem:[%s6640_s12 + $0x44] ss:$8 sps:$4 sm:$0xff]  }
 0x374   : > { %2400 = vmatprep.subr.bf16.mxu1 %v4718_v55  ;;  %v4730_v0 = vld [vmem:[%s6639_s11 + $0x54] ss:$8 sps:$4 sm:$0xff]   ;;  %v4752_v21 = vld [vmem:[%s6639_s11 + $0x90] ss:$8 sps:$4 sm:$0xff]   ;;  %v1911_v55 = vld [vmem:[%s6638_s10] sm:$0x3] }
 0x375   : > { %v1426_v60 = vadd.f32 %v1425_v59, %v1424_v58  ;;  %v1402_v8 = vadd.f32 %v1400_v2, %v1398_v5  ;;  %v1409_v9 = vadd.f32 %v1401_v3, %v1399_v7  ;;  %v4739_v58 = vld [vmem:[%s6640_s12 + $0x34] ss:$8 sps:$4 sm:$0xff]   ;;  %v4724_v59 = vld [vmem:[%s6639_s11 + $0x44] ss:$8 sps:$4 sm:$0xff]   ;;  %v4728_v2 = vld [vmem:[%s6639_s11 + $0x50] ss:$8 sps:$4 sm:$0xff]  }
 0x376   : > { %v4751_v3 = vld [vmem:[%s6640_s12 + $0x54] ss:$8 sps:$4 sm:$0xff]   ;;  %v4749_v5 = vld [vmem:[%s6640_s12 + $0x50] ss:$8 sps:$4 sm:$0xff]   ;;  %v4734_v7 = vld [vmem:[%s6639_s11 + $0x60] ss:$8 sps:$4 sm:$0xff]  }
 0x377   : > { %4486 = vpush %v1426_v60  ;;  %v1403_v12 = vrot.slane %v1402_v8, 4  ;;  %v1410_v13 = vrot.slane %v1409_v9, 4  ;;  %v4737_v60 = vld [vmem:[%s6640_s12 + $0x30] ss:$8 sps:$4 sm:$0xff]   ;;  %2401 = vmatpush1.bf16.msra.mxu1 %v4716_v57  ;;  %v4775_v28 = vld [vmem:[%s6640_s12 + $0x94] ss:$8 sps:$4 sm:$0xff]  }
 0x378   : > { %2402 = vmatprep.subr.bf16.mxu1 %v4724_v59 }
 0x379   : > { %v1404_v19 = vadd.f32 %v1403_v12, %v1402_v8  ;;  %v1411_v20 = vadd.f32 %v1410_v13, %v1409_v9  ;;  %v4757_v8 = vld [vmem:[%s6640_s12 + $0x64] ss:$8 sps:$4 sm:$0xff]   ;;  %v4742_v9 = vld [vmem:[%s6639_s11 + $0x74] ss:$8 sps:$4 sm:$0xff]   ;;  %v4740_v12 = vld [vmem:[%s6639_s11 + $0x70] ss:$8 sps:$4 sm:$0xff]  }
 0x37a   : > { %v4763_v13 = vld [vmem:[%s6640_s12 + $0x74] ss:$8 sps:$4 sm:$0xff]  }
 0x37b   : > { %v1405_v23 = vrot.slane %v1404_v19, 2  ;;  %v1412_v24 = vrot.slane %v1411_v20, 2  ;;  %2403 = vmatpush1.bf16.msra.mxu1 %v4722_v62  ;;  %v1920_v62 = vrot.slane %v1911_v55, %v5770_v35 }
 0x37c   : > { %2404 = vmatprep.subr.bf16.mxu1 %v4730_v0 }
 0x37d   : > { %v1406_v30 = vadd.f32 %v1405_v23, %v1404_v19  ;;  %v1413_v31 = vadd.f32 %v1412_v24, %v1411_v20  ;;  %v4769_v19 = vld [vmem:[%s6640_s12 + $0x84] ss:$8 sps:$4 sm:$0xff]   ;;  %v4754_v20 = vld [vmem:[%s6639_s11 + $0x94] ss:$8 sps:$4 sm:$0xff]   ;;  %v4758_v23 = vld [vmem:[%s6639_s11 + $0xa0] ss:$8 sps:$4 sm:$0xff]  }
 0x37e   : > { %v4766_v24 = vld [vmem:[%s6639_s11 + $0xb4] ss:$8 sps:$4 sm:$0xff]  }
 0x37f   : > { %v1407_v34 = vrot.slane %v1406_v30, 1  ;;  %v1414_v36 = vrot.slane %v1413_v31, 1  ;;  %2405 = vmatpush1.bf16.msra.mxu1 %v4728_v2 }
 0x380   : > { %2406 = vmatprep.subr.bf16.mxu1 %v4736_v4 }
 0x381   : > { %v1408_v37 = vadd.f32 %v1407_v34, %v1406_v30  ;;  %v1415_v11 = vadd.f32 %v1414_v36, %v1413_v31  ;;  %v4773_v30 = vld [vmem:[%s6640_s12 + $0x90] ss:$8 sps:$4 sm:$0xff]   ;;  %v4779_v34 = vld [vmem:[%s6640_s12 + $0xa0] ss:$8 sps:$4 sm:$0xff]  }
 0x382   : > { %v4776_v31 = vld [vmem:[%s6639_s11 + $0xd0] ss:$8 sps:$4 sm:$0xff]   ;;  %v4782_v36 = vld [vmem:[%s6639_s11 + $0xe0] ss:$8 sps:$4 sm:$0xff]  }
 0x383   : > { %2407 = vmatpush1.bf16.msra.mxu1 %v4734_v7 }
 0x384   : > { %2408 = vmatprep.subr.bf16.mxu1 %v4742_v9 }
 0x387   : > { %2409 = vmatpush1.bf16.msra.mxu1 %v4740_v12 }
 0x388   : > { %2410 = vmatprep.subr.bf16.mxu1 %v4748_v14 }
 0x3a3   : > { %v1944_v15 = vpop.xlane.xlu1 %1943 }
 0x3a4   : > { %v1945_v18 = vrot.slane %v1944_v15, 4 }
 0x3a6   : > { %v1946_v6 = vadd.f32 %v1945_v18, %v1944_v15  ;;  %v4761_v15 = vld [vmem:[%s6640_s12 + $0x70] ss:$8 sps:$4 sm:$0xff]   ;;  %v4746_v18 = vld [vmem:[%s6639_s11 + $0x80] ss:$8 sps:$4 sm:$0xff]  }
 0x3a7   : > { %2411 = vmatpush1.bf16.msra.mxu1 %v4746_v18  ;;  %v4803_v18 = vld [vmem:[%s6642_s14] ss:$8 sps:$4 sm:$0xff]  }
 0x3a8   : > { %v1947_v22 = vrot.slane %v1946_v6, 2  ;;  %s4487_s29 = spop %4486  ;;  %2412 = vmatprep.subr.bf16.mxu1 %v4754_v20 }
 0x3a9   : > { %v1428_v25 = vstv %s4487_s29  ;;  %s6713_s29 = sld [smem:[#allocation13_spill]] }
 0x3aa   : > { %v1948_v26 = vadd.f32 %v1947_v22, %v1946_v6  ;;  %v1429_v27 = vadd.f32 1e-06, %v1428_v25  ;;  %v4767_v6 = vld [vmem:[%s6640_s12 + $0x80] ss:$8 sps:$4 sm:$0xff]   ;;  %v4760_v22 = vld [vmem:[%s6639_s11 + $0xa4] ss:$8 sps:$4 sm:$0xff]  }
 0x3ab   : > { %2413 = vmatpush1.bf16.msra.mxu1 %v4752_v21  ;;  %v4764_v25 = vld [vmem:[%s6639_s11 + $0xb0] ss:$8 sps:$4 sm:$0xff]  }
 0x3ac   : > { %5087 = vrcp.f32 %v1429_v27  ;;  %v1949_v29 = vrot.slane %v1948_v26, 1  ;;  %2414 = vmatprep.subr.bf16.mxu1 %v4760_v22  ;;  %v4770_v27 = vld [vmem:[%s6639_s11 + $0xc0] ss:$8 sps:$4 sm:$0xff]   ;;  %v4806_v22 = vld [vmem:[%s6642_s14 + $0x10] ss:$8 sps:$4 sm:$0xff]  }
 0x3ae   : > { %v1950_v32 = vadd.f32 %v1949_v29, %v1948_v26  ;;  %v4772_v26 = vld [vmem:[%s6639_s11 + $0xc4] ss:$8 sps:$4 sm:$0xff]   ;;  %v4778_v29 = vld [vmem:[%s6639_s11 + $0xd4] ss:$8 sps:$4 sm:$0xff]  }
 0x3af   : > { %2415 = vmatpush1.bf16.msra.mxu1 %v4758_v23  ;;  %s4451_s4 = sshll.u32 %s6713_s29, 6  ;;  %s5195_s29 = smov [#allocation7]  }
 0x3b0   : > { %4488 = vpush %v1950_v32  ;;  %2416 = vmatprep.subr.bf16.mxu1 %v4766_v24  ;;  %v4781_v32 = vld [vmem:[%s6640_s12 + $0xa4] ss:$8 sps:$4 sm:$0xff]   ;;  %s6581_s1 = scalar_lea.hbm %s6716_s0, %s4451_s4  ;;  %s5112_s5 = sshll.u32 %s5195_s29, 4  ;;  %s5113_s5 = int_to_ptr.vmem [resolvable:$false] %s5112_s5 }
 0x3b1   : > { %4490 = vpush %v2988_v33  ;;  %v4784_v33 = vld [vmem:[%s6639_s11 + $0xe4] ss:$8 sps:$4 sm:$0xff]   ;;  %p5115_p0 = scmp.lt.s32.totalorder %s6583_s30, %s5113_s5 }
 0x3b2   : > { %v4811_v24 = vld [vmem:[%s6642_s14 + $0x24] ss:$8 sps:$4 sm:$0xff]  }
 0x3b3   : > { %2417 = vmatpush1.bf16.msra.mxu1 %v4764_v25 }
 0x3b4   : > { %2418 = vmatprep.subr.bf16.mxu1 %v4772_v26 }
 0x3b6   : > { %v5088_v38 = vpop.eup %5087 }
 0x3b7   : > { %v1432_v16 = vmul.f32 %v5088_v38, %v1415_v11  ;;  %v1431_v39 = vmul.f32 %v5088_v38, %v1408_v37  ;;  %2419 = vmatpush1.bf16.msra.mxu1 %v4770_v27  ;;  %v4787_v37 = vld [vmem:[%s6640_s12 + $0xb4] ss:$8 sps:$4 sm:$0xff]   ;;  %v4785_v38 = vld [vmem:[%s6640_s12 + $0xb0] ss:$8 sps:$4 sm:$0xff]  }
 0x3b8   : > { %2420 = vmatprep.subr.bf16.mxu1 %v4778_v29  ;;  %v4790_v11 = vld [vmem:[%s6639_s11 + $0xf4] ss:$8 sps:$4 sm:$0xff]  }
 0x3b9   : > { %v1434_v40 = vpack.c.bf16 %v1432_v16, %v1432_v16  ;;  %v1433_v41 = vpack.c.bf16 %v1431_v39, %v1431_v39  ;;  %v4788_v16 = vld [vmem:[%s6639_s11 + $0xf0] ss:$8 sps:$4 sm:$0xff]   ;;  %v4793_v39 = vld [vmem:[%s6640_s12 + $0xc4] ss:$8 sps:$4 sm:$0xff]  }
 0x3bb   : > { %1659 = vmatprep.mubr.bf16.mxu0 %v1434_v40  ;;  %2421 = vmatpush1.bf16.msra.mxu1 %v4776_v31  ;;  %v4791_v40 = vld [vmem:[%s6640_s12 + $0xc0] ss:$8 sps:$4 sm:$0xff]  }
 0x3bc   : > { %1660 = vmatmul.mubr.bf16.vlgmr.msra.gmra.mrb[4].mxu0 %v1433_v41  ;;  %2422 = vmatprep.subr.bf16.mxu1 %v4784_v33  ;;  %v4794_v41 = vld [vmem:[%s6640_s12 + $0xd0] ss:$8 sps:$4 sm:$0xff]  }
 0x3bd   : > { %2152 = vmatpush1.bf16.msra.mxu0 %v4719_v47  ;;  %v4802_v47 = vld [vmem:[%s6640_s12 + $0xf4] ss:$8 sps:$4 sm:$0xff]  }
 0x3be   : > { %2153 = vmatprep.subr.bf16.mxu0 %v4727_v50 }
 0x3bf   : > { %2423 = vmatpush1.bf16.msra.mxu1 %v4782_v36  ;;  %v4812_v36 = vld [vmem:[%s6642_s14 + $0x30] ss:$8 sps:$4 sm:$0xff]  }
 0x3c0   : > { %2424 = vmatprep.subr.bf16.mxu1 %v4790_v11  ;;  %v4820_v11 = vld [vmem:[%s6642_s14 + $0x44] ss:$8 sps:$4 sm:$0xff]  }
 0x3c1   : > { %2154 = vmatpush1.bf16.msra.mxu0 %v4725_v53 }
 0x3c2   : > { %2155 = vmatprep.subr.bf16.mxu0 %v4733_v54 }
 0x3c3   : > { %2425 = vmatpush1.bf16.msra.mxu1 %v4788_v16 }
 0x3c4   : > { %2904 = vmatprep.subr.bf16.mxu1 %v4805_v46  ;;  %v4832_v46 = vld [vmem:[%s6642_s14 + $0x64] ss:$8 sps:$4 sm:$0xff]  }
 0x3c5   : > { %2156 = vmatpush1.bf16.msra.mxu0 %v4731_v56 }
 0x3c6   : > { %2157 = vmatprep.subr.bf16.mxu0 %v4739_v58  ;;  %v1916_v58 = vrot.slane %v1911_v55, %v5550_v48  ;;  %v4836_v55 = vld [vmem:[%s6642_s14 + $0x70] ss:$8 sps:$4 sm:$0xff]  }
 0x3c9   : > { %2158 = vmatpush1.bf16.msra.mxu0 %v4737_v60 }
 0x3ca   : > { %2159 = vmatprep.subr.bf16.mxu0 %v4745_v63 }
 0x3cd   : > { %2160 = vmatpush1.bf16.msra.mxu0 %v4743_v1 }
 0x3ce   : > { %2161 = vmatprep.subr.bf16.mxu0 %v4751_v3 }
 0x3d1   : > { %2162 = vmatpush1.bf16.msra.mxu0 %v4749_v5 }
 0x3d2   : > { %2163 = vmatprep.subr.bf16.mxu0 %v4757_v8 }
 0x3d5   : > { %2164 = vmatpush1.bf16.msra.mxu0 %v4755_v10 }
 0x3d6   : > { %2165 = vmatprep.subr.bf16.mxu0 %v4763_v13 }
 0x3d9   : > { %2166 = vmatpush1.bf16.msra.mxu0 %v4761_v15 }
 0x3da   : > { %2167 = vmatprep.subr.bf16.mxu0 %v4769_v19 }
 0x3dd   : > { %2168 = vmatpush1.bf16.msra.mxu0 %v4767_v6  ;;  %v4808_v6 = vld [vmem:[%s6642_s14 + $0x14] ss:$8 sps:$4 sm:$0xff]  }
 0x3de   : > { %2169 = vmatprep.subr.bf16.mxu0 %v4775_v28  ;;  %v4809_v28 = vld [vmem:[%s6642_s14 + $0x20] ss:$8 sps:$4 sm:$0xff]  }
 0x3e1   : > { %2170 = vmatpush1.bf16.msra.mxu0 %v4773_v30  ;;  %s4489_s24 = spop %4488  ;;  %v4814_v30 = vld [vmem:[%s6642_s14 + $0x34] ss:$8 sps:$4 sm:$0xff]  }
 0x3e2   : > { %2171 = vmatprep.subr.bf16.mxu0 %v4781_v32  ;;  %v1952_v5 = vstv %s4489_s24  ;;  %s4491_s6 = spop %4490  ;;  %s6714_s24 = sld [smem:[#allocation30_spill]] }
 0x3e3   : > { %v1953_v10 = vadd.f32 1e-06, %v1952_v5  ;;  %v4859_v5 = vld [vmem:[%s6643_s15 + $0x74] ss:$8 sps:$4 sm:$0xff]  }
 0x3e5   : > { %2172 = vmatpush1.bf16.msra.mxu0 %v4779_v34  ;;  %5089 = vrcp.f32 %v1953_v10  ;;  %v4865_v10 = vld [vmem:[%s6643_s15 + $0x84] ss:$8 sps:$4 sm:$0xff]  }
 0x3e6   : > { %2173 = vmatprep.subr.bf16.mxu0 %v4787_v37 }
 0x3e9   : > { %2174 = vmatpush1.bf16.msra.mxu0 %v4785_v38 }
 0x3ea   : > { %2175 = vmatprep.subr.bf16.mxu0 %v4793_v39  ;;  %v4815_v39 = vld [vmem:[%s6643_s15] ss:$8 sps:$4 sm:$0xff]  }
 0x3ed   : > { %2176 = vmatpush1.bf16.msra.mxu0 %v4791_v40  ;;  %v4818_v40 = vld [vmem:[%s6642_s14 + $0x40] ss:$8 sps:$4 sm:$0xff]  }
 0x3ee   : > { %2177 = vmatprep.subr.bf16.mxu0 %v4796_v42  ;;  %v4823_v42 = vld [vmem:[%s6643_s15 + $0x14] ss:$8 sps:$4 sm:$0xff]  }
 0x3ef   : > { %v6021_v33 = vpop.eup %5089 }
 0x3f1   : > { %2178 = vmatpush1.bf16.msra.mxu0 %v4794_v41 }
 0x3f2   : > { %2179 = vmatprep.subr.bf16.mxu0 %v4799_v43  ;;  %v4826_v43 = vld [vmem:[%s6642_s14 + $0x54] ss:$8 sps:$4 sm:$0xff]  }
 0x3f5   : > { %2180 = vmatpush1.bf16.msra.mxu0 %v4797_v44  ;;  %v4821_v44 = vld [vmem:[%s6643_s15 + $0x10] ss:$8 sps:$4 sm:$0xff]  }
 0x3f6   : > { %2181 = vmatprep.subr.bf16.mxu0 %v4802_v47  ;;  %v4824_v47 = vld [vmem:[%s6642_s14 + $0x50] ss:$8 sps:$4 sm:$0xff]  }
 0x3f9   : > { %2182 = vmatpush1.bf16.msra.mxu0 %v4800_v45  ;;  %v4829_v45 = vld [vmem:[%s6643_s15 + $0x24] ss:$8 sps:$4 sm:$0xff]  }
 0x3fa   : > { %2661 = vmatprep.subr.bf16.mxu0 %v4817_v49  ;;  %v4827_v49 = vld [vmem:[%s6643_s15 + $0x20] ss:$8 sps:$4 sm:$0xff]  }
 0x43d   : > { %v1904_v50 = vpop.f32.mrb[4].mxu1 }
 0x43e   : > { %v1906_v53 = vpop.f32.mrb[5].mxu1 }
 0x43f   : > { %v1908_v17 = vpop.f32.mrb[6].mxu1 }
 0x440   : > { %v1909_v54 = vpop.f32.mrb[7].mxu1  ;;  %v4838_v17 = vld [vmem:[%s6642_s14 + $0x74] ss:$8 sps:$4 sm:$0xff]  }
 0x441   : > { %v4833_v54 = vld [vmem:[%s6643_s15 + $0x30] ss:$8 sps:$4 sm:$0xff]  }
 0x48f   : > { %v1661_v56 = vpop.f32.mrb[4].mxu0 }
 0x490   : > { %v1705_v57 = vrot.slane %v1661_v56, %v5550_v48  ;;  %v1663_v59 = vpop.f32.mrb[5].mxu0  ;;  %v4841_v56 = vld [vmem:[%s6643_s15 + $0x44] ss:$8 sps:$4 sm:$0xff]  }
 0x491   : > { %v1709_v60 = vrot.slane %v1663_v59, %v5550_v48  ;;  %v1665_v63 = vpop.f32.mrb[6].mxu0  ;;  %v4842_v59 = vld [vmem:[%s6642_s14 + $0x80] ss:$8 sps:$4 sm:$0xff]  }
 0x492   : > { %v1905_v0 = vadd.f32 %v1904_v50, %v1705_v57  ;;  %v1666_v1 = vpop.f32.mrb[7].mxu0  ;;  %v4830_v50 = vld [vmem:[%s6642_s14 + $0x60] ss:$8 sps:$4 sm:$0xff]   ;;  %v4844_v57 = vld [vmem:[%s6642_s14 + $0x84] ss:$8 sps:$4 sm:$0xff]  }
 0x493   : > { %v1907_v2 = vadd.f32 %v1906_v53, %v1709_v60  ;;  %v4835_v53 = vld [vmem:[%s6643_s15 + $0x34] ss:$8 sps:$4 sm:$0xff]   ;;  %v4845_v63 = vld [vmem:[%s6643_s15 + $0x50] ss:$8 sps:$4 sm:$0xff]   ;;  %v4851_v1 = vld [vmem:[%s6643_s15 + $0x60] ss:$8 sps:$4 sm:$0xff]  }
 0x494   : > { %v1923_v3 = vadd.f32 %v1916_v58, %v1905_v0  ;;  %v4839_v58 = vld [vmem:[%s6643_s15 + $0x40] ss:$8 sps:$4 sm:$0xff]   ;;  %v4847_v60 = vld [vmem:[%s6643_s15 + $0x54] ss:$8 sps:$4 sm:$0xff]   ;;  %v4848_v0 = vld [vmem:[%s6642_s14 + $0x90] ss:$8 sps:$4 sm:$0xff]  }
 0x495   : > { %v1924_v4 = vadd.f32 %v1920_v62, %v1907_v2  ;;  %v4850_v62 = vld [vmem:[%s6642_s14 + $0x94] ss:$8 sps:$4 sm:$0xff]   ;;  %v4853_v2 = vld [vmem:[%s6643_s15 + $0x64] ss:$8 sps:$4 sm:$0xff]  }
 0x496   : > { %v1925_v7 = vmax.f32 %v1923_v3, 0.0  ;;  %v4854_v3 = vld [vmem:[%s6642_s14 + $0xa0] ss:$8 sps:$4 sm:$0xff]  }
 0x497   : > { %v1926_v8 = vmax.f32 %v1924_v4, 0.0  ;;  %v4856_v4 = vld [vmem:[%s6642_s14 + $0xa4] ss:$8 sps:$4 sm:$0xff]  }
 0x498   : > { %v1927_v9 = vadd.f32 %v1925_v7, %v5780_v51  ;;  %v4862_v7 = vld [vmem:[%s6642_s14 + $0xb4] ss:$8 sps:$4 sm:$0xff]  }
 0x499   : > { %v1928_v12 = vadd.f32 %v1926_v8, %v5782_v52  ;;  %v4857_v8 = vld [vmem:[%s6643_s15 + $0x70] ss:$8 sps:$4 sm:$0xff]  }
 0x49a   : > { %v1929_v13 = vmul.f32 %v1927_v9, %v5788_v61  ;;  %v2192_v20 = vpack.c.bf16 %v1927_v9, %v1927_v9  ;;  %v4860_v9 = vld [vmem:[%s6642_s14 + $0xb0] ss:$8 sps:$4 sm:$0xff]  }
 0x49b   : > { %v1930_v14 = vmul.f32 %v1928_v12, %v5788_v61  ;;  %v2193_v15 = vpack.c.bf16 %v1928_v12, %v1928_v12  ;;  %v4868_v12 = vld [vmem:[%s6642_s14 + $0xc4] ss:$8 sps:$4 sm:$0xff]  }
 0x49c   : > { %v1931_v19 = vrot.slane %v1929_v13, 4 }
 0x49d   : > { %v1937_v51 = vrot.slane %v1930_v14, 4  ;;  %2426 = vmatprep.mubr.bf16.mxu1 %v2193_v15  ;;  %v4871_v15 = vld [vmem:[%s6643_s15 + $0x94] ss:$8 sps:$4 sm:$0xff]  }
 0x49e   : > { %v1932_v21 = vadd.f32 %v1931_v19, %v1929_v13  ;;  %2427 = vmatmul.mubr.bf16.vlgmr.msra.gmra.mrb[8].mxu1 %v2192_v20  ;;  %v4863_v13 = vld [vmem:[%s6643_s15 + $0x80] ss:$8 sps:$4 sm:$0xff]   ;;  %v4869_v19 = vld [vmem:[%s6643_s15 + $0x90] ss:$8 sps:$4 sm:$0xff]  }
 0x49f   : > { %v1938_v52 = vadd.f32 %v1937_v51, %v1930_v14  ;;  %2905 = vmatpush1.bf16.msra.mxu1 %v4803_v18  ;;  %v4866_v14 = vld [vmem:[%s6642_s14 + $0xc0] ss:$8 sps:$4 sm:$0xff]   ;;  %v4874_v18 = vld [vmem:[%s6642_s14 + $0xd4] ss:$8 sps:$4 sm:$0xff]   ;;  %v4872_v20 = vld [vmem:[%s6642_s14 + $0xd0] ss:$8 sps:$4 sm:$0xff]  }
 0x4a0   : > { %v1933_v23 = vrot.slane %v1932_v21, 2  ;;  %2906 = vmatprep.subr.bf16.mxu1 %v4808_v6  ;;  %v4877_v6 = vld [vmem:[%s6643_s15 + $0xa4] ss:$8 sps:$4 sm:$0xff]  }
 0x4a1   : > { %v1939_v25 = vrot.slane %v1938_v52, 2  ;;  %v4880_v51 = vld [vmem:[%s6642_s14 + $0xe4] ss:$8 sps:$4 sm:$0xff]  }
 0x4a2   : > { %v1934_v26 = vadd.f32 %v1933_v23, %v1932_v21  ;;  %v4875_v21 = vld [vmem:[%s6643_s15 + $0xa0] ss:$8 sps:$4 sm:$0xff]   ;;  %v4886_v23 = vld [vmem:[%s6642_s14 + $0xf4] ss:$8 sps:$4 sm:$0xff]  }
 0x4a3   : > { %v1940_v27 = vadd.f32 %v1939_v25, %v1938_v52  ;;  %2907 = vmatpush1.bf16.msra.mxu1 %v4806_v22  ;;  %v4878_v52 = vld [vmem:[%s6642_s14 + $0xe0] ss:$8 sps:$4 sm:$0xff]   ;;  %v4883_v22 = vld [vmem:[%s6643_s15 + $0xb4] ss:$8 sps:$4 sm:$0xff]   ;;  %v4884_v25 = vld [vmem:[%s6642_s14 + $0xf0] ss:$8 sps:$4 sm:$0xff]  }
 0x4a4   : > { %v1935_v29 = vrot.slane %v1934_v26, 1  ;;  %2908 = vmatprep.subr.bf16.mxu1 %v4811_v24  ;;  %v4881_v24 = vld [vmem:[%s6643_s15 + $0xb0] ss:$8 sps:$4 sm:$0xff]  }
 0x4a5   : > { %v1941_v31 = vrot.slane %v1940_v27, 1 }
 0x4a6   : > { %v1936_v32 = vadd.f32 %v1935_v29, %v1934_v26  ;;  %v4889_v26 = vld [vmem:[%s6643_s15 + $0xc4] ss:$8 sps:$4 sm:$0xff]   ;;  %v4892_v29 = vld [vmem:[%s6643_s15 + $0xd4] ss:$8 sps:$4 sm:$0xff]  }
 0x4a7   : > { %v1942_v34 = vadd.f32 %v1941_v31, %v1940_v27  ;;  %2909 = vmatpush1.bf16.msra.mxu1 %v4809_v28  ;;  %v4887_v27 = vld [vmem:[%s6643_s15 + $0xc0] ss:$8 sps:$4 sm:$0xff]   ;;  %v4890_v28 = vld [vmem:[%s6643_s15 + $0xd0] ss:$8 sps:$4 sm:$0xff]  }
 0x4a8   : > { %v1955_v37 = vmul.f32 %v6021_v33, %v1936_v32  ;;  %2910 = vmatprep.subr.bf16.mxu1 %v4814_v30  ;;  %v4895_v30 = vld [vmem:[%s6643_s15 + $0xe4] ss:$8 sps:$4 sm:$0xff]   ;;  %v4893_v31 = vld [vmem:[%s6643_s15 + $0xe0] ss:$8 sps:$4 sm:$0xff]   ;;  %v4898_v32 = vld [vmem:[%s6643_s15 + $0xf4] ss:$8 sps:$4 sm:$0xff]  }
 0x4a9   : > { %v1956_v38 = vmul.f32 %v6021_v33, %v1942_v34  ;;  %v4896_v34 = vld [vmem:[%s6643_s15 + $0xf0] ss:$8 sps:$4 sm:$0xff]  }
 0x4aa   : > { %v1957_v41 = vpack.c.bf16 %v1955_v37, %v1955_v37  ;;  %v4916_v37 = vld [vmem:[%s6646_s18 + $0x4] ss:$8 sps:$4 sm:$0xff]  }
 0x4ab   : > { %v1958_v16 = vpack.c.bf16 %v1956_v38, %v1956_v38  ;;  %2911 = vmatpush1.bf16.msra.mxu1 %v4812_v36  ;;  %v4901_v36 = vld [vmem:[%s6645_s17 + $0x4] ss:$8 sps:$4 sm:$0xff]  }
 0x4ac   : > { %2912 = vmatprep.subr.bf16.mxu1 %v4820_v11 }
 0x4ad   : > { %2183 = vmatprep.mubr.bf16.mxu0 %v1958_v16 }
 0x4ae   : > { %2184 = vmatmul.mubr.bf16.vlgmr.msra.gmra.mrb[8].mxu0 %v1957_v41 }
 0x4af   : > { %2662 = vmatpush1.bf16.msra.mxu0 %v4815_v39  ;;  %2913 = vmatpush1.bf16.msra.mxu1 %v4818_v40  ;;  %v2435_v40 = vld [vmem:[%s6641_s13] sm:$0x3] }
 0x4b0   : > { %2663 = vmatprep.subr.bf16.mxu0 %v4823_v42  ;;  %2914 = vmatprep.subr.bf16.mxu1 %v4826_v43  ;;  %v2440_v43 = vrot.slane %v2435_v40, %v5550_v48 }
 0x4b3   : > { %2664 = vmatpush1.bf16.msra.mxu0 %v4821_v44  ;;  %2915 = vmatpush1.bf16.msra.mxu1 %v4824_v47 }
 0x4b4   : > { %2665 = vmatprep.subr.bf16.mxu0 %v4829_v45  ;;  %2916 = vmatprep.subr.bf16.mxu1 %v4832_v46  ;;  %v2444_v45 = vrot.slane %v2435_v40, %v5770_v35  ;;  %v4943_v40 = vld [vmem:[%s6645_s17 + $0x94] ss:$8 sps:$4 sm:$0xff]  }
 0x4b7   : > { %2666 = vmatpush1.bf16.msra.mxu0 %v4827_v49  ;;  %2917 = vmatpush1.bf16.msra.mxu1 %v4830_v50 }
 0x4b8   : > { %2667 = vmatprep.subr.bf16.mxu0 %v4835_v53  ;;  %2918 = vmatprep.subr.bf16.mxu1 %v4838_v17 }
 0x4bb   : > { %2668 = vmatpush1.bf16.msra.mxu0 %v4833_v54  ;;  %2919 = vmatpush1.bf16.msra.mxu1 %v4836_v55 }
 0x4bc   : > { %2669 = vmatprep.subr.bf16.mxu0 %v4841_v56  ;;  %2920 = vmatprep.subr.bf16.mxu1 %v4844_v57 }
 0x4bf   : > { %2670 = vmatpush1.bf16.msra.mxu0 %v4839_v58  ;;  %2921 = vmatpush1.bf16.msra.mxu1 %v4842_v59 }
 0x4c0   : > { %2671 = vmatprep.subr.bf16.mxu0 %v4847_v60  ;;  %2922 = vmatprep.subr.bf16.mxu1 %v4850_v62  ;;  %v4899_v60 = vld [vmem:[%s6645_s17] ss:$8 sps:$4 sm:$0xff]  }
 0x4c3   : > { %2672 = vmatpush1.bf16.msra.mxu0 %v4845_v63  ;;  %2923 = vmatpush1.bf16.msra.mxu1 %v4848_v0  ;;  %v4904_v0 = vld [vmem:[%s6645_s17 + $0x14] ss:$8 sps:$4 sm:$0xff]  }
 0x4c4   : > { %2673 = vmatprep.subr.bf16.mxu0 %v4853_v2  ;;  %2924 = vmatprep.subr.bf16.mxu1 %v4856_v4  ;;  %v4902_v4 = vld [vmem:[%s6645_s17 + $0x10] ss:$8 sps:$4 sm:$0xff]  }
 0x4c7   : > { %2674 = vmatpush1.bf16.msra.mxu0 %v4851_v1  ;;  %2925 = vmatpush1.bf16.msra.mxu1 %v4854_v3 }
 0x4c8   : > { %2675 = vmatprep.subr.bf16.mxu0 %v4859_v5  ;;  %2926 = vmatprep.subr.bf16.mxu1 %v4862_v7  ;;  %v4907_v7 = vld [vmem:[%s6645_s17 + $0x24] ss:$8 sps:$4 sm:$0xff]  }
 0x4cb   : > { %2676 = vmatpush1.bf16.msra.mxu0 %v4857_v8  ;;  %2927 = vmatpush1.bf16.msra.mxu1 %v4860_v9 }
 0x4cc   : > { %2677 = vmatprep.subr.bf16.mxu0 %v4865_v10  ;;  %2928 = vmatprep.subr.bf16.mxu1 %v4868_v12  ;;  %v4905_v12 = vld [vmem:[%s6645_s17 + $0x20] ss:$8 sps:$4 sm:$0xff]  }
 0x4cf   : > { %2678 = vmatpush1.bf16.msra.mxu0 %v4863_v13  ;;  %2929 = vmatpush1.bf16.msra.mxu1 %v4866_v14  ;;  %v4910_v14 = vld [vmem:[%s6645_s17 + $0x34] ss:$8 sps:$4 sm:$0xff]  }
 0x4d0   : > { %2679 = vmatprep.subr.bf16.mxu0 %v4871_v15  ;;  %2930 = vmatprep.subr.bf16.mxu1 %v4874_v18 }
 0x4d3   : > { %2680 = vmatpush1.bf16.msra.mxu0 %v4869_v19  ;;  %2931 = vmatpush1.bf16.msra.mxu1 %v4872_v20  ;;  %v4908_v20 = vld [vmem:[%s6645_s17 + $0x30] ss:$8 sps:$4 sm:$0xff]  }
 0x4d4   : > { %2681 = vmatprep.subr.bf16.mxu0 %v4877_v6  ;;  %2932 = vmatprep.subr.bf16.mxu1 %v4880_v51  ;;  %v4913_v51 = vld [vmem:[%s6645_s17 + $0x44] ss:$8 sps:$4 sm:$0xff]  }
 0x4d7   : > { %2682 = vmatpush1.bf16.msra.mxu0 %v4875_v21  ;;  %2933 = vmatpush1.bf16.msra.mxu1 %v4878_v52 }
 0x4d8   : > { %2683 = vmatprep.subr.bf16.mxu0 %v4883_v22  ;;  %2934 = vmatprep.subr.bf16.mxu1 %v4886_v23  ;;  %v4911_v22 = vld [vmem:[%s6645_s17 + $0x40] ss:$8 sps:$4 sm:$0xff]  }
 0x4d9   : > { %v4914_v23 = vld [vmem:[%s6646_s18] ss:$8 sps:$4 sm:$0xff]  }
 0x4db   : > { %2684 = vmatpush1.bf16.msra.mxu0 %v4881_v24  ;;  %2935 = vmatpush1.bf16.msra.mxu1 %v4884_v25  ;;  %v4919_v25 = vld [vmem:[%s6645_s17 + $0x54] ss:$8 sps:$4 sm:$0xff]  }
 0x4dc   : > { %2685 = vmatprep.subr.bf16.mxu0 %v4889_v26  ;;  %3432 = vmatprep.subr.bf16.mxu1 %v4901_v36  ;;  %v4917_v26 = vld [vmem:[%s6645_s17 + $0x50] ss:$8 sps:$4 sm:$0xff]  }
 0x4dd   : > { %v4929_v36 = vld [vmem:[%s6645_s17 + $0x70] ss:$8 sps:$4 sm:$0xff]  }
 0x4df   : > { %2686 = vmatpush1.bf16.msra.mxu0 %v4887_v27  ;;  %v4920_v27 = vld [vmem:[%s6646_s18 + $0x10] ss:$8 sps:$4 sm:$0xff]  }
 0x4e0   : > { %2687 = vmatprep.subr.bf16.mxu0 %v4892_v29  ;;  %v4928_v29 = vld [vmem:[%s6646_s18 + $0x24] ss:$8 sps:$4 sm:$0xff]  }
 0x4e3   : > { %2688 = vmatpush1.bf16.msra.mxu0 %v4890_v28  ;;  %v4925_v28 = vld [vmem:[%s6645_s17 + $0x64] ss:$8 sps:$4 sm:$0xff]  }
 0x4e4   : > { %2689 = vmatprep.subr.bf16.mxu0 %v4895_v30  ;;  %v4923_v30 = vld [vmem:[%s6645_s17 + $0x60] ss:$8 sps:$4 sm:$0xff]  }
 0x4e7   : > { %2690 = vmatpush1.bf16.msra.mxu0 %v4893_v31  ;;  %v4926_v31 = vld [vmem:[%s6646_s18 + $0x20] ss:$8 sps:$4 sm:$0xff]  }
 0x4e8   : > { %2691 = vmatprep.subr.bf16.mxu0 %v4898_v32  ;;  %v4931_v32 = vld [vmem:[%s6645_s17 + $0x74] ss:$8 sps:$4 sm:$0xff]  }
 0x4eb   : > { %2692 = vmatpush1.bf16.msra.mxu0 %v4896_v34  ;;  %v4934_v34 = vld [vmem:[%s6646_s18 + $0x34] ss:$8 sps:$4 sm:$0xff]  }
 0x4ec   : > { %3189 = vmatprep.subr.bf16.mxu0 %v4916_v37  ;;  %v4932_v37 = vld [vmem:[%s6646_s18 + $0x30] ss:$8 sps:$4 sm:$0xff]  }
 0x571   : > { %v2428_v11 = vpop.f32.mrb[8].mxu1 }
 0x572   : > { %v2430_v38 = vpop.f32.mrb[9].mxu1 }
 0x573   : > { %v2432_v16 = vpop.f32.mrb[10].mxu1 }
 0x574   : > { %v2433_v39 = vpop.f32.mrb[11].mxu1  ;;  %v4940_v16 = vld [vmem:[%s6646_s18 + $0x44] ss:$8 sps:$4 sm:$0xff]  }
 0x575   : > { %v4938_v39 = vld [vmem:[%s6646_s18 + $0x40] ss:$8 sps:$4 sm:$0xff]  }
 0x581   : > { %v2185_v41 = vpop.f32.mrb[8].mxu0 }
 0x582   : > { %v2229_v42 = vrot.slane %v2185_v41, %v5550_v48  ;;  %v2187_v44 = vpop.f32.mrb[9].mxu0  ;;  %v4941_v41 = vld [vmem:[%s6645_s17 + $0x90] ss:$8 sps:$4 sm:$0xff]  }
 0x583   : > { %v2233_v47 = vrot.slane %v2187_v44, %v5550_v48  ;;  %v2189_v46 = vpop.f32.mrb[10].mxu0  ;;  %v4949_v44 = vld [vmem:[%s6645_s17 + $0xa4] ss:$8 sps:$4 sm:$0xff]  }
 0x584   : > { %v2429_v49 = vadd.f32 %v2428_v11, %v2229_v42  ;;  %v2190_v50 = vpop.f32.mrb[11].mxu0  ;;  %v4937_v11 = vld [vmem:[%s6645_s17 + $0x84] ss:$8 sps:$4 sm:$0xff]   ;;  %v4944_v42 = vld [vmem:[%s6646_s18 + $0x50] ss:$8 sps:$4 sm:$0xff]  }
 0x585   : > { %v2431_v53 = vadd.f32 %v2430_v38, %v2233_v47  ;;  %v4935_v38 = vld [vmem:[%s6645_s17 + $0x80] ss:$8 sps:$4 sm:$0xff]   ;;  %v4958_v50 = vld [vmem:[%s6646_s18 + $0x74] ss:$8 sps:$4 sm:$0xff]  }
 0x586   : > { %v2447_v17 = vadd.f32 %v2440_v43, %v2429_v49  ;;  %v4946_v43 = vld [vmem:[%s6646_s18 + $0x54] ss:$8 sps:$4 sm:$0xff]   ;;  %v4947_v47 = vld [vmem:[%s6645_s17 + $0xa0] ss:$8 sps:$4 sm:$0xff]  }
 0x587   : > { %v2448_v54 = vadd.f32 %v2444_v45, %v2431_v53  ;;  %v4952_v45 = vld [vmem:[%s6646_s18 + $0x64] ss:$8 sps:$4 sm:$0xff]   ;;  %v4950_v46 = vld [vmem:[%s6646_s18 + $0x60] ss:$8 sps:$4 sm:$0xff]   ;;  %v4955_v49 = vld [vmem:[%s6645_s17 + $0xb4] ss:$8 sps:$4 sm:$0xff]  }
 0x588   : > { %v6206_v55 = vmax.f32 %v2447_v17, 0.0  ;;  %v4953_v53 = vld [vmem:[%s6645_s17 + $0xb0] ss:$8 sps:$4 sm:$0xff]  }
 0x589   : > { %v6208_v56 = vmax.f32 %v2448_v54, 0.0  ;;  %v4956_v17 = vld [vmem:[%s6646_s18 + $0x70] ss:$8 sps:$4 sm:$0xff]   ;;  %v4961_v54 = vld [vmem:[%s6645_s17 + $0xc4] ss:$8 sps:$4 sm:$0xff]  }
 0x58a   : > { %v2451_v57 = vmul.f32 %v6206_v55, %v5788_v61  ;;  %v2702_v63 = vpack.c.bf16 %v6206_v55, %v6206_v55 }
 0x58b   : > { %v2452_v58 = vmul.f32 %v6208_v56, %v5788_v61  ;;  %v2703_v59 = vpack.c.bf16 %v6208_v56, %v6208_v56 }
 0x58c   : > { %v2453_v62 = vrot.slane %v2451_v57, 4 }
 0x58d   : > { %v2459_v1 = vrot.slane %v2452_v58, 4  ;;  %2936 = vmatprep.mubr.bf16.mxu1 %v2703_v59  ;;  %v4962_v59 = vld [vmem:[%s6646_s18 + $0x80] ss:$8 sps:$4 sm:$0xff]  }
 0x58e   : > { %v2454_v2 = vadd.f32 %v2453_v62, %v2451_v57  ;;  %2937 = vmatmul.mubr.bf16.vlgmr.msra.gmra.mrb[12].mxu1 %v2702_v63  ;;  %v4959_v57 = vld [vmem:[%s6645_s17 + $0xc0] ss:$8 sps:$4 sm:$0xff]   ;;  %v4965_v62 = vld [vmem:[%s6645_s17 + $0xd0] ss:$8 sps:$4 sm:$0xff]   ;;  %v4970_v63 = vld [vmem:[%s6646_s18 + $0x94] ss:$8 sps:$4 sm:$0xff]  }
 0x58f   : > { %v2460_v3 = vadd.f32 %v2459_v1, %v2452_v58  ;;  %3433 = vmatpush1.bf16.msra.mxu1 %v4899_v60  ;;  %v4964_v58 = vld [vmem:[%s6646_s18 + $0x84] ss:$8 sps:$4 sm:$0xff]   ;;  %v4967_v60 = vld [vmem:[%s6645_s17 + $0xd4] ss:$8 sps:$4 sm:$0xff]  }
 0x590   : > { %v2455_v5 = vrot.slane %v2454_v2, 2  ;;  %3434 = vmatprep.subr.bf16.mxu1 %v4904_v0  ;;  %v4968_v0 = vld [vmem:[%s6646_s18 + $0x90] ss:$8 sps:$4 sm:$0xff]   ;;  %v4973_v1 = vld [vmem:[%s6645_s17 + $0xe4] ss:$8 sps:$4 sm:$0xff]  }
 0x591   : > { %v2461_v8 = vrot.slane %v2460_v3, 2 }
 0x592   : > { %v2456_v9 = vadd.f32 %v2455_v5, %v2454_v2  ;;  %v4971_v2 = vld [vmem:[%s6645_s17 + $0xe0] ss:$8 sps:$4 sm:$0xff]   ;;  %v4979_v5 = vld [vmem:[%s6645_s17 + $0xf4] ss:$8 sps:$4 sm:$0xff]  }
 0x593   : > { %v2462_v10 = vadd.f32 %v2461_v8, %v2460_v3  ;;  %3435 = vmatpush1.bf16.msra.mxu1 %v4902_v4  ;;  %v4976_v3 = vld [vmem:[%s6646_s18 + $0xa4] ss:$8 sps:$4 sm:$0xff]   ;;  %v4974_v4 = vld [vmem:[%s6646_s18 + $0xa0] ss:$8 sps:$4 sm:$0xff]   ;;  %v4982_v8 = vld [vmem:[%s6646_s18 + $0xb4] ss:$8 sps:$4 sm:$0xff]  }
 0x594   : > { %v2457_v13 = vrot.slane %v2456_v9, 1  ;;  %3436 = vmatprep.subr.bf16.mxu1 %v4907_v7  ;;  %v4977_v7 = vld [vmem:[%s6645_s17 + $0xf0] ss:$8 sps:$4 sm:$0xff]  }
 0x595   : > { %v2463_v15 = vrot.slane %v2462_v10, 1 }
 0x596   : > { %v2458_v18 = vadd.f32 %v2457_v13, %v2456_v9  ;;  %v4980_v9 = vld [vmem:[%s6646_s18 + $0xb0] ss:$8 sps:$4 sm:$0xff]   ;;  %v4988_v13 = vld [vmem:[%s6646_s18 + $0xd4] ss:$8 sps:$4 sm:$0xff]  }
 0x597   : > { %v2464_v19 = vadd.f32 %v2463_v15, %v2462_v10  ;;  %3437 = vmatpush1.bf16.msra.mxu1 %v4905_v12  ;;  %v4985_v10 = vld [vmem:[%s6646_s18 + $0xc4] ss:$8 sps:$4 sm:$0xff]   ;;  %v4983_v12 = vld [vmem:[%s6646_s18 + $0xc0] ss:$8 sps:$4 sm:$0xff]  }
 0x598   : > { %v2465_v6 = vmul.f32 %v6021_v33, %v2458_v18  ;;  %3438 = vmatprep.subr.bf16.mxu1 %v4910_v14  ;;  %v4986_v14 = vld [vmem:[%s6646_s18 + $0xd0] ss:$8 sps:$4 sm:$0xff]   ;;  %v4991_v15 = vld [vmem:[%s6646_s18 + $0xe4] ss:$8 sps:$4 sm:$0xff]   ;;  %v4989_v18 = vld [vmem:[%s6646_s18 + $0xe0] ss:$8 sps:$4 sm:$0xff]  }
 0x599   : > { %v2466_v21 = vmul.f32 %v6021_v33, %v2464_v19  ;;  %v4922_v33 = vld [vmem:[%s6646_s18 + $0x14] ss:$8 sps:$4 sm:$0xff]  }
 0x59a   : > { %v2467_v24 = vpack.c.bf16 %v2465_v6, %v2465_v6  ;;  %v4994_v19 = vld [vmem:[%s6646_s18 + $0xf4] ss:$8 sps:$4 sm:$0xff]   ;;  %v4997_v6 = vld [vmem:[%s6648_s20 + $0x4] ss:$8 sps:$4 sm:$0xff]  }
 0x59b   : > { %v2468_v52 = vpack.c.bf16 %v2466_v21, %v2466_v21  ;;  %3439 = vmatpush1.bf16.msra.mxu1 %v4908_v20  ;;  %v4992_v20 = vld [vmem:[%s6646_s18 + $0xf0] ss:$8 sps:$4 sm:$0xff]  }
 0x59c   : > { %3440 = vmatprep.subr.bf16.mxu1 %v4913_v51 }
 0x59d   : > { %2693 = vmatprep.mubr.bf16.mxu0 %v2468_v52 }
 0x59e   : > { %2694 = vmatmul.mubr.bf16.vlgmr.msra.gmra.mrb[12].mxu0 %v2467_v24 }
 0x59f   : > { %3441 = vmatpush1.bf16.msra.mxu1 %v4911_v22  ;;  %3190 = vmatpush1.bf16.msra.mxu0 %v4914_v23  ;;  %v2945_v23 = vld [vmem:[%s6644_s16] sm:$0x3] }
 0x5a0   : > { %3442 = vmatprep.subr.bf16.mxu1 %v4919_v25  ;;  %3191 = vmatprep.subr.bf16.mxu0 %v4922_v33  ;;  %v2950_v33 = vrot.slane %v2945_v23, %v5550_v48 }
 0x5a3   : > { %3443 = vmatpush1.bf16.msra.mxu1 %v4917_v26  ;;  %3192 = vmatpush1.bf16.msra.mxu0 %v4920_v27 }
 0x5a4   : > { %3444 = vmatprep.subr.bf16.mxu1 %v4925_v28  ;;  %3193 = vmatprep.subr.bf16.mxu0 %v4928_v29  ;;  %v2954_v28 = vrot.slane %v2945_v23, %v5770_v35  ;;  %v5025_v23 = vld [vmem:[%s6648_s20 + $0xa0] ss:$8 sps:$4 sm:$0xff]  }
 0x5a7   : > { %3445 = vmatpush1.bf16.msra.mxu1 %v4923_v30  ;;  %3194 = vmatpush1.bf16.msra.mxu0 %v4926_v31 }
 0x5a8   : > { %3446 = vmatprep.subr.bf16.mxu1 %v4931_v32  ;;  %3195 = vmatprep.subr.bf16.mxu0 %v4934_v34 }
 0x5ab   : > { %3447 = vmatpush1.bf16.msra.mxu1 %v4929_v36  ;;  %3196 = vmatpush1.bf16.msra.mxu0 %v4932_v37 }
 0x5ac   : > { %3448 = vmatprep.subr.bf16.mxu1 %v4937_v11  ;;  %3197 = vmatprep.subr.bf16.mxu0 %v4940_v16  ;;  %v2990_v11 = vstv %s4491_s6  ;;  %s5108_s6 = scalar_lea.vmem %s6583_s30, 64 }
 0x5ad   : > { %p5109_p10 = scmp.ne.s32.totalorder %s6583_s30, %s5108_s6 }
 0x5af   : > { %3449 = vmatpush1.bf16.msra.mxu1 %v4935_v38  ;;  %3198 = vmatpush1.bf16.msra.mxu0 %v4938_v39  ;;  %p5110_p11 = pnand %p5109_p10, %p5366_p4 }
 0x5b0   : > { %3450 = vmatprep.subr.bf16.mxu1 %v4943_v40  ;;  %3199 = vmatprep.subr.bf16.mxu0 %v4946_v43  ;;  %v2991_v40 = vadd.f32 1e-06, %v2990_v11  ;;  %v5046_v11 = vld [vmem:[%s6650_s22 + $0x8] sm:$0xff]  }
 0x5b1   : > { %p5111_p13 = pneg %p5110_p11 }
 0x5b2   : > { %5091 = vrcp.f32 %v2991_v40  ;;  %v5050_v40 = vld [vmem:[%s6650_s22 + $0x18] sm:$0xff]  }
 0x5b3   : > { %3451 = vmatpush1.bf16.msra.mxu1 %v4941_v41  ;;  %3200 = vmatpush1.bf16.msra.mxu0 %v4944_v42 }
 0x5b4   : > { %3452 = vmatprep.subr.bf16.mxu1 %v4949_v44  ;;  %3201 = vmatprep.subr.bf16.mxu0 %v4952_v45 }
 0x5b7   : > { %3453 = vmatpush1.bf16.msra.mxu1 %v4947_v47  ;;  %3202 = vmatpush1.bf16.msra.mxu0 %v4950_v46 }
 0x5b8   : > { %3454 = vmatprep.subr.bf16.mxu1 %v4955_v49  ;;  %3203 = vmatprep.subr.bf16.mxu0 %v4958_v50 }
 0x5bb   : > { %3455 = vmatpush1.bf16.msra.mxu1 %v4953_v53  ;;  %3204 = vmatpush1.bf16.msra.mxu0 %v4956_v17 }
 0x5bc   : > { %3456 = vmatprep.subr.bf16.mxu1 %v4961_v54  ;;  %3205 = vmatprep.subr.bf16.mxu0 %v4964_v58 }
 0x5bf   : > { %3457 = vmatpush1.bf16.msra.mxu1 %v4959_v57  ;;  %3206 = vmatpush1.bf16.msra.mxu0 %v4962_v59 }
 0x5c0   : > { %3458 = vmatprep.subr.bf16.mxu1 %v4967_v60  ;;  %3207 = vmatprep.subr.bf16.mxu0 %v4970_v63  ;;  %v5092_v60 = vpop.eup %5091 }
 0x5c3   : > { %3459 = vmatpush1.bf16.msra.mxu1 %v4965_v62  ;;  %3208 = vmatpush1.bf16.msra.mxu0 %v4968_v0 }
 0x5c4   : > { %3460 = vmatprep.subr.bf16.mxu1 %v4973_v1  ;;  %3209 = vmatprep.subr.bf16.mxu0 %v4976_v3  ;;  %v4995_v1 = vld [vmem:[%s6648_s20] ss:$8 sps:$4 sm:$0xff]   ;;  %v5000_v3 = vld [vmem:[%s6648_s20 + $0x14] ss:$8 sps:$4 sm:$0xff]  }
 0x5c7   : > { %3461 = vmatpush1.bf16.msra.mxu1 %v4971_v2  ;;  %3210 = vmatpush1.bf16.msra.mxu0 %v4974_v4  ;;  %v4998_v4 = vld [vmem:[%s6648_s20 + $0x10] ss:$8 sps:$4 sm:$0xff]  }
 0x5c8   : > { %3462 = vmatprep.subr.bf16.mxu1 %v4979_v5  ;;  %3211 = vmatprep.subr.bf16.mxu0 %v4982_v8  ;;  %v5003_v5 = vld [vmem:[%s6648_s20 + $0x24] ss:$8 sps:$4 sm:$0xff]   ;;  %v5006_v8 = vld [vmem:[%s6648_s20 + $0x34] ss:$8 sps:$4 sm:$0xff]  }
 0x5cb   : > { %3463 = vmatpush1.bf16.msra.mxu1 %v4977_v7  ;;  %3212 = vmatpush1.bf16.msra.mxu0 %v4980_v9  ;;  %v5001_v7 = vld [vmem:[%s6648_s20 + $0x20] ss:$8 sps:$4 sm:$0xff]   ;;  %v5004_v9 = vld [vmem:[%s6648_s20 + $0x30] ss:$8 sps:$4 sm:$0xff]  }
 0x5cc   : > { %3213 = vmatprep.subr.bf16.mxu0 %v4985_v10  ;;  %v5009_v10 = vld [vmem:[%s6648_s20 + $0x44] ss:$8 sps:$4 sm:$0xff]  }
 0x5cf   : > { %3214 = vmatpush1.bf16.msra.mxu0 %v4983_v12  ;;  %v5007_v12 = vld [vmem:[%s6648_s20 + $0x40] ss:$8 sps:$4 sm:$0xff]  }
 0x5d0   : > { %3215 = vmatprep.subr.bf16.mxu0 %v4988_v13  ;;  %v5012_v13 = vld [vmem:[%s6648_s20 + $0x54] ss:$8 sps:$4 sm:$0xff]  }
 0x5d3   : > { %3216 = vmatpush1.bf16.msra.mxu0 %v4986_v14  ;;  %v5010_v14 = vld [vmem:[%s6648_s20 + $0x50] ss:$8 sps:$4 sm:$0xff]  }
 0x5d4   : > { %3217 = vmatprep.subr.bf16.mxu0 %v4991_v15  ;;  %v5015_v15 = vld [vmem:[%s6648_s20 + $0x64] ss:$8 sps:$4 sm:$0xff]  }
 0x5d7   : > { %3218 = vmatpush1.bf16.msra.mxu0 %v4989_v18  ;;  %v5013_v18 = vld [vmem:[%s6648_s20 + $0x60] ss:$8 sps:$4 sm:$0xff]  }
 0x5d8   : > { %3219 = vmatprep.subr.bf16.mxu0 %v4994_v19  ;;  %v5018_v19 = vld [vmem:[%s6648_s20 + $0x74] ss:$8 sps:$4 sm:$0xff]  }
 0x5db   : > { %3220 = vmatpush1.bf16.msra.mxu0 %v4992_v20  ;;  %v5016_v20 = vld [vmem:[%s6648_s20 + $0x70] ss:$8 sps:$4 sm:$0xff]  }
 0x5dc   : > { %3695 = vmatprep.subr.bf16.mxu0 %v4997_v6  ;;  %v5021_v6 = vld [vmem:[%s6648_s20 + $0x84] ss:$8 sps:$4 sm:$0xff]  }
 0x661   : > { %v2938_v51 = vpop.f32.mrb[12].mxu1 }
 0x662   : > { %v2940_v21 = vpop.f32.mrb[13].mxu1 }
 0x663   : > { %v2942_v52 = vpop.f32.mrb[14].mxu1 }
 0x664   : > { %v2943_v22 = vpop.f32.mrb[15].mxu1  ;;  %v5022_v52 = vld [vmem:[%s6648_s20 + $0x90] ss:$8 sps:$4 sm:$0xff]  }
 0x665   : > { %v5027_v22 = vld [vmem:[%s6648_s20 + $0xa4] ss:$8 sps:$4 sm:$0xff]  }
 0x671   : > { %v2695_v24 = vpop.f32.mrb[12].mxu0 }
 0x672   : > { %v2739_v25 = vrot.slane %v2695_v24, %v5550_v48  ;;  %v2697_v26 = vpop.f32.mrb[13].mxu0  ;;  %v5030_v24 = vld [vmem:[%s6648_s20 + $0xb4] ss:$8 sps:$4 sm:$0xff]  }
 0x673   : > { %v2743_v27 = vrot.slane %v2697_v26, %v5550_v48  ;;  %v2699_v29 = vpop.f32.mrb[14].mxu0  ;;  %v5031_v26 = vld [vmem:[%s6648_s20 + $0xc0] ss:$8 sps:$4 sm:$0xff]  }
 0x674   : > { %v2939_v30 = vadd.f32 %v2938_v51, %v2739_v25  ;;  %v2700_v31 = vpop.f32.mrb[15].mxu0  ;;  %v5019_v51 = vld [vmem:[%s6648_s20 + $0x80] ss:$8 sps:$4 sm:$0xff]   ;;  %v5028_v25 = vld [vmem:[%s6648_s20 + $0xb0] ss:$8 sps:$4 sm:$0xff]  }
 0x675   : > { %v2941_v32 = vadd.f32 %v2940_v21, %v2743_v27  ;;  %v5024_v21 = vld [vmem:[%s6648_s20 + $0x94] ss:$8 sps:$4 sm:$0xff]   ;;  %v5039_v29 = vld [vmem:[%s6648_s20 + $0xe4] ss:$8 sps:$4 sm:$0xff]  }
 0x676   : > { %v2957_v34 = vadd.f32 %v2950_v33, %v2939_v30  ;;  %v5033_v33 = vld [vmem:[%s6648_s20 + $0xc4] ss:$8 sps:$4 sm:$0xff]   ;;  %v5036_v27 = vld [vmem:[%s6648_s20 + $0xd4] ss:$8 sps:$4 sm:$0xff]   ;;  %v5037_v30 = vld [vmem:[%s6648_s20 + $0xe0] ss:$8 sps:$4 sm:$0xff]  }
 0x677   : > { %v2958_v36 = vadd.f32 %v2954_v28, %v2941_v32  ;;  %v5034_v28 = vld [vmem:[%s6648_s20 + $0xd0] ss:$8 sps:$4 sm:$0xff]   ;;  %v5042_v31 = vld [vmem:[%s6648_s20 + $0xf4] ss:$8 sps:$4 sm:$0xff]  }
 0x678   : > { %v2959_v37 = vmax.f32 %v2957_v34, 0.0  ;;  %v5040_v32 = vld [vmem:[%s6648_s20 + $0xf0] ss:$8 sps:$4 sm:$0xff]   ;;  %v5043_v34 = vld [vmem:[%s6650_s22 + $0x40] sm:$0xff]  }
 0x679   : > { %v2960_v38 = vmax.f32 %v2958_v36, 0.0  ;;  %v5044_v36 = vld [vmem:[%s6650_s22] sm:$0xff]   ;;  %4462 = vmatprep.subr.bf16.mxu1 %v5043_v34 }
 0x67a   : > { %v2961_v16 = vadd.f32 %v2959_v37, %v6206_v55  ;;  %v5045_v37 = vld [vmem:[%s6650_s22 + $0x48] sm:$0xff]  }
 0x67b   : > { %v2962_v39 = vadd.f32 %v2960_v38, %v6208_v56  ;;  %v5047_v38 = vld [vmem:[%s6650_s22 + $0x50] sm:$0xff]  }
 0x67c   : > { %v2963_v41 = vmul.f32 %v2961_v16, %v5788_v61  ;;  %v3230_v47 = vpack.c.bf16 %v2961_v16, %v2961_v16  ;;  %v5048_v16 = vld [vmem:[%s6650_s22 + $0x10] sm:$0xff]  }
 0x67d   : > { %v2964_v42 = vmul.f32 %v2962_v39, %v5788_v61  ;;  %v3231_v43 = vpack.c.bf16 %v2962_v39, %v2962_v39  ;;  %v5049_v39 = vld [vmem:[%s6650_s22 + $0x58] sm:$0xff]  }
 0x67e   : > { %v2966_v44 = vsel %vm2965_vm13, %v2963_v41, 0.0  ;;  %v5051_v41 = vld [vmem:[%s6650_s22 + $0x60] sm:$0xff]  }
 0x67f   : > { %v2967_v45 = vrot.slane %v2966_v44, 4  ;;  %v2973_v46 = vsel %vm2965_vm13, %v2964_v42, 0.0  ;;  %3464 = vmatprep.mubr.bf16.mxu1 %v3231_v43  ;;  %v5052_v42 = vld [vmem:[%s6650_s22 + $0x20] sm:$0xff]   ;;  %v5053_v43 = vld [vmem:[%s6650_s22 + $0x68] sm:$0xff]  }
 0x680   : > { %v2974_v49 = vrot.slane %v2973_v46, 4  ;;  %3465 = vmatmul.mubr.bf16.vlgmr.msra.gmra.mrb[16].mxu1 %v3230_v47 }
 0x681   : > { %v2968_v50 = vadd.f32 %v2967_v45, %v2966_v44  ;;  %4463 = vmatpush3.bf16.msra.mxu1 %v5044_v36  ;;  %v5054_v44 = vld [vmem:[%s6650_s22 + $0x28] sm:$0xff]  }
 0x682   : > { %v2975_v53 = vadd.f32 %v2974_v49, %v2973_v46  ;;  %4464 = vmatprep.subr.bf16.mxu1 %v5045_v37 }
 0x683   : > { %v2969_v55 = vrot.slane %v2968_v50, 2 }
 0x684   : > { %v2976_v17 = vrot.slane %v2975_v53, 2 }
 0x685   : > { %v2970_v54 = vadd.f32 %v2969_v55, %v2968_v50  ;;  %4465 = vmatpush3.bf16.msra.mxu1 %v5046_v11  ;;  %v3473_v50 = vld [vmem:[%s6647_s19] sm:$0x3] }
 0x686   : > { %v2977_v56 = vadd.f32 %v2976_v17, %v2975_v53  ;;  %4466 = vmatprep.subr.bf16.mxu1 %v5047_v38  ;;  %v3478_v17 = vrot.slane %v3473_v50, %v5550_v48 }
 0x687   : > { %v2971_v57 = vrot.slane %v2970_v54, 1 }
 0x688   : > { %v2978_v58 = vrot.slane %v2977_v56, 1 }
 0x689   : > { %v2972_v59 = vadd.f32 %v2971_v57, %v2970_v54  ;;  %4467 = vmatpush3.bf16.msra.mxu1 %v5048_v16  ;;  %v3482_v57 = vrot.slane %v3473_v50, %v5770_v35 }
 0x68a   : > { %v2979_v61 = vadd.f32 %v2978_v58, %v2977_v56  ;;  %4468 = vmatprep.subr.bf16.mxu1 %v5049_v39 }
 0x68b   : > { %v2993_v62 = vmul.f32 %v5092_v60, %v2972_v59 }
 0x68c   : > { %v2994_v63 = vmul.f32 %v5092_v60, %v2979_v61 }
 0x68d   : > { %v2995_v2 = vpack.c.bf16 %v2993_v62, %v2993_v62  ;;  %4469 = vmatpush3.bf16.msra.mxu1 %v5050_v40 }
 0x68e   : > { %v2996_v0 = vpack.c.bf16 %v2994_v63, %v2994_v63  ;;  %4470 = vmatprep.subr.bf16.mxu1 %v5051_v41 }
 0x690   : > { %3221 = vmatprep.mubr.bf16.mxu0 %v2996_v0 }
 0x691   : > { %3222 = vmatmul.mubr.bf16.vlgmr.msra.gmra.mrb[16].mxu0 %v2995_v2  ;;  %4471 = vmatpush3.bf16.msra.mxu1 %v5052_v42 }
 0x692   : > { %3696 = vmatpush1.bf16.msra.mxu0 %v4995_v1  ;;  %4472 = vmatprep.subr.bf16.mxu1 %v5053_v43 }
 0x693   : > { %3697 = vmatprep.subr.bf16.mxu0 %v5000_v3 }
 0x695   : > { %4473 = vmatpush3.bf16.msra.mxu1 %v5054_v44 }
 0x696   : > { %3698 = vmatpush1.bf16.msra.mxu0 %v4998_v4  ;;  %v5055_v4 = vld [vmem:[%s6650_s22 + $0x70] sm:$0xff]  }
 0x697   : > { %3699 = vmatprep.subr.bf16.mxu0 %v5003_v5  ;;  %v5056_v5 = vld [vmem:[%s6650_s22 + $0x30] sm:$0xff]   ;;  %4474 = vmatprep.subr.bf16.mxu1 %v5055_v4 }
 0x699   : > { %4475 = vmatpush3.bf16.msra.mxu1 %v5056_v5 }
 0x69a   : > { %3700 = vmatpush1.bf16.msra.mxu0 %v5001_v7  ;;  %v5057_v7 = vld [vmem:[%s6650_s22 + $0x78] sm:$0xff]  }
 0x69b   : > { %3701 = vmatprep.subr.bf16.mxu0 %v5006_v8  ;;  %v5058_v8 = vld [vmem:[%s6650_s22 + $0x38] sm:$0xff]   ;;  %4476 = vmatprep.subr.bf16.mxu1 %v5057_v7 }
 0x69d   : > { %4477 = vmatpush3.bf16.msra.mxu1 %v5058_v8 }
 0x69e   : > { %3702 = vmatpush1.bf16.msra.mxu0 %v5004_v9  ;;  %v3523_v9 = vld [vmem:[%s6649_s21] sm:$0x3] }
 0x69f   : > { %3703 = vmatprep.subr.bf16.mxu0 %v5009_v10  ;;  %v3528_v10 = vrot.slane %v3523_v9, %v5550_v48 }
 0x6a2   : > { %3704 = vmatpush1.bf16.msra.mxu0 %v5007_v12  ;;  %v3532_v12 = vrot.slane %v3523_v9, %v5770_v35 }
 0x6a3   : > { %3705 = vmatprep.subr.bf16.mxu0 %v5012_v13 }
 0x6a6   : > { %3706 = vmatpush1.bf16.msra.mxu0 %v5010_v14 }
 0x6a7   : > { %3707 = vmatprep.subr.bf16.mxu0 %v5015_v15 }
 0x6aa   : > { %3708 = vmatpush1.bf16.msra.mxu0 %v5013_v18 }
 0x6ab   : > { %3709 = vmatprep.subr.bf16.mxu0 %v5018_v19 }
 0x6ae   : > { %3710 = vmatpush1.bf16.msra.mxu0 %v5016_v20 }
 0x6af   : > { %3711 = vmatprep.subr.bf16.mxu0 %v5021_v6 }
 0x6b2   : > { %3712 = vmatpush1.bf16.msra.mxu0 %v5019_v51 }
 0x6b3   : > { %3713 = vmatprep.subr.bf16.mxu0 %v5024_v21 }
 0x6b6   : > { %3714 = vmatpush1.bf16.msra.mxu0 %v5022_v52 }
 0x6b7   : > { %3715 = vmatprep.subr.bf16.mxu0 %v5027_v22 }
 0x6ba   : > { %3716 = vmatpush1.bf16.msra.mxu0 %v5025_v23 }
 0x6bb   : > { %3717 = vmatprep.subr.bf16.mxu0 %v5030_v24 }
 0x6be   : > { %3718 = vmatpush1.bf16.msra.mxu0 %v5028_v25 }
 0x6bf   : > { %3719 = vmatprep.subr.bf16.mxu0 %v5033_v33 }
 0x6c2   : > { %3720 = vmatpush1.bf16.msra.mxu0 %v5031_v26 }
 0x6c3   : > { %3721 = vmatprep.subr.bf16.mxu0 %v5036_v27 }
 0x6c6   : > { %3722 = vmatpush1.bf16.msra.mxu0 %v5034_v28 }
 0x6c7   : > { %3723 = vmatprep.subr.bf16.mxu0 %v5039_v29 }
 0x6ca   : > { %3724 = vmatpush1.bf16.msra.mxu0 %v5037_v30 }
 0x6cb   : > { %3725 = vmatprep.subr.bf16.mxu0 %v5042_v31 }
 0x6ce   : > { %3726 = vmatpush1.bf16.msra.mxu0 %v5040_v32 }
 0x753   : > { %v3466_v47 = vpop.f32.mrb[16].mxu1 }
 0x754   : > { %v3468_v45 = vpop.f32.mrb[17].mxu1 }
 0x755   : > { %v3470_v46 = vpop.f32.mrb[18].mxu1 }
 0x756   : > { %v3471_v49 = vpop.f32.mrb[19].mxu1 }
 0x764   : > { %v3223_v53 = vpop.f32.mrb[16].mxu0 }
 0x765   : > { %v3267_v55 = vrot.slane %v3223_v53, %v5550_v48  ;;  %v3225_v54 = vpop.f32.mrb[17].mxu0 }
 0x766   : > { %v3271_v56 = vrot.slane %v3225_v54, %v5550_v48  ;;  %v3227_v58 = vpop.f32.mrb[18].mxu0  ;;  %v4433_v48 = vld [vmem:[%s6714_s24] ss:$0 sm:$0xff]  ;;  %s5114_s24 = scalar_lea.vmem %s5113_s5, 128 }
 0x767   : > { %v3467_v59 = vadd.f32 %v3466_v47, %v3267_v55  ;;  %v3228_v60 = vpop.f32.mrb[19].mxu0  ;;  %p5116_p1 = scmp.lt.s32.totalorder %s5114_s24, %s5108_s6 }
 0x768   : > { %v3469_v61 = vadd.f32 %v3468_v45, %v3271_v56 }
 0x769   : > { %v3485_v62 = vadd.f32 %v3478_v17, %v3467_v59  ;;  %p5117_p2 = por %p5116_p1, %p5115_p0 }
 0x76a   : > { %v3486_v63 = vadd.f32 %v3482_v57, %v3469_v61 }
 0x76b   : > { %v3487_v0 = vmax.f32 %v3485_v62, 0.0  ;;  %p5118_p3 = pnand %p5117_p2, %p5111_p13 }
 0x76c   : > { %v3488_v1 = vmax.f32 %v3486_v63, 0.0 }
 0x76d   : > { %v3489_v3 = vpack.c.bf16 %v3487_v0, %v3487_v0 }
 0x76e   : > { %v3490_v2 = vpack.c.bf16 %v3488_v1, %v3488_v1 }
 0x770   : > { %3727 = vmatprep.mubr.bf16.mxu0 %v3490_v2 }
 0x771   : > { %3728 = vmatmul.mubr.bf16.vlgmr.msra.gmra.mrb[20].mxu0 %v3489_v3 }
 0x844   : > { %v3729_v13 = vpop.f32.mrb[20].mxu0 }
 0x845   : > { %v3730_v14 = vadd.f32 %v3729_v13, %v3528_v10  ;;  %v3731_v15 = vpop.f32.mrb[21].mxu0 }
 0x846   : > { %v3732_v18 = vadd.f32 %v3731_v15, %v3532_v12  ;;  %v3733_v19 = vpop.f32.mrb[22].mxu0 }
 0x847   : > { %v3736_v20 = vmax.f32 %v3730_v14, 0.0  ;;  %v3734_v6 = vpop.f32.mrb[23].mxu0 }
 0x848   : > { %v3737_v51 = vmax.f32 %v3732_v18, 0.0 }
 0x849   : > { %v3738_v52 = vpack.c.bf16 %v3736_v20, %v3736_v20 }
 0x84a   : > { %v3739_v21 = vpack.c.bf16 %v3737_v51, %v3737_v51 }
 0x84c   : > { %3907 = vmatprep.mubr.bf16.mxu1 %v3739_v21 }
 0x84d   : > { %3908 = vmatmul.mubr.bf16.vlgmr.msra.gmra.mrb[20].mxu1 %v3738_v52 }
 0x920   : > { %v4478_v22 = vpop.f32.mrb[20].mxu1 }
 0x921   : > { %v4479_v35 = vpop.f32.mrb[21].mxu1 }
 0x922   : > { %v4480_v23 = vadd.f32 %v4479_v35, %v4478_v22  ;;  %v4481_v24 = vpop.f32.mrb[22].mxu1 }
 0x923   : > { %v4482_v25 = vpop.f32.mrb[23].mxu1 }
 0x924   : > { %v3910_v33 = vadd.f32 %v4480_v23, %v4433_v48 }
 0x926   : > { %v3915_v26 = vmax.f32 %v3910_v33, 0.0 }
 0x928   : > { %3916 = vst [vmem:[%s851_s2] sm:$0xf] %v3915_v26 }
 0x929   : > { %5121 = shalt.err (!%p5118_p3)
}
 0x92a   : > { %s5122_s7 = scalar_lea.hbm %s6581_s1, 64  ;;  %s5126_s3 = scalar_lea.hbm %s6716_s0, 128 }
 0x92b   : > { %p5123_p5 = scmp.ne.s32.totalorder %s6581_s1, %s5122_s7  ;;  %p5127_p9 = scmp.lt.u32.totalorder %s6581_s1, %s6716_s0 }
 0x92c   : > { %p5128_p12 = scmp.lt.u32.totalorder %s5126_s3, %s5122_s7  ;;  %p5130_p11 = scmp.lt.u32.totalorder %s5122_s7, %s6581_s1 }
 0x92d   : > { %p5124_p6 = pnand %p5123_p5, %p5366_p4 }
 0x92e   : > { %p5129_p10 = por %p5128_p12, %p5127_p9 }
 0x92f   : > { %p5125_p7 = pneg %p5124_p6 }
 0x930   : > { %p5131_p13 = por %p5130_p11, %p5129_p10 }
 0x932   : > { %p5132_p0 = pnand %p5131_p13, %p5125_p7 }
 0x934   : > { %5135 = shalt.err (!%p5132_p0)
}
 0x935   : > { %4496 = dma.vmem_to_hbm [thread:$0]  (%p5366_p4), %s6583_s30, 64, %s6581_s1, %s3918_s8  }
 0x936 PF: > { %s6717_s6 = sld [smem:[#allocation15_spill]]  ;;  %s6718_s5 = sld [smem:[#allocation10_spill]] }
 0x93c   : > { %p4508_p1 = scmp.ge.s32.totalorder %s6717_s6, 2  ;;  %s3950_s4 = sand.u32 1, %s6718_s5  }
 0x93d   : > { %s3951_s2 = scalar_lea.sflag [#allocation5], %s3950_s4 }
 0x93e   : > { %p4503_p2 = pnand %p4508_p1, %p5373_p8 }
 0x940   : > { %5165 = dma.done.wait (!%p4503_p2), %s3951_s2, 64  }
 0x941   : > { %5167 = vsyncadd (!%p4503_p2), %s3951_s2, 4294967232  ;;  %s40_s3 = sadd.s32 1, %s6717_s6   ;;  %s6720_s29 = sld [smem:[#allocation11_spill]] }
 0x942   : > { %p37_p3 = scmp.ge.s32.totalorder %s40_s3, 4   ;;  %s6721_s2 = sld [smem:[#allocation12_spill]] }
 0x943   : > { %s6722_s6 = sld [smem:[#allocation19_spill]]  ;;  %s6723_s30 = sld [smem:[#allocation14_spill]] }
 0x944   : > { %s6724_s7 = sld [smem:[#allocation16_spill]]  ;;  %39 = sbr.rel (!%p37_p3) target bundleno = 18 (0x12), region = 185 }
 0x94b   :  { %3963 = vsyncpa [#allocation5], 1 }
 0x94c   :  { %3965 = vsyncpa [#allocation5 + $0x1], 1 }
 0x94d   :  { %3966 = vsyncpa [#allocation6], 1 }
 0x94e   :  { %3968 = vsyncpa [#allocation6 + $0x1], 1 }

</bundles_post_ra>
